<compile_context>
chip_gen: v5e
topology: v5e:2x2
jax: 0.10.0
libtpu: 0.0.40
codegen_flags: <defaults>
</compile_context>

<pallas_src>
import jax
import jax.numpy as jnp
from jax.experimental import pallas as pl
from jax.experimental.pallas import tpu as pltpu


def _round_up(x, m):
    return ((x + m - 1) // m) * m


def _vmem_estimate_bytes(tile_m, n_emb, hidden, x_itemsize, w_itemsize,
                         out_itemsize):
    """Rough per-step VMEM footprint of the full-hidden kernel."""
    xbuf = 2 * tile_m * n_emb * x_itemsize            # x tile, double-buffered
    obuf = 2 * tile_m * n_emb * out_itemsize          # out tile, double-buffered
    wbuf = 2 * 2 * n_emb * hidden * w_itemsize        # W1 + W2 (counted x2)
    hbuf = tile_m * hidden * (4 + w_itemsize)         # f32 hidden + bf16 copy
    bbuf = 2 * 4 * (hidden + n_emb)                   # biases (f32)
    return xbuf + obuf + wbuf + hbuf + bbuf


def _ffn_kernel(x_ref, w1_ref, b1_ref, w2_ref, b2_ref, o_ref):
    # Cast x to the MXU dtype in-kernel (VPU op, hidden under the matmuls).
    x = x_ref[...].astype(w1_ref.dtype)
    # Layer 1: single full-hidden matmul, f32 accumulation in the MXU.
    h = jnp.dot(x, w1_ref[...], preferred_element_type=jnp.float32)
    h = jnp.maximum(h + b1_ref[...], 0.0)             # bias + ReLU in f32
    # Layer 2: downcast activations to weight dtype, single MXU matmul.
    y = jnp.dot(h.astype(w2_ref.dtype), w2_ref[...],
                preferred_element_type=jnp.float32)
    y = jnp.maximum(y + b2_ref[...], 0.0)             # bias + ReLU in f32
    o_ref[...] = y.astype(o_ref.dtype)


def feed_forward(x, w1, b1, w2, b2, *, tile_m=1024, use_bf16=True):
    """x: (..., n_emb). Weights stored (in_features, out_features).

    Pre-cast w1/w2 to bf16 once at setup (see init_params) to avoid a
    per-call HBM convert.
    """
    n_emb = x.shape[-1]
    hidden = w1.shape[1]
    lead_shape = x.shape[:-1]
    x2d = x.reshape(-1, n_emb)
    M = x2d.shape[0]

    compute_dtype = jnp.bfloat16 if use_bf16 else x.dtype
    w1_in = w1 if w1.dtype == compute_dtype else w1.astype(compute_dtype)
    w2_in = w2 if w2.dtype == compute_dtype else w2.astype(compute_dtype)
    b1_2d = b1.reshape(1, hidden).astype(jnp.float32)
    b2_2d = b2.reshape(1, n_emb).astype(jnp.float32)

    # --- tile_m selection -------------------------------------------------
    # 1) never larger than (8-rounded) M; keep a multiple of 8 (sublane).
    tile_m = max(8, min(tile_m, _round_up(M, 8)))
    tile_m = _round_up(tile_m, 8)
    # 2) keep grid_m >= 4 when possible so the "parallel" M axis can shard
    #    across both v7x TensorCores (and still pipeline >=2 blocks each).
    tile_m = min(tile_m, max(8, _round_up((M + 3) // 4, 8)))
    # 3) shrink until the VMEM estimate fits a budget safe on every
    #    generation (v7x has only 64 MiB physical per TensorCore).
    x_isz = jnp.dtype(x.dtype).itemsize
    w_isz = jnp.dtype(compute_dtype).itemsize
    o_isz = jnp.dtype(x.dtype).itemsize
    vmem_budget = 40 * 1024 * 1024
    while tile_m > 8 and _vmem_estimate_bytes(
            tile_m, n_emb, hidden, x_isz, w_isz, o_isz) > vmem_budget:
        tile_m = max(8, _round_up(tile_m // 2, 8))

    grid_m = pl.cdiv(M, tile_m)     # ragged last block handled by Pallas

    vmem_est = _vmem_estimate_bytes(tile_m, n_emb, hidden, x_isz, w_isz, o_isz)
    vmem_limit = int(min(48 * 1024 * 1024,
                         max(16 * 1024 * 1024, 1.5 * vmem_est)))

    cost = pl.CostEstimate(
        flops=4 * M * n_emb * hidden,                    # two matmuls
        transcendentals=0,
        bytes_accessed=(M * n_emb * x_isz                # x (read as-is)
                        + M * n_emb * o_isz              # out
                        + 2 * n_emb * hidden * w_isz     # W1 + W2
                        + 4 * (hidden + n_emb)),         # biases (f32)
    )

    out = pl.pallas_call(
        _ffn_kernel,
        out_shape=jax.ShapeDtypeStruct((M, n_emb), x.dtype),
        grid_spec=pltpu.PrefetchScalarGridSpec(
            num_scalar_prefetch=0,
            grid=(grid_m,),
            in_specs=[
                pl.BlockSpec((tile_m, n_emb), lambda i: (i, 0)),   # x tile
                pl.BlockSpec((n_emb, hidden), lambda i: (0, 0)),   # W1 resident
                pl.BlockSpec((1, hidden), lambda i: (0, 0)),       # b1
                pl.BlockSpec((hidden, n_emb), lambda i: (0, 0)),   # W2 resident
                pl.BlockSpec((1, n_emb), lambda i: (0, 0)),        # b2
            ],
            out_specs=pl.BlockSpec((tile_m, n_emb), lambda i: (i, 0)),
        ),
        compiler_params=pltpu.CompilerParams(
            dimension_semantics=("parallel",),
            vmem_limit_bytes=vmem_limit),
        cost_estimate=cost,
    )(x2d, w1_in, b1_2d, w2_in, b2_2d)

    return out.reshape(*lead_shape, n_emb)


def init_params(key, n_emb, *, compute_dtype=jnp.bfloat16):
    """nn.Linear-style init; weights stored (in, out) and pre-cast ONCE."""
    hidden = 4 * n_emb
    k1, k2, k3, k4 = jax.random.split(key, 4)
    bound1 = 1.0 / jnp.sqrt(n_emb)
    bound2 = 1.0 / jnp.sqrt(hidden)
    w1 = jax.random.uniform(k1, (n_emb, hidden), jnp.float32, -bound1, bound1)
    b1 = jax.random.uniform(k2, (hidden,), jnp.float32, -bound1, bound1)
    w2 = jax.random.uniform(k3, (hidden, n_emb), jnp.float32, -bound2, bound2)
    b2 = jax.random.uniform(k4, (n_emb,), jnp.float32, -bound2, bound2)
    return w1.astype(compute_dtype), b1, w2.astype(compute_dtype), b2


if __name__ == "__main__":
    n_emb = 384            # matches the module spec
    batch, seq = 2, 8

    key = jax.random.PRNGKey(0)
    kx, kp = jax.random.split(key)
    x = jax.random.normal(kx, (batch, seq, n_emb), jnp.float32)
    w1, b1, w2, b2 = init_params(kp, n_emb)   # weights pre-cast to bf16

    out = feed_forward(x, w1, b1, w2, b2)
    out = jax.block_until_ready(out)
    assert out.shape == (batch, seq, n_emb)

    # Reference with the same bf16-input / f32-accumulate math as the kernel.
    x2d = x.reshape(-1, n_emb).astype(jnp.bfloat16)
    h = jnp.maximum(
        jnp.dot(x2d, w1, preferred_element_type=jnp.float32) + b1, 0.0)
    ref = jnp.maximum(
        jnp.dot(h.astype(jnp.bfloat16), w2,
                preferred_element_type=jnp.float32) + b2,
        0.0).reshape(batch, seq, n_emb)
    assert jnp.allclose(out, ref, atol=1e-2, rtol=1e-2), (
        float(jnp.max(jnp.abs(out - ref))))

    # Loose sanity check against the pure f32 reference (bf16 rounding only).
    w1f = w1.astype(jnp.float32)
    w2f = w2.astype(jnp.float32)
    ref_f32 = jnp.maximum(jnp.maximum(x @ w1f + b1, 0.0) @ w2f + b2, 0.0)
    assert jnp.allclose(out, ref_f32, atol=5e-2, rtol=5e-2), (
        float(jnp.max(jnp.abs(out - ref_f32))))

    print("KERNEL_OK")
</pallas_src>

<mosaic_0001>
module attributes {stable_mosaic.version = 11 : i64} {
  func.func @_ffn_kernel(%arg0: i32, %arg1: memref<8x384xf32, #tpu.memory_space<vmem>>, %arg2: memref<384x1536xbf16, #tpu.memory_space<vmem>>, %arg3: memref<1x1536xf32, #tpu.memory_space<vmem>>, %arg4: memref<1536x384xbf16, #tpu.memory_space<vmem>>, %arg5: memref<1x384xf32, #tpu.memory_space<vmem>>, %arg6: memref<8x384xf32, #tpu.memory_space<vmem>>) attributes {dimension_semantics = [#tpu.dimension_semantics<parallel>], iteration_bounds = array<i64: 2>, scalar_prefetch = 0 : i64, scratch_operands = 0 : i64, tpu.core_type = #tpu.core_type<tc>, window_params = [{transform_indices = @transform_0, window_bounds = array<i64: 8, 384>}, {pipeline_mode = #tpu.pipeline_mode<synchronous>, transform_indices = @transform_1, window_bounds = array<i64: 384, 1536>}, {pipeline_mode = #tpu.pipeline_mode<synchronous>, transform_indices = @transform_2, window_bounds = array<i64: 1, 1536>}, {pipeline_mode = #tpu.pipeline_mode<synchronous>, transform_indices = @transform_3, window_bounds = array<i64: 1536, 384>}, {pipeline_mode = #tpu.pipeline_mode<synchronous>, transform_indices = @transform_4, window_bounds = array<i64: 1, 384>}, {transform_indices = @transform_5, window_bounds = array<i64: 8, 384>}]} {
    %c0 = arith.constant 0 : index
    %c0_0 = arith.constant 0 : index
    %0 = vector.load %arg1[%c0, %c0_0] : memref<8x384xf32, #tpu.memory_space<vmem>>, vector<8x384xf32>
    %1 = arith.truncf %0 : vector<8x384xf32> to vector<8x384xbf16>
    %c0_1 = arith.constant 0 : index
    %c0_2 = arith.constant 0 : index
    %2 = vector.load %arg2[%c0_1, %c0_2] : memref<384x1536xbf16, #tpu.memory_space<vmem>>, vector<384x1536xbf16>
    %cst = arith.constant dense<0.000000e+00> : vector<8x1536xf32>
    %3 = tpu.matmul %1, %2, %cst {dimension_numbers = #tpu.dot_dimension_numbers<[1], [0], [0], [1], [0, 0, 1, 1], [], []>} : vector<8x384xbf16>, vector<384x1536xbf16>, vector<8x1536xf32> -> vector<8x1536xf32>
    %c0_3 = arith.constant 0 : index
    %c0_4 = arith.constant 0 : index
    %4 = vector.load %arg3[%c0_3, %c0_4] : memref<1x1536xf32, #tpu.memory_space<vmem>>, vector<1x1536xf32>
    %5 = vector.broadcast %4 : vector<1x1536xf32> to vector<8x1536xf32>
    %6 = arith.addf %3, %5 : vector<8x1536xf32>
    %cst_5 = arith.constant 0.000000e+00 : f32
    %7 = vector.broadcast %cst_5 : f32 to vector<8x1536xf32>
    %8 = arith.maximumf %6, %7 : vector<8x1536xf32>
    %9 = arith.truncf %8 : vector<8x1536xf32> to vector<8x1536xbf16>
    %c0_6 = arith.constant 0 : index
    %c0_7 = arith.constant 0 : index
    %10 = vector.load %arg4[%c0_6, %c0_7] : memref<1536x384xbf16, #tpu.memory_space<vmem>>, vector<1536x384xbf16>
    %cst_8 = arith.constant dense<0.000000e+00> : vector<8x384xf32>
    %11 = tpu.matmul %9, %10, %cst_8 {dimension_numbers = #tpu.dot_dimension_numbers<[1], [0], [0], [1], [0, 0, 1, 1], [], []>} : vector<8x1536xbf16>, vector<1536x384xbf16>, vector<8x384xf32> -> vector<8x384xf32>
    %c0_9 = arith.constant 0 : index
    %c0_10 = arith.constant 0 : index
    %12 = vector.load %arg5[%c0_9, %c0_10] : memref<1x384xf32, #tpu.memory_space<vmem>>, vector<1x384xf32>
    %13 = vector.broadcast %12 : vector<1x384xf32> to vector<8x384xf32>
    %14 = arith.addf %11, %13 : vector<8x384xf32>
    %cst_11 = arith.constant 0.000000e+00 : f32
    %15 = vector.broadcast %cst_11 : f32 to vector<8x384xf32>
    %16 = arith.maximumf %14, %15 : vector<8x384xf32>
    %c0_12 = arith.constant 0 : index
    %c0_13 = arith.constant 0 : index
    %17 = vector.load %arg6[%c0_12, %c0_13] : memref<8x384xf32, #tpu.memory_space<vmem>>, vector<8x384xf32>
    tpu.vector_store %arg6[%c0_12, %c0_13], %16 {strides = array<i32>} : memref<8x384xf32, #tpu.memory_space<vmem>>, vector<8x384xf32>,
    return
  }
  func.func @transform_0(%arg0: i32) -> (i32, i32) {
    %c0_i32 = arith.constant 0 : i32
    %c0_i32_0 = arith.constant 0 : i32
    return %arg0, %c0_i32 : i32, i32
  }
  func.func @transform_1(%arg0: i32) -> (i32, i32) {
    %c0_i32 = arith.constant 0 : i32
    %c0_i32_0 = arith.constant 0 : i32
    %c0_i32_1 = arith.constant 0 : i32
    return %c0_i32, %c0_i32_0 : i32, i32
  }
  func.func @transform_2(%arg0: i32) -> (i32, i32) {
    %c0_i32 = arith.constant 0 : i32
    %c0_i32_0 = arith.constant 0 : i32
    %c0_i32_1 = arith.constant 0 : i32
    return %c0_i32, %c0_i32_0 : i32, i32
  }
  func.func @transform_3(%arg0: i32) -> (i32, i32) {
    %c0_i32 = arith.constant 0 : i32
    %c0_i32_0 = arith.constant 0 : i32
    %c0_i32_1 = arith.constant 0 : i32
    return %c0_i32, %c0_i32_0 : i32, i32
  }
  func.func @transform_4(%arg0: i32) -> (i32, i32) {
    %c0_i32 = arith.constant 0 : i32
    %c0_i32_0 = arith.constant 0 : i32
    %c0_i32_1 = arith.constant 0 : i32
    return %c0_i32, %c0_i32_0 : i32, i32
  }
  func.func @transform_5(%arg0: i32) -> (i32, i32) {
    %c0_i32 = arith.constant 0 : i32
    %c0_i32_0 = arith.constant 0 : i32
    return %arg0, %c0_i32 : i32, i32
  }
}

</mosaic_0001>

<bundles_post_ra>
// kernel: tpu_custom_call.1
= control target key start
LH: loop header
LB: loop body
LE: loop exit
PB: predicated region body
PF: predicated region fallthrough
CT: control target
= control target key end

     0   :  { %s8701_s0 = inlined_call_operand.hbm [shape: f32[16,384], index: 0, kind: input, shape index: {}]   ;;  %s8702_s1 = inlined_call_operand.hbm [shape: bf16[384,1536], index: 1, kind: input, shape index: {}]   ;;  %s8703_s2 = inlined_call_operand.hbm [shape: f32[1,1536], index: 2, kind: input, shape index: {}]   ;;  %s8704_s3 = inlined_call_operand.hbm [shape: bf16[1536,384], index: 3, kind: input, shape index: {}]   ;;  %s8705_s4 = inlined_call_operand.hbm [shape: f32[1,384], index: 4, kind: input, shape index: {}]   ;;  %s8706_s5 = inlined_call_operand.hbm [shape: f32[16,384], index: 5, kind: output, shape index: {}]  }
   0x1   :  { %8707 = sst [smem:[#allocation16_spill]] %s8702_s1 }
   0x2   :  { %10 = vsyncpa [#allocation3], 0 }
   0x3   :  { %12 = vsyncpa [#allocation3 + $0x1], 0 }
   0x4   :  { %13 = vsyncpa [#allocation6], 0 }
   0x5   :  { %14 = vsyncpa [#allocation9], 0 }
   0x6   :  { %15 = vsyncpa [#allocation4], 0 }
   0x7   :  { %17 = vsyncpa [#allocation4 + $0x1], 0  ;;  %s8343_s18 = smov 0   ;;  %s8345_s19 = smov 0  }
   0x8   :  { %s8347_s20 = smov 0   ;;  %s8349_s21 = smov 0  }
   0x9 LB: > { %s8708_s1 = sld [smem:[#allocation16_spill]]  ;;  %s8367_s25 = sadd.s32 4294967295, %s8303_s21   ;;  %s8303_s21 = sphi %s8349_s21, %s8719_s21   ;;  %s8299_s20 = sphi %s8347_s20, %s8718_s20   ;;  %s8295_s19 = sphi %s8345_s19, %s8717_s19   ;;  %s8291_s18 = sphi %s8343_s18, %s8716_s18  }
   0xa   : > { %p5087_p0 = scmp.ge.s32.totalorder %s8303_s21, 1  ;;  %p44_p1 = scmp.eq.s32.totalorder %s8367_s25, 0 }
   0xb   : > { %p164_p2 = scmp.lt.s32.totalorder %s8303_s21, 3  ;;  %s8305_s27 = smov [#allocation5]  }
   0xc   : > { %s177_s28 = sshll.u32 %s8305_s27, 4  ;;  %s201_s6 = sshll.u32 %s8704_s3, 4  ;;  %s178_s28 = int_to_ptr.vmem [resolvable:$true] %s177_s28  ;;  %s202_s6 = int_to_ptr.hbm [resolvable:$true] %s201_s6 }
   0xd   : > { %p8372_p3 = pnand %p5087_p0, %p164_p2  ;;  %s8306_s8 = smov [#allocation8]  }
   0xe   : > { %s203_s9 = sshll.u32 %s8306_s8, 4  ;;  %s8307_s10 = smov 768   ;;  %s204_s9 = int_to_ptr.vmem [resolvable:$true] %s203_s9 }
   0xf   : > { %s175_s24 = sshll.u32 %s8708_s1, 4  ;;  %p8006_p4 = pneg %p8372_p3  ;;  %s176_s24 = int_to_ptr.hbm [resolvable:$true] %s175_s24 }
  0x10   : > { %s8308_s11 = smov 48   ;;  %s8309_s12 = smov 192  }
  0x11   : > { %p8384_p6 = pnand %p8006_p4, %p44_p1  ;;  %s8310_s13 = smov 12  }
  0x12   : > { %s190_s16 = sshll.u32 %s8703_s2, 4  ;;  %s8311_s17 = smov [#allocation7]   ;;  %s191_s16 = int_to_ptr.hbm [resolvable:$true] %s190_s16 }
  0x13   : > { %8009 = dma.hbm_to_vmem [thread:$0]  (!%p8384_p6), %s176_s24, 36864, %s178_s28, [#allocation6], %s8307_s10, %s8307_s10, %s8308_s11  }
  0x14   : > { %8015 = dma.hbm_to_vmem [thread:$0]  (!%p8384_p6), %s202_s6, 36864, %s204_s9, [#allocation9], %s8309_s12, %s8309_s12, %s8310_s13  }
  0x15   : > { %s192_s22 = sshll.u32 %s8311_s17, 4  ;;  %s216_s27 = sshll.u32 %s8705_s4, 4  ;;  %s193_s22 = int_to_ptr.vmem [resolvable:$true] %s192_s22  ;;  %s217_s27 = int_to_ptr.hbm [resolvable:$true] %s216_s27 }
  0x16   : > { %8012 = dma.hbm_to_vmem [thread:$0]  (!%p8384_p6), %s191_s16, 192, %s193_s22, [#allocation6]  }
  0x17   : > { %s8312_s28 = smov [#allocation10]   ;;  %s5086_s30 = sadd.s32 4294967294, %s8303_s21  }
  0x18   : > { %s218_s29 = sshll.u32 %s8312_s28, 4  ;;  %s8404_s6 = sadd.s32 1, %s8303_s21   ;;  %s219_s29 = int_to_ptr.vmem [resolvable:$true] %s218_s29 }
  0x19   : > { %8018 = dma.hbm_to_vmem [thread:$0]  (!%p8384_p6), %s217_s27, 48, %s219_s29, [#allocation9]  }
  0x1a   : > { %s27_s8 = ssub.s32 %s8303_s21, %s8404_s6  ;;  %s30_s9 = sadd.s32 1, %s8299_s20 }
  0x1b   : > { %p28_p7 = scmp.eq.s32.totalorder %s27_s8, 0  ;;  %p37_p8 = scmp.ne.s32.totalorder %s8299_s20, %s8295_s19 }
  0x1c   : > { %p38_p9 = scmp.eq.s32.totalorder %s8303_s21, 0  ;;  %p43_p10 = scmp.ne.s32.totalorder %s8295_s19, %s8291_s18 }
  0x1d   : > { %s8415_s10 = scalar_select %p28_p7, %s8299_s20, %s30_s9  }
  0x1e   : > { %p39_p11 = por %p38_p9, %p37_p8  ;;  %p8419_p12 = por %p44_p1, %p43_p10 }
  0x1f   : > { %p151_p13 = scmp.eq.s32.totalorder %s8367_s25, 1  ;;  %p157_p0 = scmp.eq.s32.totalorder %s5086_s30, 1 }
  0x20   : > { %p8031_p2 = scmp.lt.s32.totalorder %s8303_s21, 2  ;;  %s229_s7 = sand.u32 1, %s8299_s20  }
  0x21   : > { %p8426_p4 = por %p151_p13, %p37_p8  ;;  %p8430_p6 = por %p157_p0, %p43_p10 }
  0x22   : > { %s7982_s14 = smul.u32 24, %s229_s7  ;;  %p8435_p7 = pnand %p8031_p2, %p39_p11 }
  0x23   : > { %s7983_s15 = smul.u32 24, %s8303_s21  ;;  %s230_s29 = scalar_lea.sflag [#allocation3], %s229_s7 }
  0x24   : > { %s233_s24 = scalar_lea.vmem [#allocation2], %s7982_s14  ;;  %p8203_p9 = pneg %p8435_p7 }
  0x25   : > { %s238_s23 = scalar_lea.hbm %s8701_s0, %s7983_s15  ;;  %s242_s27 = sshll.u32 %s233_s24, 4  ;;  %s243_s27 = int_to_ptr.vmem [resolvable:$true] %s242_s27 }
  0x26   : > { %s240_s28 = sshll.u32 %s238_s23, 4  ;;  %s8206_s17 = scalar_lea.hbm %s8701_s0, 48  ;;  %s241_s28 = int_to_ptr.hbm [resolvable:$true] %s240_s28 }
  0x27   : > { %s8199_s30 = sshra.s32 %s241_s28, 4  ;;  %s8200_s30 = int_to_ptr.hbm [resolvable:$true] %s8199_s30 }
  0x28   : > { %s8201_s8 = scalar_lea.hbm %s8200_s30, 24  ;;  %p8207_p13 = scmp.lt.s32.totalorder %s8200_s30, %s8701_s0 }
  0x29   : > { %p8202_p8 = scmp.ne.s32.totalorder %s8200_s30, %s8201_s8  ;;  %p8208_p0 = scmp.lt.s32.totalorder %s8206_s17, %s8201_s8 }
  0x2b   : > { %p8204_p10 = pnand %p8203_p9, %p8202_p8  ;;  %p8209_p2 = por %p8208_p0, %p8207_p13 }
  0x2d   : > { %p8205_p11 = pneg %p8204_p10 }
  0x2f   : > { %p8210_p5 = pnand %p8209_p2, %p8205_p11 }
  0x31   : > { %8213 = shalt.err (!%p8210_p5)
}
  0x32   : > { %8022 = dma.hbm_to_vmem [thread:$0]  (!%p8435_p7), %s241_s28, 384, %s243_s27, %s230_s29  }
  0x33   : > { %251 = sbr.rel (%p8372_p3) target bundleno = 800 (0x320), region = 40  ;;  %s8455_s7 = sand.u32 (!%p8372_p3), 1, %s8295_s19  }
  0x34   : > { %s7984_s1 = smul.u32 (!%p8372_p3), 24, %s8455_s7  ;;  %s254_s14 = scalar_lea.sflag (!%p8372_p3), [#allocation3], %s8455_s7 }
  0x36   : > { %s8461_s23 = scalar_lea.vmem (!%p8372_p3), [#allocation2], %s7984_s1 }
  0x38   : > { %8274 = dma.done.wait (%p8419_p12), %s254_s14, 384  }
  0x39   : > { %8276 = vsyncadd (%p8419_p12), %s254_s14, 4294966912 }
  0x3a   : > { %8278 = dma.done.wait (%p44_p1), [#allocation6], 37056  }
  0x3b   : > { %8280 = vsyncadd (%p44_p1), [#allocation6], 4294930240 }
  0x3c   : > { %8282 = dma.done.wait (%p44_p1), [#allocation9], 36912  }
  0x3d   : > { %8284 = vsyncadd (%p44_p1), [#allocation9], 4294930384  ;;  %v5437_v0 = vld [vmem:[#allocation5 + $0x2a0] sm:$0xf]  ;;  %v7496_v1 = vld [vmem:[#allocation5 + $0x2cc] sm:$0xf0] }
  0x3e   : > { %v5821_v2 = vld [vmem:[#allocation5 + $0x5a0] sm:$0xf]  ;;  %v5438_v3 = vor.u32 %v7496_v1, %v5437_v0  ;;  %v7592_v4 = vld [vmem:[#allocation5 + $0x5cc] sm:$0xf0]  ;;  %v7490_v9 = vld [vmem:[#allocation5 + $0x2a4] sm:$0xf] }
  0x3f   : > { %v6205_v5 = vld [vmem:[#allocation5 + $0x8a0] sm:$0xf]  ;;  %v7688_v6 = vld [vmem:[#allocation5 + $0x8cc] sm:$0xf0]  ;;  %v5822_v7 = vor.u32 %v7592_v4, %v5821_v2  ;;  %v5439_v10 = vld [vmem:[#allocation5 + $0x2d0] sm:$0xf0] }
  0x40   : > { %v6206_v8 = vor.u32 %v7688_v6, %v6205_v5  ;;  %v5389_v11 = vld [vmem:[#allocation5 + $0x240] sm:$0xf]  ;;  %2067 = vmatpush.bf16.msra.mxu0 %v5438_v3  ;;  %v5442_v12 = vor.u32 %v7490_v9, %v5439_v10  ;;  %v7484_v13 = vld [vmem:[#allocation5 + $0x26c] sm:$0xf0]  ;;  %v7478_v20 = vld [vmem:[#allocation5 + $0x244] sm:$0xf] }
  0x41   : > { %v5773_v14 = vld [vmem:[#allocation5 + $0x540] sm:$0xf]  ;;  %v7580_v15 = vld [vmem:[#allocation5 + $0x56c] sm:$0xf0]  ;;  %2080 = vmatpush.bf16.msra.mxu1 %v5822_v7  ;;  %v5390_v16 = vor.u32 %v7484_v13, %v5389_v11  ;;  %v5391_v22 = vld [vmem:[#allocation5 + $0x270] sm:$0xf0] }
  0x42   : > { %2093 = vmatpush.bf16.msra.mxu2 %v6206_v8  ;;  %v5774_v17 = vor.u32 %v7580_v15, %v5773_v14  ;;  %v6157_v18 = vld [vmem:[#allocation5 + $0x840] sm:$0xf]  ;;  %v7676_v19 = vld [vmem:[#allocation5 + $0x86c] sm:$0xf0]  ;;  %2106 = vmatpush.bf16.msra.mxu3 %v5442_v12  ;;  %v5394_v25 = vor.u32 %v7478_v20, %v5391_v22  ;;  %v7466_v31 = vld [vmem:[#allocation5 + $0x1e4] sm:$0xf] }
  0x43   : > { %v6158_v21 = vor.u32 %v7676_v19, %v6157_v18  ;;  %v5341_v23 = vld [vmem:[#allocation5 + $0x1e0] sm:$0xf]  ;;  %v7472_v24 = vld [vmem:[#allocation5 + $0x20c] sm:$0xf0]  ;;  %v5343_v32 = vld [vmem:[#allocation5 + $0x210] sm:$0xf0] }
  0x44   : > { %v5725_v26 = vld [vmem:[#allocation5 + $0x4e0] sm:$0xf]  ;;  %v7568_v27 = vld [vmem:[#allocation5 + $0x50c] sm:$0xf0]  ;;  %2068 = vmatpush.bf16.msra.mxu0 %v5390_v16  ;;  %v5342_v29 = vor.u32 %v7472_v24, %v5341_v23  ;;  %v5346_v38 = vor.u32 %v7466_v31, %v5343_v32  ;;  %v7454_v42 = vld [vmem:[#allocation5 + $0x184] sm:$0xf] }
  0x45   : > { %v6109_v28 = vld [vmem:[#allocation5 + $0x7e0] sm:$0xf]  ;;  %v7664_v30 = vld [vmem:[#allocation5 + $0x80c] sm:$0xf0]  ;;  %2081 = vmatpush.bf16.msra.mxu1 %v5774_v17  ;;  %v5726_v33 = vor.u32 %v7568_v27, %v5725_v26  ;;  %v5295_v43 = vld [vmem:[#allocation5 + $0x1b0] sm:$0xf0] }
  0x46   : > { %2094 = vmatpush.bf16.msra.mxu2 %v6158_v21  ;;  %v6110_v34 = vor.u32 %v7664_v30, %v6109_v28  ;;  %v5293_v35 = vld [vmem:[#allocation5 + $0x180] sm:$0xf]  ;;  %v7460_v36 = vld [vmem:[#allocation5 + $0x1ac] sm:$0xf0]  ;;  %2107 = vmatpush.bf16.msra.mxu3 %v5394_v25  ;;  %v5298_v50 = vor.u32 %v7454_v42, %v5295_v43  ;;  %v7442_v54 = vld [vmem:[#allocation5 + $0x124] sm:$0xf] }
  0x47   : > { %v5677_v37 = vld [vmem:[#allocation5 + $0x480] sm:$0xf]  ;;  %v7556_v39 = vld [vmem:[#allocation5 + $0x4ac] sm:$0xf0]  ;;  %v5294_v44 = vor.u32 %v7460_v36, %v5293_v35  ;;  %v5247_v55 = vld [vmem:[#allocation5 + $0x150] sm:$0xf0] }
  0x48   : > { %v6061_v40 = vld [vmem:[#allocation5 + $0x780] sm:$0xf]  ;;  %v7652_v41 = vld [vmem:[#allocation5 + $0x7ac] sm:$0xf0]  ;;  %2069 = vmatpush.bf16.msra.mxu0 %v5342_v29  ;;  %v5678_v45 = vor.u32 %v7556_v39, %v5677_v37  ;;  %v5250_v62 = vor.u32 %v7442_v54, %v5247_v55  ;;  %v7430_v2 = vld [vmem:[#allocation5 + $0xc4] sm:$0xf] }
  0x49   : > { %2082 = vmatpush.bf16.msra.mxu1 %v5726_v33  ;;  %v6062_v46 = vor.u32 %v7652_v41, %v6061_v40  ;;  %v5245_v47 = vld [vmem:[#allocation5 + $0x120] sm:$0xf]  ;;  %v7448_v48 = vld [vmem:[#allocation5 + $0x14c] sm:$0xf0]  ;;  %v5199_v3 = vld [vmem:[#allocation5 + $0xf0] sm:$0xf0] }
  0x4a   : > { %2095 = vmatpush.bf16.msra.mxu2 %v6110_v34  ;;  %v5629_v49 = vld [vmem:[#allocation5 + $0x420] sm:$0xf]  ;;  %2108 = vmatpush.bf16.msra.mxu3 %v5346_v38  ;;  %v7544_v51 = vld [vmem:[#allocation5 + $0x44c] sm:$0xf0]  ;;  %v5246_v56 = vor.u32 %v7448_v48, %v5245_v47  ;;  %v5202_v10 = vor.u32 %v7430_v2, %v5199_v3  ;;  %v7418_v14 = vld [vmem:[#allocation5 + $0x64] sm:$0xf] }
  0x4b   : > { %v6013_v52 = vld [vmem:[#allocation5 + $0x720] sm:$0xf]  ;;  %v7640_v53 = vld [vmem:[#allocation5 + $0x74c] sm:$0xf0]  ;;  %v5630_v57 = vor.u32 %v7544_v51, %v5629_v49  ;;  %v5151_v15 = vld [vmem:[#allocation5 + $0x90] sm:$0xf0] }
  0x4c   : > { %2070 = vmatpush.bf16.msra.mxu0 %v5294_v44  ;;  %v6014_v58 = vor.u32 %v7640_v53, %v6013_v52  ;;  %v5197_v59 = vld [vmem:[#allocation5 + $0xc0] sm:$0xf]  ;;  %v7436_v60 = vld [vmem:[#allocation5 + $0xec] sm:$0xf0]  ;;  %v5154_v24 = vor.u32 %v7418_v14, %v5151_v15  ;;  %v7406_v26 = vld [vmem:[#allocation5 + $0x4] sm:$0xf] }
  0x4d   : > { %2083 = vmatpush.bf16.msra.mxu1 %v5678_v45  ;;  %v5581_v61 = vld [vmem:[#allocation5 + $0x3c0] sm:$0xf]  ;;  %v7532_v63 = vld [vmem:[#allocation5 + $0x3ec] sm:$0xf0]  ;;  %v5198_v4 = vor.u32 %v7436_v60, %v5197_v59  ;;  %v5103_v27 = vld [vmem:[#allocation5 + $0x30] sm:$0xf0] }
  0x4e   : > { %2096 = vmatpush.bf16.msra.mxu2 %v6062_v46  ;;  %2109 = vmatpush.bf16.msra.mxu3 %v5298_v50  ;;  %v5965_v0 = vld [vmem:[#allocation5 + $0x6c0] sm:$0xf]  ;;  %v7628_v1 = vld [vmem:[#allocation5 + $0x6ec] sm:$0xf0]  ;;  %v5582_v5 = vor.u32 %v7532_v63, %v5581_v61  ;;  %v7586_v28 = vld [vmem:[#allocation5 + $0x5a4] sm:$0xf]  ;;  %v5106_v39 = vor.u32 %v7406_v26, %v5103_v27 }
  0x4f   : > { %v5966_v6 = vor.u32 %v7628_v1, %v5965_v0  ;;  %v5149_v7 = vld [vmem:[#allocation5 + $0x60] sm:$0xf]  ;;  %v7424_v8 = vld [vmem:[#allocation5 + $0x8c] sm:$0xf0]  ;;  %v5823_v29 = vld [vmem:[#allocation5 + $0x5d0] sm:$0xf0] }
  0x50   : > { %2071 = vmatpush.bf16.msra.mxu0 %v5246_v56  ;;  %v5533_v9 = vld [vmem:[#allocation5 + $0x360] sm:$0xf]  ;;  %v7520_v11 = vld [vmem:[#allocation5 + $0x38c] sm:$0xf0]  ;;  %v5150_v16 = vor.u32 %v7424_v8, %v5149_v7  ;;  %v7682_v30 = vld [vmem:[#allocation5 + $0x8a4] sm:$0xf]  ;;  %v5826_v40 = vor.u32 %v7586_v28, %v5823_v29 }
  0x51   : > { %2084 = vmatpush.bf16.msra.mxu1 %v5630_v57  ;;  %v5917_v12 = vld [vmem:[#allocation5 + $0x660] sm:$0xf]  ;;  %v7616_v13 = vld [vmem:[#allocation5 + $0x68c] sm:$0xf0]  ;;  %v5534_v19 = vor.u32 %v7520_v11, %v5533_v9  ;;  %v6207_v32 = vld [vmem:[#allocation5 + $0x8d0] sm:$0xf0] }
  0x52   : > { %2097 = vmatpush.bf16.msra.mxu2 %v6014_v58  ;;  %2110 = vmatpush.bf16.msra.mxu3 %v5250_v62  ;;  %v5101_v17 = vld [vmem:[#allocation5] sm:$0xf]  ;;  %v7412_v18 = vld [vmem:[#allocation5 + $0x2c] sm:$0xf0]  ;;  %v5918_v20 = vor.u32 %v7616_v13, %v5917_v12  ;;  %v5445_v33 = vld [vmem:[#allocation5 + $0x2a8] sm:$0xf]  ;;  %v6210_v41 = vor.u32 %v7682_v30, %v6207_v32 }
  0x53   : > { %v5485_v21 = vld [vmem:[#allocation5 + $0x300] sm:$0xf]  ;;  %v7508_v22 = vld [vmem:[#allocation5 + $0x32c] sm:$0xf0]  ;;  %v5102_v31 = vor.u32 %v7412_v18, %v5101_v17  ;;  %v7497_v34 = vld [vmem:[#allocation5 + $0x2d4] sm:$0xf0] }
  0x54   : > { %2072 = vmatpush.bf16.msra.mxu0 %v5198_v4  ;;  %v5869_v23 = vld [vmem:[#allocation5 + $0x600] sm:$0xf]  ;;  %v7604_v25 = vld [vmem:[#allocation5 + $0x62c] sm:$0xf0]  ;;  %v5486_v35 = vor.u32 %v7508_v22, %v5485_v21  ;;  %v5829_v37 = vld [vmem:[#allocation5 + $0x5a8] sm:$0xf]  ;;  %v5446_v42 = vor.u32 %v7497_v34, %v5445_v33 }
  0x55   : > { %2085 = vmatpush.bf16.msra.mxu1 %v5582_v5  ;;  %v5870_v36 = vor.u32 %v7604_v25, %v5869_v23  ;;  %v7593_v38 = vld [vmem:[#allocation5 + $0x5d4] sm:$0xf0]  ;;  %v7574_v43 = vld [vmem:[#allocation5 + $0x544] sm:$0xf]  ;;  %v5775_v44 = vld [vmem:[#allocation5 + $0x570] sm:$0xf0] }
  0x56   : > { %2098 = vmatpush.bf16.msra.mxu2 %v5966_v6  ;;  %2111 = vmatpush.bf16.msra.mxu3 %v5202_v10  ;;  %v7670_v45 = vld [vmem:[#allocation5 + $0x844] sm:$0xf]  ;;  %v5830_v46 = vor.u32 %v7593_v38, %v5829_v37  ;;  %v6159_v47 = vld [vmem:[#allocation5 + $0x870] sm:$0xf0]  ;;  %v5397_v48 = vld [vmem:[#allocation5 + $0x248] sm:$0xf]  ;;  %v5778_v52 = vor.u32 %v7574_v43, %v5775_v44 }
  0x57   : > { %v7485_v49 = vld [vmem:[#allocation5 + $0x274] sm:$0xf0]  ;;  %v5781_v50 = vld [vmem:[#allocation5 + $0x548] sm:$0xf]  ;;  %v7562_v53 = vld [vmem:[#allocation5 + $0x4e4] sm:$0xf]  ;;  %v6162_v54 = vor.u32 %v7670_v45, %v6159_v47 }
  0x58   : > { %2073 = vmatpush.bf16.msra.mxu0 %v5150_v16  ;;  %v7581_v51 = vld [vmem:[#allocation5 + $0x574] sm:$0xf0]  ;;  %v5398_v55 = vor.u32 %v7485_v49, %v5397_v48  ;;  %v5727_v56 = vld [vmem:[#allocation5 + $0x510] sm:$0xf0]  ;;  %v7658_v57 = vld [vmem:[#allocation5 + $0x7e4] sm:$0xf] }
  0x59   : > { %2086 = vmatpush.bf16.msra.mxu1 %v5534_v19  ;;  %v6111_v58 = vld [vmem:[#allocation5 + $0x810] sm:$0xf0]  ;;  %v5782_v59 = vor.u32 %v7581_v51, %v5781_v50  ;;  %v5349_v60 = vld [vmem:[#allocation5 + $0x1e8] sm:$0xf]  ;;  %v7473_v61 = vld [vmem:[#allocation5 + $0x214] sm:$0xf0]  ;;  %v5730_v0 = vor.u32 %v7562_v53, %v5727_v56 }
  0x5a   : > { %2099 = vmatpush.bf16.msra.mxu2 %v5918_v20  ;;  %2112 = vmatpush.bf16.msra.mxu3 %v5154_v24  ;;  %v5733_v62 = vld [vmem:[#allocation5 + $0x4e8] sm:$0xf]  ;;  %v7569_v63 = vld [vmem:[#allocation5 + $0x514] sm:$0xf0]  ;;  %v6114_v1 = vor.u32 %v7658_v57, %v6111_v58  ;;  %v5350_v4 = vor.u32 %v7473_v61, %v5349_v60  ;;  %v7550_v5 = vld [vmem:[#allocation5 + $0x484] sm:$0xf] }
  0x5b   : > { %v307_v2 = vld [vmem:[%s8461_s23 + $0x10] sm:$0xff]  ;;  %v305_v3 = vld [vmem:[%s8461_s23] sm:$0xff]  ;;  %v5734_v10 = vor.u32 %v7569_v63, %v5733_v62  ;;  %v306_v16 = vld [vmem:[%s8461_s23 + $0x8] sm:$0xff]  ;;  %s8659_s26 = scalar_lea.vmem [#allocation11], %s7984_s1  ;;  %s7985_s11 = smul.u32 24, %s8367_s25 }
  0x5c   : > { %2074 = vmatpush.bf16.msra.mxu0 %v5102_v31  ;;  %v5679_v6 = vld [vmem:[#allocation5 + $0x4b0] sm:$0xf0]  ;;  %v7646_v7 = vld [vmem:[#allocation5 + $0x784] sm:$0xf]  ;;  %v8477_v8 = vpack.c.bf16 %v307_v2, %v307_v2  ;;  %v8479_v9 = vpack.c.bf16 %v305_v3, %v305_v3  ;;  %v5301_v12 = vld [vmem:[#allocation5 + $0x188] sm:$0xf]  ;;  %v8485_v18 = vpack.c.bf16 %v306_v16, %v306_v16 }
  0x5d   : > { %2087 = vmatpush.bf16.msra.mxu1 %v5486_v35  ;;  %v6063_v11 = vld [vmem:[#allocation5 + $0x7b0] sm:$0xf0]  ;;  %v7461_v13 = vld [vmem:[#allocation5 + $0x1b4] sm:$0xf0]  ;;  %v5685_v14 = vld [vmem:[#allocation5 + $0x488] sm:$0xf]  ;;  %v5682_v17 = vor.u32 %v7550_v5, %v5679_v6  ;;  %s4973_s27 = scalar_lea.hbm %s8706_s5, %s7985_s11 }
  0x5e   : > { %2100 = vmatpush.bf16.msra.mxu2 %v5870_v36  ;;  %2113 = vmatpush.bf16.msra.mxu3 %v5106_v39  ;;  %v7557_v15 = vld [vmem:[#allocation5 + $0x4b4] sm:$0xf0]  ;;  %v6066_v19 = vor.u32 %v7646_v7, %v6063_v11  ;;  %v5302_v20 = vor.u32 %v7461_v13, %v5301_v12  ;;  %v7538_v21 = vld [vmem:[#allocation5 + $0x424] sm:$0xf]  ;;  %v5631_v22 = vld [vmem:[#allocation5 + $0x450] sm:$0xf0] }
  0x5f   : > { %2075 = vmatmul.bf16.vlgmr.msra.gmra.mxu0 %v8479_v9  ;;  %v7634_v23 = vld [vmem:[#allocation5 + $0x724] sm:$0xf]  ;;  %v5686_v24 = vor.u32 %v7557_v15, %v5685_v14  ;;  %v6015_v25 = vld [vmem:[#allocation5 + $0x750] sm:$0xf0]  ;;  %v5253_v26 = vld [vmem:[#allocation5 + $0x128] sm:$0xf]  ;;  %v5634_v30 = vor.u32 %v7538_v21, %v5631_v22 }
  0x60   : > { %2119 = vmatpush.bf16.msrb.mxu0 %v5826_v40  ;;  %v7449_v27 = vld [vmem:[#allocation5 + $0x154] sm:$0xf0]  ;;  %2088 = vmatmul.bf16.vlgmr.msra.gmra.mxu1 %v8485_v18  ;;  %v5637_v28 = vld [vmem:[#allocation5 + $0x428] sm:$0xf]  ;;  %v6018_v31 = vor.u32 %v7634_v23, %v6015_v25  ;;  %v7526_v33 = vld [vmem:[#allocation5 + $0x3c4] sm:$0xf] }
  0x61   : > { %2132 = vmatpush.bf16.msrb.mxu1 %v6210_v41  ;;  %2101 = vmatmul.bf16.vlgmr.msra.gmra.mxu2 %v8477_v8  ;;  %v7545_v29 = vld [vmem:[#allocation5 + $0x454] sm:$0xf0]  ;;  %v5254_v32 = vor.u32 %v7449_v27, %v5253_v26  ;;  %v5583_v34 = vld [vmem:[#allocation5 + $0x3f0] sm:$0xf0]  ;;  %v7622_v35 = vld [vmem:[#allocation5 + $0x6c4] sm:$0xf] }
  0x62   : > { %2145 = vmatpush.bf16.msrb.mxu2 %v5446_v42  ;;  %2158 = vmatpush.bf16.msrb.mxu3 %v5830_v46  ;;  %v5638_v36 = vor.u32 %v7545_v29, %v5637_v28  ;;  %v5967_v37 = vld [vmem:[#allocation5 + $0x6f0] sm:$0xf0]  ;;  %v5205_v38 = vld [vmem:[#allocation5 + $0xc8] sm:$0xf]  ;;  %v7437_v39 = vld [vmem:[#allocation5 + $0xf4] sm:$0xf0]  ;;  %v5586_v42 = vor.u32 %v7526_v33, %v5583_v34 }
  0x63   : > { %2114 = vmatmul.bf16.vlgmr.msra.gmra.mxu3 %v8479_v9  ;;  %v5589_v40 = vld [vmem:[#allocation5 + $0x3c8] sm:$0xf]  ;;  %v7533_v41 = vld [vmem:[#allocation5 + $0x3f4] sm:$0xf0]  ;;  %v5970_v43 = vor.u32 %v7622_v35, %v5967_v37  ;;  %v5206_v44 = vor.u32 %v7437_v39, %v5205_v38  ;;  %v7514_v45 = vld [vmem:[#allocation5 + $0x364] sm:$0xf] }
  0x64   : > { %2120 = vmatpush.bf16.msrb.mxu0 %v5778_v52  ;;  %v5535_v46 = vld [vmem:[#allocation5 + $0x390] sm:$0xf0]  ;;  %v7610_v47 = vld [vmem:[#allocation5 + $0x664] sm:$0xf]  ;;  %v5590_v48 = vor.u32 %v7533_v41, %v5589_v40  ;;  %v5157_v50 = vld [vmem:[#allocation5 + $0x68] sm:$0xf] }
  0x65   : > { %2133 = vmatpush.bf16.msrb.mxu1 %v6162_v54  ;;  %v5919_v49 = vld [vmem:[#allocation5 + $0x690] sm:$0xf0]  ;;  %v7425_v51 = vld [vmem:[#allocation5 + $0x94] sm:$0xf0]  ;;  %v5541_v52 = vld [vmem:[#allocation5 + $0x368] sm:$0xf]  ;;  %v5538_v54 = vor.u32 %v7514_v45, %v5535_v46 }
  0x66   : > { %2146 = vmatpush.bf16.msrb.mxu2 %v5398_v55  ;;  %2159 = vmatpush.bf16.msrb.mxu3 %v5782_v59  ;;  %v7521_v53 = vld [vmem:[#allocation5 + $0x394] sm:$0xf0]  ;;  %v7502_v55 = vld [vmem:[#allocation5 + $0x304] sm:$0xf]  ;;  %v5487_v56 = vld [vmem:[#allocation5 + $0x330] sm:$0xf0]  ;;  %v5922_v57 = vor.u32 %v7610_v47, %v5919_v49  ;;  %v5158_v58 = vor.u32 %v7425_v51, %v5157_v50 }
  0x67   : > { %v7598_v59 = vld [vmem:[#allocation5 + $0x604] sm:$0xf]  ;;  %v5871_v60 = vld [vmem:[#allocation5 + $0x630] sm:$0xf0]  ;;  %v5109_v61 = vld [vmem:[#allocation5 + $0x8] sm:$0xf]  ;;  %v5542_v62 = vor.u32 %v7521_v53, %v5541_v52  ;;  %v5490_v5 = vor.u32 %v7502_v55, %v5487_v56 }
  0x68   : > { %2121 = vmatpush.bf16.msrb.mxu0 %v5730_v0  ;;  %v7413_v63 = vld [vmem:[#allocation5 + $0x34] sm:$0xf0]  ;;  %v5493_v0 = vld [vmem:[#allocation5 + $0x308] sm:$0xf]  ;;  %v5447_v6 = vld [vmem:[#allocation5 + $0x2d8] sm:$0xf0]  ;;  %v5874_v11 = vor.u32 %v7598_v59, %v5871_v60 }
  0x69   : > { %2134 = vmatpush.bf16.msrb.mxu1 %v6114_v1  ;;  %v7509_v1 = vld [vmem:[#allocation5 + $0x334] sm:$0xf0]  ;;  %v6213_v2 = vld [vmem:[#allocation5 + $0x8a8] sm:$0xf]  ;;  %v7587_v7 = vld [vmem:[#allocation5 + $0x5ac] sm:$0xf]  ;;  %v5110_v12 = vor.u32 %v7413_v63, %v5109_v61 }
  0x6a   : > { %2147 = vmatpush.bf16.msrb.mxu2 %v5350_v4  ;;  %2160 = vmatpush.bf16.msrb.mxu3 %v5734_v10  ;;  %v7689_v3 = vld [vmem:[#allocation5 + $0x8d4] sm:$0xf0]  ;;  %v7491_v4 = vld [vmem:[#allocation5 + $0x2ac] sm:$0xf]  ;;  %v5831_v10 = vld [vmem:[#allocation5 + $0x5d8] sm:$0xf0]  ;;  %v5494_v15 = vor.u32 %v7509_v1, %v5493_v0 }
  0x6b   : > { %v7683_v13 = vld [vmem:[#allocation5 + $0x8ac] sm:$0xf]  ;;  %v6215_v14 = vld [vmem:[#allocation5 + $0x8d8] sm:$0xf0]  ;;  %v6214_v16 = vor.u32 %v7689_v3, %v6213_v2  ;;  %v7677_v21 = vld [vmem:[#allocation5 + $0x874] sm:$0xf0] }
  0x6c   : > { %2122 = vmatpush.bf16.msrb.mxu0 %v5682_v17  ;;  %v5450_v17 = vor.u32 %v7491_v4, %v5447_v6  ;;  %v7479_v22 = vld [vmem:[#allocation5 + $0x24c] sm:$0xf]  ;;  %v6218_v23 = vor.u32 %v7683_v13, %v6215_v14  ;;  %v5783_v26 = vld [vmem:[#allocation5 + $0x578] sm:$0xf0]  ;;  %v7665_v33 = vld [vmem:[#allocation5 + $0x814] sm:$0xf0] }
  0x6d   : > { %2135 = vmatpush.bf16.msrb.mxu1 %v6066_v19  ;;  %v5834_v19 = vor.u32 %v7587_v7, %v5831_v10  ;;  %v7575_v25 = vld [vmem:[#allocation5 + $0x54c] sm:$0xf]  ;;  %v6167_v28 = vld [vmem:[#allocation5 + $0x878] sm:$0xf0]  ;;  %v7653_v45 = vld [vmem:[#allocation5 + $0x7b4] sm:$0xf0] }
  0x6e   : > { %2148 = vmatpush.bf16.msrb.mxu2 %v5302_v20  ;;  %2161 = vmatpush.bf16.msrb.mxu3 %v5686_v24  ;;  %v6165_v20 = vld [vmem:[#allocation5 + $0x848] sm:$0xf]  ;;  %v5399_v24 = vld [vmem:[#allocation5 + $0x278] sm:$0xf0]  ;;  %v7671_v27 = vld [vmem:[#allocation5 + $0x84c] sm:$0xf] }
  0x6f   : > { %v6166_v29 = vor.u32 %v7677_v21, %v6165_v20  ;;  %v7467_v34 = vld [vmem:[#allocation5 + $0x1ec] sm:$0xf]  ;;  %v6170_v35 = vor.u32 %v7671_v27, %v6167_v28  ;;  %v5735_v38 = vld [vmem:[#allocation5 + $0x518] sm:$0xf0]  ;;  %v6021_v56 = vld [vmem:[#allocation5 + $0x728] sm:$0xf] }
  0x70   : > { %2123 = vmatpush.bf16.msrb.mxu0 %v5634_v30  ;;  %v5402_v30 = vor.u32 %v7479_v22, %v5399_v24  ;;  %v7563_v37 = vld [vmem:[#allocation5 + $0x4ec] sm:$0xf]  ;;  %v6119_v40 = vld [vmem:[#allocation5 + $0x818] sm:$0xf0]  ;;  %v5973_v4 = vld [vmem:[#allocation5 + $0x6c8] sm:$0xf] }
  0x71   : > { %2136 = vmatpush.bf16.msrb.mxu1 %v6018_v31  ;;  %v5786_v31 = vor.u32 %v7575_v25, %v5783_v26  ;;  %v7659_v39 = vld [vmem:[#allocation5 + $0x7ec] sm:$0xf]  ;;  %v5687_v50 = vld [vmem:[#allocation5 + $0x4b8] sm:$0xf0]  ;;  %v7617_v20 = vld [vmem:[#allocation5 + $0x694] sm:$0xf0] }
  0x72   : > { %2149 = vmatpush.bf16.msrb.mxu2 %v5254_v32  ;;  %2162 = vmatpush.bf16.msrb.mxu3 %v5638_v36  ;;  %v6117_v32 = vld [vmem:[#allocation5 + $0x7e8] sm:$0xf]  ;;  %v5351_v36 = vld [vmem:[#allocation5 + $0x218] sm:$0xf0]  ;;  %v7455_v46 = vld [vmem:[#allocation5 + $0x18c] sm:$0xf]  ;;  %v6122_v47 = vor.u32 %v7659_v39, %v6119_v40 }
  0x73   : > { %v6118_v41 = vor.u32 %v7665_v33, %v6117_v32  ;;  %v7551_v49 = vld [vmem:[#allocation5 + $0x48c] sm:$0xf]  ;;  %v6071_v52 = vld [vmem:[#allocation5 + $0x7b8] sm:$0xf0]  ;;  %v5453_v40 = vld [vmem:[#allocation5 + $0x2b0] sm:$0xf] }
  0x74   : > { %2124 = vmatpush.bf16.msrb.mxu0 %v5586_v42  ;;  %v5354_v42 = vor.u32 %v7467_v34, %v5351_v36  ;;  %v7647_v51 = vld [vmem:[#allocation5 + $0x78c] sm:$0xf]  ;;  %v5690_v55 = vor.u32 %v7551_v49, %v5687_v50  ;;  %v5255_v60 = vld [vmem:[#allocation5 + $0x158] sm:$0xf0]  ;;  %v7492_v49 = vld [vmem:[#allocation5 + $0x2b4] sm:$0xf] }
  0x75   : > { %2137 = vmatpush.bf16.msrb.mxu1 %v5970_v43  ;;  %v5738_v43 = vor.u32 %v7563_v37, %v5735_v38  ;;  %v6074_v59 = vor.u32 %v7647_v51, %v6071_v52  ;;  %v7539_v61 = vld [vmem:[#allocation5 + $0x42c] sm:$0xf]  ;;  %v6023_v0 = vld [vmem:[#allocation5 + $0x758] sm:$0xf0]  ;;  %v5455_v50 = vld [vmem:[#allocation5 + $0x2e0] sm:$0xf0] }
  0x76   : > { %2150 = vmatpush.bf16.msrb.mxu2 %v5206_v44  ;;  %2163 = vmatpush.bf16.msrb.mxu3 %v5590_v48  ;;  %v6069_v44 = vld [vmem:[#allocation5 + $0x788] sm:$0xf]  ;;  %v5303_v48 = vld [vmem:[#allocation5 + $0x1b8] sm:$0xf0]  ;;  %v7635_v63 = vld [vmem:[#allocation5 + $0x72c] sm:$0xf] }
  0x77   : > { %v6070_v53 = vor.u32 %v7653_v45, %v6069_v44  ;;  %v7431_v6 = vld [vmem:[#allocation5 + $0xcc] sm:$0xf]  ;;  %v6026_v7 = vor.u32 %v7635_v63, %v6023_v0  ;;  %v5207_v10 = vld [vmem:[#allocation5 + $0xf8] sm:$0xf0]  ;;  %v7594_v44 = vld [vmem:[#allocation5 + $0x5dc] sm:$0xf0] }
  0x78   : > { %2125 = vmatpush.bf16.msrb.mxu0 %v5538_v54  ;;  %v5306_v54 = vor.u32 %v7455_v46, %v5303_v48  ;;  %v7623_v13 = vld [vmem:[#allocation5 + $0x6cc] sm:$0xf]  ;;  %v5975_v14 = vld [vmem:[#allocation5 + $0x6f8] sm:$0xf0]  ;;  %v6221_v45 = vld [vmem:[#allocation5 + $0x8b0] sm:$0xf] }
  0x79   : > { %2138 = vmatpush.bf16.msrb.mxu1 %v5922_v57  ;;  %v7641_v57 = vld [vmem:[#allocation5 + $0x754] sm:$0xf0]  ;;  %v7419_v21 = vld [vmem:[#allocation5 + $0x6c] sm:$0xf]  ;;  %v5978_v22 = vor.u32 %v7623_v13, %v5975_v14  ;;  %v5543_v25 = vld [vmem:[#allocation5 + $0x398] sm:$0xf0] }
  0x7a   : > { %2151 = vmatpush.bf16.msrb.mxu2 %v5158_v58  ;;  %2164 = vmatpush.bf16.msrb.mxu3 %v5542_v62  ;;  %v7443_v58 = vld [vmem:[#allocation5 + $0x12c] sm:$0xf]  ;;  %v5639_v62 = vld [vmem:[#allocation5 + $0x458] sm:$0xf0]  ;;  %v6022_v1 = vor.u32 %v7641_v57, %v6021_v56  ;;  %v7690_v46 = vld [vmem:[#allocation5 + $0x8dc] sm:$0xf0] }
  0x7b   : > { %v5258_v2 = vor.u32 %v7443_v58, %v5255_v60  ;;  %v5642_v3 = vor.u32 %v7539_v61, %v5639_v62  ;;  %v7515_v24 = vld [vmem:[#allocation5 + $0x36c] sm:$0xf]  ;;  %v5927_v27 = vld [vmem:[#allocation5 + $0x698] sm:$0xf0]  ;;  %v7486_v56 = vld [vmem:[#allocation5 + $0x27c] sm:$0xf0]  ;;  %v5458_v58 = vor.u32 %v7492_v49, %v5455_v50 }
  0x7c   : > { %2126 = vmatpush.bf16.msrb.mxu0 %v5490_v5  ;;  %v7629_v5 = vld [vmem:[#allocation5 + $0x6f4] sm:$0xf0]  ;;  %v7611_v26 = vld [vmem:[#allocation5 + $0x66c] sm:$0xf]  ;;  %v5546_v32 = vor.u32 %v7515_v24, %v5543_v25  ;;  %v5111_v34 = vld [vmem:[#allocation5 + $0x38] sm:$0xf0] }
  0x7d   : > { %2139 = vmatpush.bf16.msrb.mxu1 %v5874_v11  ;;  %v7527_v11 = vld [vmem:[#allocation5 + $0x3cc] sm:$0xf]  ;;  %v5930_v36 = vor.u32 %v7611_v26, %v5927_v27  ;;  %v5495_v37 = vld [vmem:[#allocation5 + $0x338] sm:$0xf0]  ;;  %v5789_v57 = vld [vmem:[#allocation5 + $0x550] sm:$0xf] }
  0x7e   : > { %2152 = vmatpush.bf16.msrb.mxu2 %v5110_v12  ;;  %2165 = vmatpush.bf16.msrb.mxu3 %v5494_v15  ;;  %v5591_v12 = vld [vmem:[#allocation5 + $0x3f8] sm:$0xf0]  ;;  %v5974_v15 = vor.u32 %v7629_v5, %v5973_v4  ;;  %v7407_v33 = vld [vmem:[#allocation5 + $0xc] sm:$0xf]  ;;  %v6173_v60 = vld [vmem:[#allocation5 + $0x850] sm:$0xf] }
  0x7f   : > { %2127 = vmatmul.bf16.vlgmr.msrb.gmra.mxu0 %v8485_v18  ;;  %v7599_v38 = vld [vmem:[#allocation5 + $0x60c] sm:$0xf]  ;;  %v5879_v39 = vld [vmem:[#allocation5 + $0x638] sm:$0xf0]  ;;  %v7678_v61 = vld [vmem:[#allocation5 + $0x87c] sm:$0xf0] }
  0x80   : > { %2171 = vmatpush.bf16.msra.mxu0 %v6214_v16  ;;  %2140 = vmatmul.bf16.vlgmr.msrb.gmra.mxu1 %v8477_v8  ;;  %v5210_v16 = vor.u32 %v7431_v6, %v5207_v10  ;;  %v5882_v51 = vor.u32 %v7599_v38, %v5879_v39  ;;  %v7480_v62 = vld [vmem:[#allocation5 + $0x254] sm:$0xf]  ;;  %v5407_v63 = vld [vmem:[#allocation5 + $0x280] sm:$0xf0]  ;;  %v7474_v4 = vld [vmem:[#allocation5 + $0x21c] sm:$0xf0] }
  0x81   : > { %2184 = vmatpush.bf16.msra.mxu1 %v5450_v17  ;;  %2153 = vmatmul.bf16.vlgmr.msrb.gmra.mxu2 %v8479_v9  ;;  %v5594_v17 = vor.u32 %v7527_v11, %v5591_v12  ;;  %v5741_v5 = vld [vmem:[#allocation5 + $0x4f0] sm:$0xf]  ;;  %v5410_v6 = vor.u32 %v7480_v62, %v5407_v63  ;;  %v7666_v11 = vld [vmem:[#allocation5 + $0x81c] sm:$0xf0]  ;;  %v7468_v12 = vld [vmem:[#allocation5 + $0x1f4] sm:$0xf] }
  0x82   : > { %2197 = vmatpush.bf16.msra.mxu2 %v5834_v19  ;;  %2210 = vmatpush.bf16.msra.mxu3 %v6218_v23  ;;  %v5925_v19 = vld [vmem:[#allocation5 + $0x668] sm:$0xf]  ;;  %v5159_v23 = vld [vmem:[#allocation5 + $0x98] sm:$0xf0]  ;;  %v6125_v10 = vld [vmem:[#allocation5 + $0x7f0] sm:$0xf] }
  0x83   : > { %2166 = vmatmul.bf16.vlgmr.msrb.gmra.mxu3 %v8485_v18  ;;  %v5926_v28 = vor.u32 %v7617_v20, %v5925_v19  ;;  %v5359_v13 = vld [vmem:[#allocation5 + $0x220] sm:$0xf0]  ;;  %v7462_v19 = vld [vmem:[#allocation5 + $0x1bc] sm:$0xf0]  ;;  %v5693_v20 = vld [vmem:[#allocation5 + $0x490] sm:$0xf] }
  0x84   : > { %2172 = vmatpush.bf16.msra.mxu0 %v6166_v29  ;;  %v5877_v29 = vld [vmem:[#allocation5 + $0x608] sm:$0xf]  ;;  %v7654_v24 = vld [vmem:[#allocation5 + $0x7bc] sm:$0xf0]  ;;  %v7456_v25 = vld [vmem:[#allocation5 + $0x194] sm:$0xf] }
  0x85   : > { %2185 = vmatpush.bf16.msra.mxu1 %v5402_v30  ;;  %v7605_v30 = vld [vmem:[#allocation5 + $0x634] sm:$0xf0]  ;;  %v5311_v26 = vld [vmem:[#allocation5 + $0x1c0] sm:$0xf0]  ;;  %v7432_v49 = vld [vmem:[#allocation5 + $0xd4] sm:$0xf] }
  0x86   : > { %2198 = vmatpush.bf16.msra.mxu2 %v5786_v31  ;;  %2211 = vmatpush.bf16.msra.mxu3 %v6170_v35  ;;  %v5162_v31 = vor.u32 %v7419_v21, %v5159_v23  ;;  %v7503_v35 = vld [vmem:[#allocation5 + $0x30c] sm:$0xf]  ;;  %v5362_v21 = vor.u32 %v7468_v12, %v5359_v13  ;;  %v6077_v23 = vld [vmem:[#allocation5 + $0x790] sm:$0xf]  ;;  %v5263_v38 = vld [vmem:[#allocation5 + $0x160] sm:$0xf0] }
  0x87   : > { %v5498_v48 = vor.u32 %v7503_v35, %v5495_v37  ;;  %v6029_v35 = vld [vmem:[#allocation5 + $0x730] sm:$0xf]  ;;  %v7444_v37 = vld [vmem:[#allocation5 + $0x134] sm:$0xf]  ;;  %v5215_v50 = vld [vmem:[#allocation5 + $0x100] sm:$0xf0] }
  0x88   : > { %2173 = vmatpush.bf16.msra.mxu0 %v6118_v41  ;;  %v7498_v41 = vld [vmem:[#allocation5 + $0x2dc] sm:$0xf0]  ;;  %v5167_v62 = vld [vmem:[#allocation5 + $0xa0] sm:$0xf0]  ;;  %v7588_v13 = vld [vmem:[#allocation5 + $0x5b4] sm:$0xf] }
  0x89   : > { %2186 = vmatpush.bf16.msra.mxu1 %v5354_v42  ;;  %v5837_v42 = vld [vmem:[#allocation5 + $0x5b0] sm:$0xf]  ;;  %v5454_v52 = vor.u32 %v7498_v41, %v5453_v40  ;;  %v5119_v12 = vld [vmem:[#allocation5 + $0x40] sm:$0xf0]  ;;  %s4975_s28 = sshll.u32 %s8659_s26, 4  ;;  %s4977_s29 = sshll.u32 %s4973_s27, 4  ;;  %s4976_s28 = int_to_ptr.vmem [resolvable:$true] %s4975_s28  ;;  %s4978_s29 = int_to_ptr.hbm [resolvable:$true] %s4977_s29 }
  0x8a   : > { %2199 = vmatpush.bf16.msra.mxu2 %v5738_v43  ;;  %2212 = vmatpush.bf16.msra.mxu3 %v6122_v47  ;;  %v5878_v43 = vor.u32 %v7605_v30, %v5877_v29  ;;  %v5114_v47 = vor.u32 %v7407_v33, %v5111_v34  ;;  %v6078_v29 = vor.u32 %v7654_v24, %v6077_v23  ;;  %v5261_v30 = vld [vmem:[#allocation5 + $0x130] sm:$0xf]  ;;  %v7546_v34 = vld [vmem:[#allocation5 + $0x45c] sm:$0xf0]  ;;  %v5845_v23 = vld [vmem:[#allocation5 + $0x5b8] sm:$0xf] }
  0x8b   : > { %v5314_v33 = vor.u32 %v7456_v25, %v5311_v26  ;;  %v7595_v24 = vld [vmem:[#allocation5 + $0x5e4] sm:$0xf0]  ;;  %s4962_s30 = scalar_lea.sflag [#allocation4], %s8455_s7  ;;  %s8243_s8 = sshra.s32 %s4978_s29, 4  ;;  %s8244_s8 = int_to_ptr.hbm [resolvable:$true] %s8243_s8 }
  0x8c   : > { %2174 = vmatpush.bf16.msra.mxu0 %v6070_v53  ;;  %v5838_v53 = vor.u32 %v7594_v44, %v5837_v42  ;;  %v5213_v42 = vld [vmem:[#allocation5 + $0xd0] sm:$0xf]  ;;  %s8245_s25 = scalar_lea.hbm %s8244_s8, 24  ;;  %s8249_s22 = scalar_lea.hbm %s8706_s5, 48 }
  0x8d   : > { %2187 = vmatpush.bf16.msra.mxu1 %v5306_v54  ;;  %v6222_v54 = vor.u32 %v7690_v46, %v6221_v45  ;;  %v5597_v44 = vld [vmem:[#allocation5 + $0x3d0] sm:$0xf]  ;;  %v5266_v45 = vor.u32 %v7444_v37, %v5263_v38  ;;  %v7534_v46 = vld [vmem:[#allocation5 + $0x3fc] sm:$0xf0]  ;;  %v7583_v37 = vld [vmem:[#allocation5 + $0x584] sm:$0xf0]  ;;  %p8246_p1 = scmp.ne.s32.totalorder %s8244_s8, %s8245_s25  ;;  %p8250_p12 = scmp.lt.s32.totalorder %s8244_s8, %s8706_s5 }
  0x8e   : > { %2200 = vmatpush.bf16.msra.mxu2 %v5690_v55  ;;  %2213 = vmatpush.bf16.msra.mxu3 %v6074_v59  ;;  %v5405_v55 = vld [vmem:[#allocation5 + $0x250] sm:$0xf]  ;;  %v7582_v59 = vld [vmem:[#allocation5 + $0x57c] sm:$0xf0]  ;;  %p8251_p7 = scmp.lt.s32.totalorder %s8249_s22, %s8245_s25 }
  0x8f   : > { %v5406_v0 = vor.u32 %v7486_v56, %v5405_v55  ;;  %v7426_v55 = vld [vmem:[#allocation5 + $0x9c] sm:$0xf0]  ;;  %v5549_v56 = vld [vmem:[#allocation5 + $0x370] sm:$0xf]  ;;  %p8247_p3 = pnand %p8246_p1, %p8426_p4 }
  0x90   : > { %2175 = vmatpush.bf16.msra.mxu0 %v6022_v1  ;;  %v5790_v1 = vor.u32 %v7582_v59, %v5789_v57  ;;  %v5218_v57 = vor.u32 %v7432_v49, %v5215_v50  ;;  %v5933_v59 = vld [vmem:[#allocation5 + $0x670] sm:$0xf]  ;;  %v7571_v49 = vld [vmem:[#allocation5 + $0x524] sm:$0xf0]  ;;  %p8252_p8 = por %p8251_p7, %p8250_p12 }
  0x91   : > { %2188 = vmatpush.bf16.msra.mxu1 %v5258_v2  ;;  %v6174_v2 = vor.u32 %v7678_v61, %v6173_v60  ;;  %v7618_v60 = vld [vmem:[#allocation5 + $0x69c] sm:$0xf0]  ;;  %v7420_v61 = vld [vmem:[#allocation5 + $0x74] sm:$0xf]  ;;  %p8248_p5 = pneg %p8247_p3 }
  0x92   : > { %2201 = vmatpush.bf16.msra.mxu2 %v5642_v3  ;;  %2214 = vmatpush.bf16.msra.mxu3 %v6026_v7  ;;  %v5357_v3 = vld [vmem:[#allocation5 + $0x1f0] sm:$0xf]  ;;  %v7570_v7 = vld [vmem:[#allocation5 + $0x51c] sm:$0xf0] }
  0x93   : > { %v5358_v14 = vor.u32 %v7474_v4, %v5357_v3  ;;  %v5934_v3 = vor.u32 %v7618_v60, %v5933_v59  ;;  %v5501_v4 = vld [vmem:[#allocation5 + $0x310] sm:$0xf]  ;;  %v7463_v59 = vld [vmem:[#allocation5 + $0x1c4] sm:$0xf0]  ;;  %v5701_v60 = vld [vmem:[#allocation5 + $0x498] sm:$0xf]  ;;  %p8253_p9 = pnand %p8252_p8, %p8248_p5 }
  0x94   : > { %2176 = vmatpush.bf16.msra.mxu0 %v5974_v15  ;;  %v5742_v15 = vor.u32 %v7570_v7, %v5741_v5  ;;  %v7510_v5 = vld [vmem:[#allocation5 + $0x33c] sm:$0xf0]  ;;  %v5170_v7 = vor.u32 %v7420_v61, %v5167_v62  ;;  %v7559_v61 = vld [vmem:[#allocation5 + $0x4c4] sm:$0xf0] }
  0x95   : > { %2189 = vmatpush.bf16.msra.mxu1 %v5210_v16  ;;  %v6126_v16 = vor.u32 %v7666_v11, %v6125_v10  ;;  %v7606_v10 = vld [vmem:[#allocation5 + $0x63c] sm:$0xf0]  ;;  %v7408_v11 = vld [vmem:[#allocation5 + $0x14] sm:$0xf] }
  0x96   : > { %2202 = vmatpush.bf16.msra.mxu2 %v5594_v17  ;;  %2215 = vmatpush.bf16.msra.mxu3 %v5978_v22  ;;  %v5309_v17 = vld [vmem:[#allocation5 + $0x190] sm:$0xf]  ;;  %v7558_v22 = vld [vmem:[#allocation5 + $0x4bc] sm:$0xf0]  ;;  %v5122_v25 = vor.u32 %v7408_v11, %v5119_v12  ;;  %v7547_v11 = vld [vmem:[#allocation5 + $0x464] sm:$0xf0] }
  0x97   : > { %v5310_v27 = vor.u32 %v7462_v19, %v5309_v17  ;;  %v6223_v17 = vld [vmem:[#allocation5 + $0x8e0] sm:$0xf0]  ;;  %v5461_v19 = vld [vmem:[#allocation5 + $0x2b8] sm:$0xf] }
  0x98   : > { %2177 = vmatpush.bf16.msra.mxu0 %v5926_v28  ;;  %v5694_v28 = vor.u32 %v7558_v22, %v5693_v20  ;;  %v7499_v20 = vld [vmem:[#allocation5 + $0x2e4] sm:$0xf0] }
  0x99   : > { %2190 = vmatpush.bf16.msra.mxu1 %v5162_v31  ;;  %v7450_v31 = vld [vmem:[#allocation5 + $0x15c] sm:$0xf0] }
  0x9a   : > { %2203 = vmatpush.bf16.msra.mxu2 %v5546_v32  ;;  %2216 = vmatpush.bf16.msra.mxu3 %v5930_v36  ;;  %v5645_v32 = vld [vmem:[#allocation5 + $0x430] sm:$0xf]  ;;  %v7642_v36 = vld [vmem:[#allocation5 + $0x75c] sm:$0xf0]  ;;  %v5262_v39 = vor.u32 %v7450_v31, %v5261_v30  ;;  %v5791_v30 = vld [vmem:[#allocation5 + $0x580] sm:$0xf0] }
  0x9b   : > { %v5646_v40 = vor.u32 %v7546_v34, %v5645_v32  ;;  %v6030_v41 = vor.u32 %v7642_v36, %v6029_v35  ;;  %v7672_v31 = vld [vmem:[#allocation5 + $0x854] sm:$0xf]  ;;  %v5846_v32 = vor.u32 %v7595_v24, %v5845_v23  ;;  %v5413_v34 = vld [vmem:[#allocation5 + $0x258] sm:$0xf]  ;;  %v7487_v35 = vld [vmem:[#allocation5 + $0x284] sm:$0xf0] }
  0x9c   : > { %2178 = vmatpush.bf16.msra.mxu0 %v5878_v43  ;;  %v7438_v43 = vld [vmem:[#allocation5 + $0xfc] sm:$0xf0]  ;;  %v5797_v36 = vld [vmem:[#allocation5 + $0x558] sm:$0xf]  ;;  %v7535_v24 = vld [vmem:[#allocation5 + $0x404] sm:$0xf0] }
  0x9d   : > { %2191 = vmatpush.bf16.msra.mxu1 %v5114_v47  ;;  %v5981_v47 = vld [vmem:[#allocation5 + $0x6d0] sm:$0xf]  ;;  %v5605_v23 = vld [vmem:[#allocation5 + $0x3d8] sm:$0xf] }
  0x9e   : > { %2204 = vmatpush.bf16.msra.mxu2 %v5498_v48  ;;  %2217 = vmatpush.bf16.msra.mxu3 %v5882_v51  ;;  %v7630_v48 = vld [vmem:[#allocation5 + $0x6fc] sm:$0xf0]  ;;  %v5214_v51 = vor.u32 %v7438_v43, %v5213_v42  ;;  %v5743_v42 = vld [vmem:[#allocation5 + $0x520] sm:$0xf0]  ;;  %v7660_v43 = vld [vmem:[#allocation5 + $0x7f4] sm:$0xf] }
  0x9f   : > { %2179 = vmatmul.bf16.vlgmr.msra.gmra.mxu0 %v8477_v8 }
  0xa0   : > { %2223 = vmatpush.bf16.msrb.mxu0 %v5454_v52  ;;  %2192 = vmatmul.bf16.vlgmr.msra.gmra.mxu1 %v8479_v9  ;;  %v5598_v52 = vor.u32 %v7534_v46, %v5597_v44  ;;  %v5798_v44 = vor.u32 %v7583_v37, %v5797_v36  ;;  %v5365_v46 = vld [vmem:[#allocation5 + $0x1f8] sm:$0xf]  ;;  %v7523_v36 = vld [vmem:[#allocation5 + $0x3a4] sm:$0xf0] }
  0xa1   : > { %2236 = vmatpush.bf16.msrb.mxu1 %v5838_v53  ;;  %2205 = vmatmul.bf16.vlgmr.msra.gmra.mxu2 %v8485_v18  ;;  %v5982_v53 = vor.u32 %v7630_v48, %v5981_v47  ;;  %v7475_v47 = vld [vmem:[#allocation5 + $0x224] sm:$0xf0]  ;;  %v5749_v48 = vld [vmem:[#allocation5 + $0x4f8] sm:$0xf] }
  0xa2   : > { %2249 = vmatpush.bf16.msrb.mxu2 %v6222_v54  ;;  %2262 = vmatpush.bf16.msrb.mxu3 %v5458_v58  ;;  %v5165_v54 = vld [vmem:[#allocation5 + $0x70] sm:$0xf]  ;;  %v7522_v58 = vld [vmem:[#allocation5 + $0x39c] sm:$0xf0] }
  0xa3   : > { %2218 = vmatmul.bf16.vlgmr.msra.gmra.mxu3 %v8477_v8  ;;  %v5166_v63 = vor.u32 %v7426_v55, %v5165_v54  ;;  %v5695_v54 = vld [vmem:[#allocation5 + $0x4c0] sm:$0xf0]  ;;  %v7648_v55 = vld [vmem:[#allocation5 + $0x794] sm:$0xf] }
  0xa4   : > { %2224 = vmatpush.bf16.msrb.mxu0 %v5406_v0  ;;  %v5117_v0 = vld [vmem:[#allocation5 + $0x10] sm:$0xf] }
  0xa5   : > { %2237 = vmatpush.bf16.msrb.mxu1 %v5790_v1  ;;  %v7414_v1 = vld [vmem:[#allocation5 + $0x3c] sm:$0xf0] }
  0xa6   : > { %2250 = vmatpush.bf16.msrb.mxu2 %v6174_v2  ;;  %2263 = vmatpush.bf16.msrb.mxu3 %v5410_v6  ;;  %v5550_v2 = vor.u32 %v7522_v58, %v5549_v56  ;;  %v5885_v6 = vld [vmem:[#allocation5 + $0x610] sm:$0xf]  ;;  %v5750_v56 = vor.u32 %v7571_v49, %v5749_v48  ;;  %v5317_v58 = vld [vmem:[#allocation5 + $0x198] sm:$0xf]  ;;  %v7511_v48 = vld [vmem:[#allocation5 + $0x344] sm:$0xf0] }
  0xa7   : > { %v5886_v22 = vor.u32 %v7606_v10, %v5885_v6  ;;  %v5269_v6 = vld [vmem:[#allocation5 + $0x138] sm:$0xf] }
  0xa8   : > { %2225 = vmatpush.bf16.msrb.mxu0 %v5358_v14  ;;  %v5839_v14 = vld [vmem:[#allocation5 + $0x5e0] sm:$0xf0]  ;;  %v5653_v10 = vld [vmem:[#allocation5 + $0x438] sm:$0xf] }
  0xa9   : > { %2238 = vmatpush.bf16.msrb.mxu1 %v5742_v15  ;;  %v7684_v15 = vld [vmem:[#allocation5 + $0x8b4] sm:$0xf]  ;;  %v5842_v26 = vor.u32 %v7588_v13, %v5839_v14  ;;  %v6229_v49 = vld [vmem:[#allocation5 + $0x8b8] sm:$0xf] }
  0xaa   : > { %2251 = vmatpush.bf16.msrb.mxu2 %v6126_v16  ;;  %2264 = vmatpush.bf16.msrb.mxu3 %v5362_v21  ;;  %v5118_v16 = vor.u32 %v7414_v1, %v5117_v0  ;;  %v5502_v21 = vor.u32 %v7510_v5, %v5501_v4  ;;  %v5318_v0 = vor.u32 %v7463_v59, %v5317_v58  ;;  %v7540_v1 = vld [vmem:[#allocation5 + $0x434] sm:$0xf]  ;;  %v6031_v5 = vld [vmem:[#allocation5 + $0x760] sm:$0xf0]  ;;  %v7685_v58 = vld [vmem:[#allocation5 + $0x8bc] sm:$0xf] }
  0xab   : > { %v5702_v4 = vor.u32 %v7559_v61, %v5701_v60  ;;  %v6231_v59 = vld [vmem:[#allocation5 + $0x8e8] sm:$0xf0] }
  0xac   : > { %2226 = vmatpush.bf16.msrb.mxu0 %v5310_v27  ;;  %v6226_v27 = vor.u32 %v7684_v15, %v6223_v17  ;;  %v7528_v15 = vld [vmem:[#allocation5 + $0x3d4] sm:$0xf] }
  0xad   : > { %2239 = vmatpush.bf16.msrb.mxu1 %v5694_v28  ;;  %v5462_v28 = vor.u32 %v7499_v20, %v5461_v19  ;;  %v7624_v17 = vld [vmem:[#allocation5 + $0x6d4] sm:$0xf]  ;;  %v5654_v19 = vor.u32 %v7547_v11, %v5653_v10  ;;  %v5983_v20 = vld [vmem:[#allocation5 + $0x700] sm:$0xf0]  ;;  %v6183_v10 = vld [vmem:[#allocation5 + $0x888] sm:$0xf0] }
  0xae   : > { %2252 = vmatpush.bf16.msrb.mxu2 %v6078_v29  ;;  %2265 = vmatpush.bf16.msrb.mxu3 %v5314_v33  ;;  %v7576_v29 = vld [vmem:[#allocation5 + $0x554] sm:$0xf]  ;;  %v6175_v33 = vld [vmem:[#allocation5 + $0x880] sm:$0xf0] }
  0xaf   : > { %v5794_v38 = vor.u32 %v7576_v29, %v5791_v30  ;;  %v5551_v29 = vld [vmem:[#allocation5 + $0x3a0] sm:$0xf0]  ;;  %v7612_v30 = vld [vmem:[#allocation5 + $0x674] sm:$0xf] }
  0xb0   : > { %2227 = vmatpush.bf16.msrb.mxu0 %v5262_v39  ;;  %v6178_v39 = vor.u32 %v7672_v31, %v6175_v33  ;;  %v5606_v31 = vor.u32 %v7535_v24, %v5605_v23  ;;  %v5173_v33 = vld [vmem:[#allocation5 + $0x78] sm:$0xf]  ;;  %v6135_v23 = vld [vmem:[#allocation5 + $0x828] sm:$0xf0] }
  0xb1   : > { %2240 = vmatpush.bf16.msrb.mxu1 %v5646_v40  ;;  %v5414_v40 = vor.u32 %v7487_v35, %v5413_v34  ;;  %v7427_v34 = vld [vmem:[#allocation5 + $0xa4] sm:$0xf0]  ;;  %v5557_v35 = vld [vmem:[#allocation5 + $0x378] sm:$0xf] }
  0xb2   : > { %2253 = vmatpush.bf16.msrb.mxu2 %v6030_v41  ;;  %2266 = vmatpush.bf16.msrb.mxu3 %v5266_v45  ;;  %v7564_v41 = vld [vmem:[#allocation5 + $0x4f4] sm:$0xf]  ;;  %v6127_v45 = vld [vmem:[#allocation5 + $0x820] sm:$0xf0] }
  0xb3   : > { %v5746_v50 = vor.u32 %v7564_v41, %v5743_v42  ;;  %v5174_v41 = vor.u32 %v7427_v34, %v5173_v33  ;;  %v7600_v42 = vld [vmem:[#allocation5 + $0x614] sm:$0xf]  ;;  %v5703_v33 = vld [vmem:[#allocation5 + $0x4c8] sm:$0xf0]  ;;  %v8504_v34 = vld [vmem:[#allocation7] sm:$0xff] }
  0xb4   : > { %2228 = vmatpush.bf16.msrb.mxu0 %v5214_v51  ;;  %v6130_v51 = vor.u32 %v7660_v43, %v6127_v45  ;;  %v5887_v43 = vld [vmem:[#allocation5 + $0x640] sm:$0xf0]  ;;  %v5558_v45 = vor.u32 %v7523_v36, %v5557_v35  ;;  %v7649_v35 = vld [vmem:[#allocation5 + $0x79c] sm:$0xf]  ;;  %v6087_v36 = vld [vmem:[#allocation5 + $0x7c8] sm:$0xf0] }
  0xb5   : > { %2241 = vmatpush.bf16.msrb.mxu1 %v5598_v52  ;;  %v5366_v52 = vor.u32 %v7475_v47, %v5365_v46  ;;  %v7415_v46 = vld [vmem:[#allocation5 + $0x44] sm:$0xf0]  ;;  %v5509_v47 = vld [vmem:[#allocation5 + $0x318] sm:$0xf] }
  0xb6   : > { %2254 = vmatpush.bf16.msrb.mxu2 %v5982_v53  ;;  %2267 = vmatpush.bf16.msrb.mxu3 %v5218_v57  ;;  %v7552_v53 = vld [vmem:[#allocation5 + $0x494] sm:$0xf]  ;;  %v6079_v57 = vld [vmem:[#allocation5 + $0x7c0] sm:$0xf0]  ;;  %v5510_v60 = vor.u32 %v7511_v48, %v5509_v47  ;;  %v5655_v47 = vld [vmem:[#allocation5 + $0x468] sm:$0xf0] }
  0xb7   : > { %v5698_v62 = vor.u32 %v7552_v53, %v5695_v54  ;;  %v5463_v53 = vld [vmem:[#allocation5 + $0x2e8] sm:$0xf0]  ;;  %v7589_v54 = vld [vmem:[#allocation5 + $0x5bc] sm:$0xf] }
  0xb8   : > { %2229 = vmatpush.bf16.msrb.mxu0 %v5166_v63  ;;  %v6082_v63 = vor.u32 %v7648_v55, %v6079_v57  ;;  %v5847_v55 = vld [vmem:[#allocation5 + $0x5e8] sm:$0xf0]  ;;  %v7637_v48 = vld [vmem:[#allocation5 + $0x73c] sm:$0xf] }
  0xb9   : > { %2242 = vmatpush.bf16.msrb.mxu1 %v5550_v2  ;;  %v5647_v2 = vld [vmem:[#allocation5 + $0x460] sm:$0xf0] }
  0xba   : > { %2255 = vmatpush.bf16.msrb.mxu2 %v5934_v3  ;;  %2268 = vmatpush.bf16.msrb.mxu3 %v5170_v7  ;;  %v7636_v3 = vld [vmem:[#allocation5 + $0x734] sm:$0xf]  ;;  %v7451_v7 = vld [vmem:[#allocation5 + $0x164] sm:$0xf0]  ;;  %v5650_v12 = vor.u32 %v7540_v1, %v5647_v2  ;;  %v7481_v2 = vld [vmem:[#allocation5 + $0x25c] sm:$0xf] }
  0xbb   : > { %v6034_v13 = vor.u32 %v7636_v3, %v6031_v5  ;;  %v5270_v14 = vor.u32 %v7451_v7, %v5269_v6  ;;  %v7679_v1 = vld [vmem:[#allocation5 + $0x884] sm:$0xf0]  ;;  %v6234_v3 = vor.u32 %v7685_v58, %v6231_v59  ;;  %v7577_v5 = vld [vmem:[#allocation5 + $0x55c] sm:$0xf]  ;;  %v5799_v6 = vld [vmem:[#allocation5 + $0x588] sm:$0xf0] }
  0xbc   : > { %2230 = vmatpush.bf16.msrb.mxu0 %v5118_v16  ;;  %v5599_v16 = vld [vmem:[#allocation5 + $0x400] sm:$0xf0]  ;;  %v7673_v7 = vld [vmem:[#allocation5 + $0x85c] sm:$0xf]  ;;  %v5223_v59 = vld [vmem:[#allocation5 + $0x108] sm:$0xf0] }
  0xbd   : > { %2243 = vmatpush.bf16.msrb.mxu1 %v5502_v21  ;;  %v5221_v21 = vld [vmem:[#allocation5 + $0xd8] sm:$0xf] }
  0xbe   : > { %2256 = vmatpush.bf16.msrb.mxu2 %v5886_v22  ;;  %2269 = vmatpush.bf16.msrb.mxu3 %v5122_v25  ;;  %v7439_v22 = vld [vmem:[#allocation5 + $0x104] sm:$0xf0]  ;;  %v5602_v25 = vor.u32 %v7528_v15, %v5599_v16  ;;  %v7469_v16 = vld [vmem:[#allocation5 + $0x1fc] sm:$0xf] }
  0xbf   : > { %2231 = vmatmul.bf16.vlgmr.msrb.gmra.mxu0 %v8479_v9  ;;  %v7667_v15 = vld [vmem:[#allocation5 + $0x824] sm:$0xf0] }
  0xc0   : > { %2275 = vmatpush.bf16.msra.mxu0 %v5842_v26  ;;  %2244 = vmatmul.bf16.vlgmr.msrb.gmra.mxu1 %v8485_v18  ;;  %v5986_v26 = vor.u32 %v7624_v17, %v5983_v20  ;;  %v6186_v17 = vor.u32 %v7673_v7, %v6183_v10  ;;  %v7565_v20 = vld [vmem:[#allocation5 + $0x4fc] sm:$0xf] }
  0xc1   : > { %2288 = vmatpush.bf16.msra.mxu1 %v6226_v27  ;;  %2257 = vmatmul.bf16.vlgmr.msrb.gmra.mxu2 %v8477_v8  ;;  %v5222_v27 = vor.u32 %v7439_v22, %v5221_v21  ;;  %v5751_v21 = vld [vmem:[#allocation5 + $0x528] sm:$0xf0]  ;;  %v7661_v22 = vld [vmem:[#allocation5 + $0x7fc] sm:$0xf] }
  0xc2   : > { %2301 = vmatpush.bf16.msra.mxu2 %v5462_v28  ;;  %2314 = vmatpush.bf16.msra.mxu3 %v5846_v32  ;;  %v7516_v28 = vld [vmem:[#allocation5 + $0x374] sm:$0xf]  ;;  %v5935_v32 = vld [vmem:[#allocation5 + $0x6a0] sm:$0xf0]  ;;  %v7421_v7 = vld [vmem:[#allocation5 + $0x7c] sm:$0xf] }
  0xc3   : > { %2270 = vmatmul.bf16.vlgmr.msrb.gmra.mxu3 %v8479_v9  ;;  %v5554_v37 = vor.u32 %v7516_v28, %v5551_v29  ;;  %v7655_v28 = vld [vmem:[#allocation5 + $0x7c4] sm:$0xf0]  ;;  %v7457_v29 = vld [vmem:[#allocation5 + $0x19c] sm:$0xf] }
  0xc4   : > { %2276 = vmatpush.bf16.msra.mxu0 %v5794_v38  ;;  %v7504_v38 = vld [vmem:[#allocation5 + $0x314] sm:$0xf] }
  0xc5   : > { %2289 = vmatpush.bf16.msra.mxu1 %v6178_v39  ;;  %v5503_v39 = vld [vmem:[#allocation5 + $0x340] sm:$0xf0] }
  0xc6   : > { %2302 = vmatpush.bf16.msra.mxu2 %v5414_v40  ;;  %2315 = vmatpush.bf16.msra.mxu3 %v5798_v44  ;;  %v5938_v40 = vor.u32 %v7612_v30, %v5935_v32  ;;  %v5125_v44 = vld [vmem:[#allocation5 + $0x18] sm:$0xf]  ;;  %v5319_v30 = vld [vmem:[#allocation5 + $0x1c8] sm:$0xf0]  ;;  %v7553_v32 = vld [vmem:[#allocation5 + $0x49c] sm:$0xf] }
  0xc7   : > { %v5126_v57 = vor.u32 %v7415_v46, %v5125_v44  ;;  %v6090_v44 = vor.u32 %v7649_v35, %v6087_v36  ;;  %v7541_v46 = vld [vmem:[#allocation5 + $0x43c] sm:$0xf]  ;;  %v7500_v35 = vld [vmem:[#allocation5 + $0x2ec] sm:$0xf0]  ;;  %v5853_v36 = vld [vmem:[#allocation5 + $0x5c0] sm:$0xf] }
  0xc8   : > { %2277 = vmatpush.bf16.msra.mxu0 %v5746_v50  ;;  %v7691_v50 = vld [vmem:[#allocation5 + $0x8e4] sm:$0xf0] }
  0xc9   : > { %2290 = vmatpush.bf16.msra.mxu1 %v6130_v51  ;;  %v7493_v51 = vld [vmem:[#allocation5 + $0x2bc] sm:$0xf]  ;;  %v6230_v61 = vor.u32 %v7691_v50, %v6229_v49  ;;  %v6039_v49 = vld [vmem:[#allocation5 + $0x768] sm:$0xf0] }
  0xca   : > { %2303 = vmatpush.bf16.msra.mxu2 %v5366_v52  ;;  %2316 = vmatpush.bf16.msra.mxu3 %v5750_v56  ;;  %v5506_v52 = vor.u32 %v7504_v38, %v5503_v39  ;;  %v5890_v56 = vor.u32 %v7600_v42, %v5887_v43  ;;  %v6037_v38 = vld [vmem:[#allocation5 + $0x738] sm:$0xf]  ;;  %v5322_v39 = vor.u32 %v7457_v29, %v5319_v30  ;;  %v7445_v42 = vld [vmem:[#allocation5 + $0x13c] sm:$0xf]  ;;  %v603_v43 = vperm.slane %v8504_v34, 0 }
  0xcb   : > { %v6042_v58 = vor.u32 %v7637_v48, %v6039_v49  ;;  %v5511_v30 = vld [vmem:[#allocation5 + $0x348] sm:$0xf0] }
  0xcc   : > { %2278 = vmatpush.bf16.msra.mxu0 %v5698_v62  ;;  %v5466_v62 = vor.u32 %v7493_v51, %v5463_v53  ;;  %v5658_v53 = vor.u32 %v7541_v46, %v5655_v47 }
  0xcd   : > { %2291 = vmatpush.bf16.msra.mxu1 %v6082_v63  ;;  %v5850_v63 = vor.u32 %v7589_v54, %v5847_v55  ;;  %v5989_v54 = vld [vmem:[#allocation5 + $0x6d8] sm:$0xf]  ;;  %v7631_v55 = vld [vmem:[#allocation5 + $0x704] sm:$0xf0] }
  0xce   : > { %2304 = vmatpush.bf16.msra.mxu2 %v5318_v0  ;;  %2317 = vmatpush.bf16.msra.mxu3 %v5702_v4  ;;  %v6181_v0 = vld [vmem:[#allocation5 + $0x858] sm:$0xf]  ;;  %v5415_v4 = vld [vmem:[#allocation5 + $0x288] sm:$0xf0] }
  0xcf   : > { %v6182_v11 = vor.u32 %v7679_v1, %v6181_v0  ;;  %v5990_v1 = vor.u32 %v7631_v55, %v5989_v54 }
  0xd0   : > { %2279 = vmatpush.bf16.msra.mxu0 %v5650_v12  ;;  %v5418_v12 = vor.u32 %v7481_v2, %v5415_v4 }
  0xd1   : > { %2292 = vmatpush.bf16.msra.mxu1 %v6034_v13  ;;  %v5802_v13 = vor.u32 %v7577_v5, %v5799_v6  ;;  %v5941_v5 = vld [vmem:[#allocation5 + $0x678] sm:$0xf]  ;;  %v7619_v6 = vld [vmem:[#allocation5 + $0x6a4] sm:$0xf0] }
  0xd2   : > { %2305 = vmatpush.bf16.msra.mxu2 %v5270_v14  ;;  %2318 = vmatpush.bf16.msra.mxu3 %v5654_v19  ;;  %v6133_v14 = vld [vmem:[#allocation5 + $0x7f8] sm:$0xf]  ;;  %v5367_v19 = vld [vmem:[#allocation5 + $0x228] sm:$0xf0] }
  0xd3   : > { %v6134_v24 = vor.u32 %v7667_v15, %v6133_v14  ;;  %v7613_v15 = vld [vmem:[#allocation5 + $0x67c] sm:$0xf] }
  0xd4   : > { %2280 = vmatpush.bf16.msra.mxu0 %v5602_v25  ;;  %v6085_v25 = vld [vmem:[#allocation5 + $0x798] sm:$0xf] }
  0xd5   : > { %2293 = vmatpush.bf16.msra.mxu1 %v5986_v26  ;;  %v5370_v26 = vor.u32 %v7469_v16, %v5367_v19  ;;  %v5943_v16 = vld [vmem:[#allocation5 + $0x6a8] sm:$0xf0] }
  0xd6   : > { %2306 = vmatpush.bf16.msra.mxu2 %v5222_v27  ;;  %2319 = vmatpush.bf16.msra.mxu3 %v5606_v31  ;;  %v5754_v27 = vor.u32 %v7565_v20, %v5751_v21  ;;  %v6138_v31 = vor.u32 %v7661_v22, %v6135_v23  ;;  %v5942_v20 = vor.u32 %v7619_v6, %v5941_v5  ;;  %v5893_v21 = vld [vmem:[#allocation5 + $0x618] sm:$0xf]  ;;  %v7607_v22 = vld [vmem:[#allocation5 + $0x644] sm:$0xf0]  ;;  %v7572_v5 = vld [vmem:[#allocation5 + $0x52c] sm:$0xf0] }
  0xd7   : > { %v5946_v29 = vor.u32 %v7613_v15, %v5943_v16  ;;  %v6141_v6 = vld [vmem:[#allocation5 + $0x800] sm:$0xf] }
  0xd8   : > { %2281 = vmatpush.bf16.msra.mxu0 %v5554_v37  ;;  %v6086_v37 = vor.u32 %v7655_v28, %v6085_v25  ;;  %v7505_v28 = vld [vmem:[#allocation5 + $0x31c] sm:$0xf]  ;;  %v5325_v16 = vld [vmem:[#allocation5 + $0x1a0] sm:$0xf] }
  0xd9   : > { %2294 = vmatpush.bf16.msra.mxu1 %v5938_v40  ;;  %v5706_v40 = vor.u32 %v7553_v32, %v5703_v33  ;;  %v5895_v32 = vld [vmem:[#allocation5 + $0x648] sm:$0xf0]  ;;  %v5469_v33 = vld [vmem:[#allocation5 + $0x2c0] sm:$0xf] }
  0xda   : > { %2307 = vmatpush.bf16.msra.mxu2 %v5174_v41  ;;  %2320 = vmatpush.bf16.msra.mxu3 %v5558_v45  ;;  %v7643_v41 = vld [vmem:[#allocation5 + $0x764] sm:$0xf0]  ;;  %v5271_v45 = vld [vmem:[#allocation5 + $0x168] sm:$0xf0]  ;;  %v5470_v47 = vor.u32 %v7500_v35, %v5469_v33  ;;  %v5277_v33 = vld [vmem:[#allocation5 + $0x140] sm:$0xf] }
  0xdb   : > { %v6038_v50 = vor.u32 %v7643_v41, %v6037_v38  ;;  %v5894_v38 = vor.u32 %v7607_v22, %v5893_v21  ;;  %v7692_v41 = vld [vmem:[#allocation5 + $0x8ec] sm:$0xf0]  ;;  %v5709_v21 = vld [vmem:[#allocation5 + $0x4a0] sm:$0xf] }
  0xdc   : > { %2282 = vmatpush.bf16.msra.mxu0 %v5506_v52  ;;  %v2076_v51 = vpop.f32.mrf.mxu0  ;;  %v5274_v52 = vor.u32 %v7445_v42, %v5271_v45  ;;  %v5471_v45 = vld [vmem:[#allocation5 + $0x2f0] sm:$0xf0]  ;;  %v7452_v35 = vld [vmem:[#allocation5 + $0x16c] sm:$0xf0] }
  0xdd   : > { %2295 = vmatpush.bf16.msra.mxu1 %v5890_v56  ;;  %v7433_v56 = vld [vmem:[#allocation5 + $0xdc] sm:$0xf]  ;;  %v2089_v0 = vpop.f32.mrf.mxu1 }
  0xde   : > { %2308 = vmatpush.bf16.msra.mxu2 %v5126_v57  ;;  %2321 = vmatpush.bf16.msra.mxu3 %v5510_v60  ;;  %v2077_v57 = vadd.f32 %v2076_v51, %v603_v43  ;;  %v7529_v60 = vld [vmem:[#allocation5 + $0x3dc] sm:$0xf]  ;;  %v5514_v43 = vor.u32 %v7505_v28, %v5511_v30  ;;  %v5421_v51 = vld [vmem:[#allocation5 + $0x260] sm:$0xf] }
  0xdf   : > { %2283 = vmatmul.bf16.vlgmr.msra.gmra.mxu0 %v8485_v18 }
  0xe0   : > { %2327 = vmatpush.bf16.msrb.mxu0 %v6230_v61  ;;  %2296 = vmatmul.bf16.vlgmr.msra.gmra.mxu1 %v8477_v8  ;;  %v5607_v61 = vld [vmem:[#allocation5 + $0x408] sm:$0xf0]  ;;  %v2090_v2 = vadd.f32 %v2089_v0, %v2077_v57  ;;  %v6189_v57 = vld [vmem:[#allocation5 + $0x860] sm:$0xf] }
  0xe1   : > { %2340 = vmatpush.bf16.msrb.mxu1 %v5466_v62  ;;  %2309 = vmatmul.bf16.vlgmr.msra.gmra.mxu2 %v8479_v9  ;;  %v7625_v62 = vld [vmem:[#allocation5 + $0x6dc] sm:$0xf]  ;;  %v5610_v4 = vor.u32 %v7529_v60, %v5607_v61  ;;  %v5423_v60 = vld [vmem:[#allocation5 + $0x290] sm:$0xf0] }
  0xe2   : > { %2353 = vmatpush.bf16.msrb.mxu2 %v5850_v63  ;;  %2366 = vmatpush.bf16.msrb.mxu3 %v6234_v3  ;;  %v5991_v63 = vld [vmem:[#allocation5 + $0x708] sm:$0xf0]  ;;  %v5226_v3 = vor.u32 %v7433_v56, %v5223_v59  ;;  %v7584_v56 = vld [vmem:[#allocation5 + $0x58c] sm:$0xf0]  ;;  %v7482_v59 = vld [vmem:[#allocation5 + $0x264] sm:$0xf] }
  0xe3   : > { %2322 = vmatmul.bf16.vlgmr.msra.gmra.mxu3 %v8485_v18  ;;  %v5994_v10 = vor.u32 %v7625_v62, %v5991_v63  ;;  %v604_v62 = vperm.slane %v8504_v34, 1 }
  0xe4   : > { %2328 = vmatpush.bf16.msrb.mxu0 %v6182_v11  ;;  %v5175_v11 = vld [vmem:[#allocation5 + $0xa8] sm:$0xf0]  ;;  %v2102_v14 = vpop.f32.mrf.mxu2  ;;  %v2078_v23 = vpop.f32.mrf.mxu0 }
  0xe5   : > { %2341 = vmatpush.bf16.msrb.mxu1 %v5418_v12  ;;  %v7517_v12 = vld [vmem:[#allocation5 + $0x37c] sm:$0xf]  ;;  %v7560_v23 = vld [vmem:[#allocation5 + $0x4cc] sm:$0xf0] }
  0xe6   : > { %2354 = vmatpush.bf16.msrb.mxu2 %v5802_v13  ;;  %2367 = vmatpush.bf16.msrb.mxu3 %v6186_v17  ;;  %v5559_v13 = vld [vmem:[#allocation5 + $0x3a8] sm:$0xf0]  ;;  %v8507_v17 = vadd.f32 %v2102_v14, %v2090_v2  ;;  %v8509_v19 = vpop.f32.mrf.mxu3  ;;  %v7476_v2 = vld [vmem:[#allocation5 + $0x22c] sm:$0xf0] }
  0xe7   : > { %v5562_v25 = vor.u32 %v7517_v12, %v5559_v13  ;;  %v2116_v13 = vadd.f32 %v8509_v19, %v604_v62 }
  0xe8   : > { %2329 = vmatpush.bf16.msrb.mxu0 %v6134_v24  ;;  %v5178_v24 = vor.u32 %v7421_v7, %v5175_v11  ;;  %v7668_v7 = vld [vmem:[#allocation5 + $0x82c] sm:$0xf0]  ;;  %v5375_v11 = vld [vmem:[#allocation5 + $0x230] sm:$0xf0] }
  0xe9   : > { %2342 = vmatpush.bf16.msrb.mxu1 %v5370_v26  ;;  %v7409_v26 = vld [vmem:[#allocation5 + $0x1c] sm:$0xf]  ;;  %v6142_v15 = vor.u32 %v7668_v7, %v6141_v6  ;;  %v7524_v6 = vld [vmem:[#allocation5 + $0x3ac] sm:$0xf0]  ;;  %v5949_v7 = vld [vmem:[#allocation5 + $0x680] sm:$0xf] }
  0xea   : > { %2355 = vmatpush.bf16.msrb.mxu2 %v5754_v27  ;;  %2368 = vmatpush.bf16.msrb.mxu3 %v6138_v31  ;;  %v5127_v27 = vld [vmem:[#allocation5 + $0x48] sm:$0xf0]  ;;  %v7601_v31 = vld [vmem:[#allocation5 + $0x61c] sm:$0xf] }
  0xeb   : > { %v5130_v42 = vor.u32 %v7409_v26, %v5127_v27  ;;  %v5898_v46 = vor.u32 %v7601_v31, %v5895_v32  ;;  %v7458_v26 = vld [vmem:[#allocation5 + $0x1a4] sm:$0xf]  ;;  %v5327_v27 = vld [vmem:[#allocation5 + $0x1d0] sm:$0xf0]  ;;  %v5710_v31 = vor.u32 %v7560_v23, %v5709_v21  ;;  %v5517_v21 = vld [vmem:[#allocation5 + $0x320] sm:$0xf] }
  0xec   : > { %2330 = vmatpush.bf16.msrb.mxu0 %v6086_v37  ;;  %v2091_v37 = vpop.f32.mrf.mxu1  ;;  %v2104_v48 = vpop.f32.mrf.mxu2  ;;  %v5901_v23 = vld [vmem:[#allocation5 + $0x620] sm:$0xf] }
  0xed   : > { %2343 = vmatpush.bf16.msrb.mxu1 %v5322_v39  ;;  %v7596_v39 = vld [vmem:[#allocation5 + $0x5ec] sm:$0xf0]  ;;  %v5330_v37 = vor.u32 %v7458_v26, %v5327_v27  ;;  %v5229_v48 = vld [vmem:[#allocation5 + $0xe0] sm:$0xf]  ;;  %v7410_v26 = vld [vmem:[#allocation5 + $0x24] sm:$0xf] }
  0xee   : > { %2356 = vmatpush.bf16.msrb.mxu2 %v5706_v40  ;;  %2369 = vmatpush.bf16.msrb.mxu3 %v6090_v44  ;;  %v6237_v40 = vld [vmem:[#allocation5 + $0x8c0] sm:$0xf]  ;;  %v7494_v44 = vld [vmem:[#allocation5 + $0x2c4] sm:$0xf]  ;;  %v5854_v49 = vor.u32 %v7596_v39, %v5853_v36  ;;  %v2117_v54 = vpop.f32.mrf.mxu3  ;;  %v5135_v27 = vld [vmem:[#allocation5 + $0x50] sm:$0xf0] }
  0xef   : > { %v5474_v55 = vor.u32 %v7494_v44, %v5471_v45  ;;  %v5661_v36 = vld [vmem:[#allocation5 + $0x440] sm:$0xf]  ;;  %v605_v44 = vperm.slane %v8504_v34, 2  ;;  %v5278_v45 = vor.u32 %v7452_v35, %v5277_v33  ;;  %v7632_v54 = vld [vmem:[#allocation5 + $0x70c] sm:$0xf0] }
  0xf0   : > { %2331 = vmatpush.bf16.msrb.mxu0 %v6038_v50  ;;  %v6238_v50 = vor.u32 %v7692_v41, %v6237_v40  ;;  %v6045_v39 = vld [vmem:[#allocation5 + $0x740] sm:$0xf]  ;;  %v7644_v40 = vld [vmem:[#allocation5 + $0x76c] sm:$0xf0]  ;;  %v6239_v33 = vld [vmem:[#allocation5 + $0x8f0] sm:$0xf0] }
  0xf1   : > { %2344 = vmatpush.bf16.msrb.mxu1 %v5274_v52  ;;  %v7488_v52 = vld [vmem:[#allocation5 + $0x28c] sm:$0xf0]  ;;  %v5477_v35 = vld [vmem:[#allocation5 + $0x2c8] sm:$0xf] }
  0xf2   : > { %2357 = vmatpush.bf16.msrb.mxu2 %v5658_v53  ;;  %2370 = vmatpush.bf16.msrb.mxu3 %v6042_v58  ;;  %v5805_v53 = vld [vmem:[#allocation5 + $0x560] sm:$0xf]  ;;  %v7680_v58 = vld [vmem:[#allocation5 + $0x88c] sm:$0xf0]  ;;  %v5422_v61 = vor.u32 %v7488_v52, %v5421_v51 }
  0xf3   : > { %v5806_v63 = vor.u32 %v7584_v56, %v5805_v53  ;;  %v6190_v0 = vor.u32 %v7680_v58, %v6189_v57  ;;  %v7536_v52 = vld [vmem:[#allocation5 + $0x40c] sm:$0xf0]  ;;  %v5997_v53 = vld [vmem:[#allocation5 + $0x6e0] sm:$0xf]  ;;  %v7434_v56 = vld [vmem:[#allocation5 + $0xe4] sm:$0xf] }
  0xf4   : > { %2332 = vmatpush.bf16.msrb.mxu0 %v5990_v1  ;;  %v5373_v1 = vld [vmem:[#allocation5 + $0x200] sm:$0xf]  ;;  %v5231_v57 = vld [vmem:[#allocation5 + $0x110] sm:$0xf0] }
  0xf5   : > { %2345 = vmatpush.bf16.msrb.mxu1 %v5226_v3  ;;  %v5757_v3 = vld [vmem:[#allocation5 + $0x500] sm:$0xf]  ;;  %v5374_v12 = vor.u32 %v7476_v2, %v5373_v1  ;;  %v7428_v2 = vld [vmem:[#allocation5 + $0xac] sm:$0xf0] }
  0xf6   : > { %2358 = vmatpush.bf16.msrb.mxu2 %v5610_v4  ;;  %2371 = vmatpush.bf16.msrb.mxu3 %v5994_v10  ;;  %v5426_v4 = vor.u32 %v7482_v59, %v5423_v60  ;;  %v7470_v10 = vld [vmem:[#allocation5 + $0x204] sm:$0xf]  ;;  %v5758_v14 = vor.u32 %v7572_v5, %v5757_v3  ;;  %v5181_v1 = vld [vmem:[#allocation5 + $0x80] sm:$0xf]  ;;  %v5234_v5 = vor.u32 %v7434_v56, %v5231_v57 }
  0xf7   : > { %v5378_v22 = vor.u32 %v7470_v10, %v5375_v11  ;;  %v5565_v3 = vld [vmem:[#allocation5 + $0x380] sm:$0xf]  ;;  %v7620_v10 = vld [vmem:[#allocation5 + $0x6ac] sm:$0xf0]  ;;  %v7422_v11 = vld [vmem:[#allocation5 + $0x84] sm:$0xf] }
  0xf8   : > { %2333 = vmatpush.bf16.msrb.mxu0 %v5942_v20  ;;  %v7464_v20 = vld [vmem:[#allocation5 + $0x1cc] sm:$0xf0] }
  0xf9   : > { %2346 = vmatpush.bf16.msrb.mxu1 %v5178_v24  ;;  %v6093_v24 = vld [vmem:[#allocation5 + $0x7a0] sm:$0xf] }
  0xfa   : > { %2359 = vmatpush.bf16.msrb.mxu2 %v5562_v25  ;;  %2372 = vmatpush.bf16.msrb.mxu3 %v5946_v29  ;;  %v7656_v25 = vld [vmem:[#allocation5 + $0x7cc] sm:$0xf0]  ;;  %v5326_v29 = vor.u32 %v7464_v20, %v5325_v16  ;;  %v5566_v16 = vor.u32 %v7524_v6, %v5565_v3  ;;  %v5950_v20 = vor.u32 %v7620_v10, %v5949_v7  ;;  %v7554_v7 = vld [vmem:[#allocation5 + $0x4a4] sm:$0xf]  ;;  %v5711_v10 = vld [vmem:[#allocation5 + $0x4d0] sm:$0xf0] }
  0xfb   : > { %v6094_v32 = vor.u32 %v7656_v25, %v6093_v24  ;;  %v7608_v25 = vld [vmem:[#allocation5 + $0x64c] sm:$0xf0] }
  0xfc   : > { %2334 = vmatpush.bf16.msrb.mxu0 %v5894_v38  ;;  %v2128_v28 = vpop.f32.mrf.mxu0  ;;  %v7548_v38 = vld [vmem:[#allocation5 + $0x46c] sm:$0xf0] }
  0xfd   : > { %2347 = vmatpush.bf16.msrb.mxu1 %v5130_v42  ;;  %v2129_v19 = vadd.f32 %v2128_v28, %v2116_v13  ;;  %v2141_v30 = vpop.f32.mrf.mxu1  ;;  %v7446_v42 = vld [vmem:[#allocation5 + $0x144] sm:$0xf]  ;;  %v5182_v13 = vor.u32 %v7428_v2, %v5181_v1  ;;  %v5765_v1 = vld [vmem:[#allocation5 + $0x508] sm:$0xf]  ;;  %v7573_v2 = vld [vmem:[#allocation5 + $0x534] sm:$0xf0] }
  0xfe   : > { %2360 = vmatpush.bf16.msrb.mxu2 %v5514_v43  ;;  %2373 = vmatpush.bf16.msrb.mxu3 %v5898_v46  ;;  %v5279_v43 = vld [vmem:[#allocation5 + $0x170] sm:$0xf0]  ;;  %v5662_v46 = vor.u32 %v7548_v38, %v5661_v36  ;;  %v7501_v36 = vld [vmem:[#allocation5 + $0x2f4] sm:$0xf0]  ;;  %v5902_v38 = vor.u32 %v7608_v25, %v5901_v23  ;;  %v5714_v23 = vor.u32 %v7554_v7, %v5711_v10 }
  0xff   : > { %2335 = vmatmul.bf16.vlgmr.msrb.gmra.mxu0 %v8477_v8  ;;  %v8517_v41 = vadd.f32 %v2141_v30, %v2129_v19  ;;  %v5282_v51 = vor.u32 %v7446_v42, %v5279_v43  ;;  %v5855_v19 = vld [vmem:[#allocation5 + $0x5f0] sm:$0xf0]  ;;  %v7686_v30 = vld [vmem:[#allocation5 + $0x8c4] sm:$0xf]  ;;  %v5138_v42 = vor.u32 %v7410_v26, %v5135_v27 }
 0x100   : > { %2379 = vmatpush.bf16.msra.mxu0 %v5470_v47  ;;  %2348 = vmatmul.bf16.vlgmr.msrb.gmra.mxu1 %v8479_v9  ;;  %v6046_v47 = vor.u32 %v7644_v40, %v6045_v39  ;;  %v5861_v39 = vld [vmem:[#allocation5 + $0x5c8] sm:$0xf]  ;;  %v7597_v40 = vld [vmem:[#allocation5 + $0x5f4] sm:$0xf0]  ;;  %v7542_v27 = vld [vmem:[#allocation5 + $0x444] sm:$0xf] }
 0x101   : > { %2392 = vmatpush.bf16.msra.mxu1 %v5854_v49  ;;  %2361 = vmatmul.bf16.vlgmr.msrb.gmra.mxu2 %v8485_v18  ;;  %v7440_v49 = vld [vmem:[#allocation5 + $0x10c] sm:$0xf0]  ;;  %v5519_v7 = vld [vmem:[#allocation5 + $0x350] sm:$0xf0] }
 0x102   : > { %2405 = vmatpush.bf16.msra.mxu2 %v6238_v50  ;;  %2418 = vmatpush.bf16.msra.mxu3 %v5474_v55  ;;  %v5613_v50 = vld [vmem:[#allocation5 + $0x3e0] sm:$0xf] }
 0x103   : > { %2374 = vmatmul.bf16.vlgmr.msrb.gmra.mxu3 %v8477_v8 }
 0x104   : > { %2380 = vmatpush.bf16.msra.mxu0 %v5422_v61  ;;  %v2154_v55 = vpop.f32.mrf.mxu2  ;;  %v2130_v60 = vpop.f32.mrf.mxu0  ;;  %v5230_v61 = vor.u32 %v7440_v49, %v5229_v48  ;;  %v7674_v48 = vld [vmem:[#allocation5 + $0x864] sm:$0xf]  ;;  %v5862_v49 = vor.u32 %v7597_v40, %v5861_v39 }
 0x105   : > { %2393 = vmatpush.bf16.msra.mxu1 %v5806_v63  ;;  %v2155_v58 = vadd.f32 %v2154_v55, %v605_v44  ;;  %v2143_v62 = vpop.f32.mrf.mxu1  ;;  %v5614_v63 = vor.u32 %v7536_v52, %v5613_v50  ;;  %v6242_v44 = vor.u32 %v7686_v30, %v6239_v33  ;;  %v6191_v50 = vld [vmem:[#allocation5 + $0x890] sm:$0xf0]  ;;  %v7489_v52 = vld [vmem:[#allocation5 + $0x294] sm:$0xf0]  ;;  %v7662_v60 = vld [vmem:[#allocation5 + $0x804] sm:$0xf] }
 0x106   : > { %2406 = vmatpush.bf16.msra.mxu2 %v6190_v0  ;;  %2419 = vmatpush.bf16.msra.mxu3 %v5426_v4  ;;  %v2167_v59 = vpop.f32.mrf.mxu3  ;;  %v5998_v0 = vor.u32 %v7632_v54, %v5997_v53  ;;  %v5813_v53 = vld [vmem:[#allocation5 + $0x568] sm:$0xf]  ;;  %v7585_v54 = vld [vmem:[#allocation5 + $0x594] sm:$0xf0]  ;;  %v6194_v56 = vor.u32 %v7674_v48, %v6191_v50  ;;  %v6143_v62 = vld [vmem:[#allocation5 + $0x830] sm:$0xf0] }
 0x107   : > { %v8520_v4 = vadd.f32 %v2167_v59, %v2155_v58  ;;  %v7566_v58 = vld [vmem:[#allocation5 + $0x504] sm:$0xf]  ;;  %v5759_v59 = vld [vmem:[#allocation5 + $0x530] sm:$0xf0]  ;;  %v7453_v33 = vld [vmem:[#allocation5 + $0x174] sm:$0xf0] }
 0x108   : > { %2381 = vmatpush.bf16.msra.mxu0 %v5374_v12  ;;  %v5183_v12 = vld [vmem:[#allocation5 + $0xb0] sm:$0xf0]  ;;  %v5762_v3 = vor.u32 %v7566_v58, %v5759_v59  ;;  %v7530_v40 = vld [vmem:[#allocation5 + $0x3e4] sm:$0xf]  ;;  %v5621_v50 = vld [vmem:[#allocation5 + $0x3e8] sm:$0xf] }
 0x109   : > { %2394 = vmatpush.bf16.msra.mxu1 %v5758_v14  ;;  %v5133_v14 = vld [vmem:[#allocation5 + $0x20] sm:$0xf]  ;;  %v5186_v24 = vor.u32 %v7422_v11, %v5183_v12  ;;  %v7650_v11 = vld [vmem:[#allocation5 + $0x7a4] sm:$0xf]  ;;  %v5766_v12 = vor.u32 %v7573_v2, %v5765_v1  ;;  %v5567_v58 = vld [vmem:[#allocation5 + $0x3b0] sm:$0xf0] }
 0x10a   : > { %2407 = vmatpush.bf16.msra.mxu2 %v6142_v15  ;;  %2420 = vmatpush.bf16.msra.mxu3 %v5378_v22  ;;  %v7416_v15 = vld [vmem:[#allocation5 + $0x4c] sm:$0xf0]  ;;  %v7614_v59 = vld [vmem:[#allocation5 + $0x684] sm:$0xf]  ;;  %v7429_v1 = vld [vmem:[#allocation5 + $0xb4] sm:$0xf0] }
 0x10b   : > { %v7512_v22 = vld [vmem:[#allocation5 + $0x34c] sm:$0xf0]  ;;  %v5573_v2 = vld [vmem:[#allocation5 + $0x388] sm:$0xf] }
 0x10c   : > { %2382 = vmatpush.bf16.msra.mxu0 %v5326_v29  ;;  %v2156_v28 = vpop.f32.mrf.mxu2  ;;  %v7590_v29 = vld [vmem:[#allocation5 + $0x5c4] sm:$0xf] }
 0x10d   : > { %2395 = vmatpush.bf16.msra.mxu1 %v5710_v31  ;;  %v5858_v43 = vor.u32 %v7590_v29, %v5855_v19  ;;  %v5663_v28 = vld [vmem:[#allocation5 + $0x470] sm:$0xf0]  ;;  %v7638_v29 = vld [vmem:[#allocation5 + $0x744] sm:$0xf] }
 0x10e   : > { %2408 = vmatpush.bf16.msra.mxu2 %v6094_v32  ;;  %2421 = vmatpush.bf16.msra.mxu3 %v5330_v37  ;;  %v2169_v31 = vpop.f32.mrf.mxu3  ;;  %v5134_v32 = vor.u32 %v7416_v15, %v5133_v14  ;;  %v5518_v37 = vor.u32 %v7512_v22, %v5517_v21  ;;  %v5333_v14 = vld [vmem:[#allocation5 + $0x1a8] sm:$0xf]  ;;  %v7465_v15 = vld [vmem:[#allocation5 + $0x1d4] sm:$0xf0]  ;;  %v606_v22 = vperm.slane %v8504_v34, 3 }
 0x10f   : > { %v5334_v26 = vor.u32 %v7465_v15, %v5333_v14  ;;  %v6047_v31 = vld [vmem:[#allocation5 + $0x770] sm:$0xf0]  ;;  %v5141_v14 = vld [vmem:[#allocation5 + $0x28] sm:$0xf] }
 0x110   : > { %2383 = vmatpush.bf16.msra.mxu0 %v5278_v45  ;;  %v5478_v45 = vor.u32 %v7501_v36, %v5477_v35  ;;  %v5669_v35 = vld [vmem:[#allocation5 + $0x448] sm:$0xf]  ;;  %v7549_v36 = vld [vmem:[#allocation5 + $0x474] sm:$0xf0] }
 0x111   : > { %2396 = vmatpush.bf16.msra.mxu1 %v5662_v46  ;;  %v7578_v46 = vld [vmem:[#allocation5 + $0x564] sm:$0xf] }
 0x112   : > { %2409 = vmatpush.bf16.msra.mxu2 %v6046_v47  ;;  %2422 = vmatpush.bf16.msra.mxu3 %v5282_v51  ;;  %v5807_v47 = vld [vmem:[#allocation5 + $0x590] sm:$0xf0]  ;;  %v5429_v51 = vld [vmem:[#allocation5 + $0x268] sm:$0xf] }
 0x113   : > { %v5810_v55 = vor.u32 %v7578_v46, %v5807_v47  ;;  %v5430_v57 = vor.u32 %v7489_v52, %v5429_v51  ;;  %v5237_v46 = vld [vmem:[#allocation5 + $0xe8] sm:$0xf]  ;;  %v7441_v47 = vld [vmem:[#allocation5 + $0x114] sm:$0xf0] }
 0x114   : > { %2384 = vmatpush.bf16.msra.mxu0 %v5230_v61  ;;  %v5814_v61 = vor.u32 %v7585_v54, %v5813_v53  ;;  %v7537_v51 = vld [vmem:[#allocation5 + $0x414] sm:$0xf0] }
 0x115   : > { %2397 = vmatpush.bf16.msra.mxu1 %v5614_v63  ;;  %v5381_v63 = vld [vmem:[#allocation5 + $0x208] sm:$0xf] }
 0x116   : > { %2410 = vmatpush.bf16.msra.mxu2 %v5998_v0  ;;  %2423 = vmatpush.bf16.msra.mxu3 %v5234_v5  ;;  %v7477_v0 = vld [vmem:[#allocation5 + $0x234] sm:$0xf0]  ;;  %v6146_v5 = vor.u32 %v7662_v60, %v6143_v62  ;;  %v5622_v62 = vor.u32 %v7537_v51, %v5621_v50 }
 0x117   : > { %v5382_v6 = vor.u32 %v7477_v0, %v5381_v63  ;;  %v5951_v63 = vld [vmem:[#allocation5 + $0x6b0] sm:$0xf0]  ;;  %v5189_v0 = vld [vmem:[#allocation5 + $0x88] sm:$0xf] }
 0x118   : > { %2385 = vmatpush.bf16.msra.mxu0 %v5182_v13  ;;  %v6095_v13 = vld [vmem:[#allocation5 + $0x7d0] sm:$0xf0]  ;;  %v5954_v10 = vor.u32 %v7614_v59, %v5951_v63  ;;  %v7663_v59 = vld [vmem:[#allocation5 + $0x80c] sm:$0xf]  ;;  %v6101_v63 = vld [vmem:[#allocation5 + $0x7a8] sm:$0xf] }
 0x119   : > { %2398 = vmatpush.bf16.msra.mxu1 %v5566_v16  ;;  %v5717_v16 = vld [vmem:[#allocation5 + $0x4a8] sm:$0xf]  ;;  %v6098_v25 = vor.u32 %v7650_v11, %v6095_v13  ;;  %v5190_v11 = vor.u32 %v7429_v1, %v5189_v0  ;;  %v5903_v13 = vld [vmem:[#allocation5 + $0x650] sm:$0xf0] }
 0x11a   : > { %2411 = vmatpush.bf16.msra.mxu2 %v5950_v20  ;;  %2424 = vmatpush.bf16.msra.mxu3 %v5186_v24  ;;  %v7561_v20 = vld [vmem:[#allocation5 + $0x4d4] sm:$0xf0] }
 0x11b   : > { %v5718_v30 = vor.u32 %v7561_v20, %v5717_v16  ;;  %v7417_v16 = vld [vmem:[#allocation5 + $0x54] sm:$0xf0]  ;;  %v5525_v20 = vld [vmem:[#allocation5 + $0x328] sm:$0xf] }
 0x11c   : > { %2386 = vmatpush.bf16.msra.mxu0 %v5134_v32  ;;  %v2180_v21 = vpop.f32.mrf.mxu0  ;;  %v5285_v32 = vld [vmem:[#allocation5 + $0x148] sm:$0xf] }
 0x11d   : > { %2399 = vmatpush.bf16.msra.mxu1 %v5518_v37  ;;  %v8528_v24 = vadd.f32 %v2180_v21, %v8520_v4  ;;  %v2193_v19 = vpop.f32.mrf.mxu1  ;;  %v6050_v4 = vor.u32 %v7638_v29, %v6047_v31  ;;  %v5286_v39 = vor.u32 %v7453_v33, %v5285_v32  ;;  %v7513_v21 = vld [vmem:[#allocation5 + $0x354] sm:$0xf0]  ;;  %v5479_v29 = vld [vmem:[#allocation5 + $0x2f8] sm:$0xf0]  ;;  %v5142_v32 = vor.u32 %v7417_v16, %v5141_v14  ;;  %v7687_v33 = vld [vmem:[#allocation5 + $0x8cc] sm:$0xf] }
 0x11e   : > { %2412 = vmatpush.bf16.msra.mxu2 %v5902_v38  ;;  %2425 = vmatpush.bf16.msra.mxu3 %v5138_v42  ;;  %v2194_v37 = vadd.f32 %v2193_v19, %v606_v22  ;;  %v5666_v38 = vor.u32 %v7542_v27, %v5663_v28  ;;  %v5615_v42 = vld [vmem:[#allocation5 + $0x410] sm:$0xf0]  ;;  %v7495_v27 = vld [vmem:[#allocation5 + $0x2cc] sm:$0xf] }
 0x11f   : > { %2387 = vmatmul.bf16.vlgmr.msra.gmra.mxu0 %v8479_v9  ;;  %v5618_v54 = vor.u32 %v7530_v40, %v5615_v42  ;;  %v7591_v19 = vld [vmem:[#allocation5 + $0x5cc] sm:$0xf]  ;;  %v7681_v40 = vld [vmem:[#allocation5 + $0x894] sm:$0xf0] }
 0x120   : > { %2431 = vmatpush.bf16.msrb.mxu0 %v5858_v43  ;;  %2400 = vmatmul.bf16.vlgmr.msra.gmra.mxu1 %v8485_v18  ;;  %v7626_v43 = vld [vmem:[#allocation5 + $0x6e4] sm:$0xf]  ;;  %v7483_v42 = vld [vmem:[#allocation5 + $0x26c] sm:$0xf] }
 0x121   : > { %2444 = vmatpush.bf16.msrb.mxu1 %v6242_v44  ;;  %2413 = vmatmul.bf16.vlgmr.msra.gmra.mxu2 %v8477_v8  ;;  %v5670_v44 = vor.u32 %v7549_v36, %v5669_v35  ;;  %v6247_v35 = vld [vmem:[#allocation5 + $0x8f8] sm:$0xf0]  ;;  %v5526_v36 = vor.u32 %v7513_v21, %v5525_v20  ;;  %v6053_v21 = vld [vmem:[#allocation5 + $0x748] sm:$0xf] }
 0x122   : > { %2457 = vmatpush.bf16.msrb.mxu2 %v5478_v45  ;;  %2470 = vmatpush.bf16.msrb.mxu3 %v5862_v49  ;;  %v5999_v45 = vld [vmem:[#allocation5 + $0x710] sm:$0xf0] }
 0x123   : > { %2426 = vmatmul.bf16.vlgmr.msra.gmra.mxu3 %v8479_v9 }
 0x124   : > { %2432 = vmatpush.bf16.msrb.mxu0 %v5810_v55  ;;  %v2206_v48 = vpop.f32.mrf.mxu2  ;;  %v2182_v53 = vpop.f32.mrf.mxu0  ;;  %v6002_v55 = vor.u32 %v7626_v43, %v5999_v45  ;;  %v6250_v43 = vor.u32 %v7687_v33, %v6247_v35  ;;  %v7579_v45 = vld [vmem:[#allocation5 + $0x56c] sm:$0xf] }
 0x125   : > { %2445 = vmatpush.bf16.msrb.mxu1 %v6194_v56  ;;  %v2207_v52 = vadd.f32 %v2206_v48, %v2194_v37  ;;  %v5238_v56 = vor.u32 %v7441_v47, %v5237_v46  ;;  %v5815_v46 = vld [vmem:[#allocation5 + $0x598] sm:$0xf0]  ;;  %v7675_v47 = vld [vmem:[#allocation5 + $0x86c] sm:$0xf]  ;;  %v7669_v53 = vld [vmem:[#allocation5 + $0x834] sm:$0xf0] }
 0x126   : > { %2458 = vmatpush.bf16.msrb.mxu2 %v5430_v57  ;;  %2471 = vmatpush.bf16.msrb.mxu3 %v5814_v61  ;;  %v2219_v49 = vpop.f32.mrf.mxu3  ;;  %v7518_v57 = vld [vmem:[#allocation5 + $0x384] sm:$0xf]  ;;  %v2195_v61 = vpop.f32.mrf.mxu1  ;;  %v6199_v48 = vld [vmem:[#allocation5 + $0x898] sm:$0xf0]  ;;  %v5818_v51 = vor.u32 %v7579_v45, %v5815_v46  ;;  %v7627_v46 = vld [vmem:[#allocation5 + $0x6ec] sm:$0xf] }
 0x127   : > { %v8530_v60 = vadd.f32 %v2219_v49, %v2207_v52  ;;  %v6149_v52 = vld [vmem:[#allocation5 + $0x808] sm:$0xf]  ;;  %v6151_v61 = vld [vmem:[#allocation5 + $0x838] sm:$0xf0] }
 0x128   : > { %2433 = vmatpush.bf16.msrb.mxu0 %v5762_v3  ;;  %v7525_v3 = vld [vmem:[#allocation5 + $0x3b4] sm:$0xf0] }
 0x129   : > { %2446 = vmatpush.bf16.msrb.mxu1 %v6146_v5  ;;  %v5570_v5 = vor.u32 %v7518_v57, %v5567_v58  ;;  %v5574_v15 = vor.u32 %v7525_v3, %v5573_v2  ;;  %v7567_v57 = vld [vmem:[#allocation5 + $0x50c] sm:$0xf]  ;;  %v5767_v58 = vld [vmem:[#allocation5 + $0x538] sm:$0xf0]  ;;  %v7657_v2 = vld [vmem:[#allocation5 + $0x7d4] sm:$0xf0] }
 0x12a   : > { %2459 = vmatpush.bf16.msrb.mxu2 %v5382_v6  ;;  %2472 = vmatpush.bf16.msrb.mxu3 %v5766_v12  ;;  %v7506_v6 = vld [vmem:[#allocation5 + $0x324] sm:$0xf]  ;;  %v5770_v1 = vor.u32 %v7567_v57, %v5767_v58  ;;  %v7459_v3 = vld [vmem:[#allocation5 + $0x1ac] sm:$0xf]  ;;  %v6102_v14 = vor.u32 %v7657_v2, %v6101_v63  ;;  %v5191_v57 = vld [vmem:[#allocation5 + $0xb8] sm:$0xf0] }
 0x12b   : > { %v7602_v12 = vld [vmem:[#allocation5 + $0x624] sm:$0xf]  ;;  %v5522_v28 = vor.u32 %v7506_v6, %v5519_v7  ;;  %v6154_v6 = vor.u32 %v7663_v59, %v6151_v61  ;;  %v5335_v7 = vld [vmem:[#allocation5 + $0x1d8] sm:$0xf0]  ;;  %v7519_v58 = vld [vmem:[#allocation5 + $0x38c] sm:$0xf] }
 0x12c   : > { %2434 = vmatpush.bf16.msrb.mxu0 %v5714_v23  ;;  %v2208_v22 = vpop.f32.mrf.mxu2  ;;  %v5906_v31 = vor.u32 %v7602_v12, %v5903_v13  ;;  %v7651_v12 = vld [vmem:[#allocation5 + $0x7ac] sm:$0xf]  ;;  %v6103_v13 = vld [vmem:[#allocation5 + $0x7d8] sm:$0xf0]  ;;  %v5338_v16 = vor.u32 %v7459_v3, %v5335_v7 }
 0x12d   : > { %2447 = vmatpush.bf16.msrb.mxu1 %v6098_v25  ;;  %v6245_v25 = vld [vmem:[#allocation5 + $0x8c8] sm:$0xf]  ;;  %v7645_v22 = vld [vmem:[#allocation5 + $0x774] sm:$0xf0]  ;;  %v5575_v59 = vld [vmem:[#allocation5 + $0x3b8] sm:$0xf0] }
 0x12e   : > { %2460 = vmatpush.bf16.msrb.mxu2 %v5334_v26  ;;  %2473 = vmatpush.bf16.msrb.mxu3 %v5718_v30  ;;  %v2221_v23 = vpop.f32.mrf.mxu3  ;;  %v7693_v26 = vld [vmem:[#allocation5 + $0x8f4] sm:$0xf0]  ;;  %v5863_v30 = vld [vmem:[#allocation5 + $0x5f8] sm:$0xf0]  ;;  %v7615_v61 = vld [vmem:[#allocation5 + $0x68c] sm:$0xf]  ;;  %v5578_v3 = vor.u32 %v7519_v58, %v5575_v59 }
 0x12f   : > { %v6246_v37 = vor.u32 %v7693_v26, %v6245_v25  ;;  %v7447_v23 = vld [vmem:[#allocation5 + $0x14c] sm:$0xf] }
 0x130   : > { %2435 = vmatpush.bf16.msrb.mxu0 %v5666_v38  ;;  %v5482_v38 = vor.u32 %v7495_v27, %v5479_v29  ;;  %v5287_v27 = vld [vmem:[#allocation5 + $0x178] sm:$0xf0]  ;;  %v7507_v7 = vld [vmem:[#allocation5 + $0x32c] sm:$0xf] }
 0x131   : > { %2448 = vmatpush.bf16.msrb.mxu1 %v6050_v4  ;;  %v5866_v4 = vor.u32 %v7591_v19, %v5863_v30  ;;  %v5671_v29 = vld [vmem:[#allocation5 + $0x478] sm:$0xf0]  ;;  %v7639_v19 = vld [vmem:[#allocation5 + $0x74c] sm:$0xf]  ;;  %v5290_v33 = vor.u32 %v7447_v23, %v5287_v27  ;;  %v7740_v23 = vld [vmem:[#allocation8 + $0x170] sm:$0xf0] }
 0x132   : > { %2461 = vmatpush.bf16.msrb.mxu2 %v5286_v39  ;;  %2474 = vmatpush.bf16.msrb.mxu3 %v5670_v44  ;;  %v6197_v39 = vld [vmem:[#allocation5 + $0x868] sm:$0xf]  ;;  %v5431_v44 = vld [vmem:[#allocation5 + $0x298] sm:$0xf0] }
 0x133   : > { %v6198_v49 = vor.u32 %v7681_v40, %v6197_v39  ;;  %v5434_v50 = vor.u32 %v7483_v42, %v5431_v44  ;;  %v6055_v30 = vld [vmem:[#allocation5 + $0x778] sm:$0xf0]  ;;  %v7531_v42 = vld [vmem:[#allocation5 + $0x3ec] sm:$0xf] }
 0x134   : > { %2436 = vmatpush.bf16.msrb.mxu0 %v5618_v54  ;;  %v7471_v54 = vld [vmem:[#allocation5 + $0x20c] sm:$0xf]  ;;  %v6058_v39 = vor.u32 %v7639_v19, %v6055_v30  ;;  %v5239_v40 = vld [vmem:[#allocation5 + $0x118] sm:$0xf0] }
 0x135   : > { %2449 = vmatpush.bf16.msrb.mxu1 %v6002_v55  ;;  %v6202_v55 = vor.u32 %v7675_v47, %v6199_v48  ;;  %v6007_v47 = vld [vmem:[#allocation5 + $0x718] sm:$0xf0] }
 0x136   : > { %2462 = vmatpush.bf16.msrb.mxu2 %v5238_v56  ;;  %2475 = vmatpush.bf16.msrb.mxu3 %v5622_v62  ;;  %v5383_v56 = vld [vmem:[#allocation5 + $0x238] sm:$0xf0]  ;;  %v6150_v62 = vor.u32 %v7669_v53, %v6149_v52  ;;  %v5957_v52 = vld [vmem:[#allocation5 + $0x688] sm:$0xf]  ;;  %v7621_v53 = vld [vmem:[#allocation5 + $0x6b4] sm:$0xf0] }
 0x137   : > { %v5386_v0 = vor.u32 %v7471_v54, %v5383_v56  ;;  %v7423_v54 = vld [vmem:[#allocation5 + $0x8c] sm:$0xf]  ;;  %v6010_v56 = vor.u32 %v7627_v46, %v6007_v47  ;;  %v5958_v63 = vor.u32 %v7621_v53, %v5957_v52  ;;  %v7734_v52 = vld [vmem:[#allocation8 + $0x140] sm:$0xf0]  ;;  %v6505_v53 = vld [vmem:[#allocation8 + $0x1f8] sm:$0xf] }
 0x138   : > { %2437 = vmatpush.bf16.msrb.mxu0 %v5570_v5  ;;  %v607_v5 = vperm.slane %v8504_v34, 4  ;;  %v6106_v34 = vor.u32 %v7651_v12, %v6103_v13  ;;  %v5194_v2 = vor.u32 %v7423_v54, %v5191_v57  ;;  %v5527_v12 = vld [vmem:[#allocation5 + $0x358] sm:$0xf0]  ;;  %v7603_v13 = vld [vmem:[#allocation5 + $0x62c] sm:$0xf] }
 0x139   : > { %2450 = vmatpush.bf16.msrb.mxu1 %v5954_v10  ;;  %v7555_v10 = vld [vmem:[#allocation5 + $0x4ac] sm:$0xf]  ;;  %v5530_v27 = vor.u32 %v7507_v7, %v5527_v12  ;;  %v7758_v54 = vld [vmem:[#allocation8 + $0x200] sm:$0xf0]  ;;  %v7704_v12 = vld [vmem:[#allocation8 + $0x50] sm:$0xf0] }
 0x13a   : > { %2463 = vmatpush.bf16.msrb.mxu2 %v5190_v11  ;;  %2476 = vmatpush.bf16.msrb.mxu3 %v5574_v15  ;;  %v5719_v11 = vld [vmem:[#allocation5 + $0x4d8] sm:$0xf0]  ;;  %v6506_v59 = vor.u32 %v7758_v54, %v6505_v53  ;;  %v6253_v54 = vld [vmem:[#allocation8] sm:$0xf] }
 0x13b   : > { %v5722_v20 = vor.u32 %v7555_v10, %v5719_v11 }
 0x13c   : > { %2438 = vmatpush.bf16.msrb.mxu0 %v5522_v28  ;;  %v2232_v15 = vpop.f32.mrf.mxu0  ;;  %v7543_v28 = vld [vmem:[#allocation5 + $0x44c] sm:$0xf] }
 0x13d   : > { %2451 = vmatpush.bf16.msrb.mxu1 %v5906_v31  ;;  %v2233_v25 = vadd.f32 %v2232_v15, %v607_v5  ;;  %v2245_v26 = vpop.f32.mrf.mxu1  ;;  %v5674_v35 = vor.u32 %v7543_v28, %v5671_v29  ;;  %v7411_v5 = vld [vmem:[#allocation5 + $0x2c] sm:$0xf]  ;;  %v6625_v28 = vld [vmem:[#allocation8 + $0x2e8] sm:$0xf]  ;;  %v7788_v29 = vld [vmem:[#allocation8 + $0x2f0] sm:$0xf0] }
 0x13e   : > { %2464 = vmatpush.bf16.msrb.mxu2 %v5142_v32  ;;  %2477 = vmatpush.bf16.msrb.mxu3 %v5526_v36  ;;  %v6054_v32 = vor.u32 %v7645_v22, %v6053_v21  ;;  %v6005_v36 = vld [vmem:[#allocation5 + $0x6e8] sm:$0xf]  ;;  %v6433_v21 = vld [vmem:[#allocation8 + $0x168] sm:$0xf] }
 0x13f   : > { %2439 = vmatmul.bf16.vlgmr.msrb.gmra.mxu0 %v8485_v18  ;;  %v2246_v31 = vadd.f32 %v2245_v26, %v2233_v25  ;;  %v6529_v25 = vld [vmem:[#allocation8 + $0x228] sm:$0xf]  ;;  %v7764_v26 = vld [vmem:[#allocation8 + $0x230] sm:$0xf0] }
 0x140   : > { %2483 = vmatpush.bf16.msra.mxu0 %v6246_v37  ;;  %2452 = vmatmul.bf16.vlgmr.msrb.gmra.mxu1 %v8477_v8  ;;  %v7633_v37 = vld [vmem:[#allocation5 + $0x714] sm:$0xf0] }
 0x141   : > { %2496 = vmatpush.bf16.msra.mxu1 %v5482_v38  ;;  %2465 = vmatmul.bf16.vlgmr.msrb.gmra.mxu2 %v8479_v9  ;;  %v7435_v38 = vld [vmem:[#allocation5 + $0xec] sm:$0xf]  ;;  %v6006_v48 = vor.u32 %v7633_v37, %v6005_v36  ;;  %v6421_v36 = vld [vmem:[#allocation8 + $0x150] sm:$0xf]  ;;  %v6626_v37 = vor.u32 %v7788_v29, %v6625_v28 }
 0x142   : > { %2509 = vmatpush.bf16.msra.mxu2 %v5866_v4  ;;  %2522 = vmatpush.bf16.msra.mxu3 %v6250_v43  ;;  %v5623_v43 = vld [vmem:[#allocation5 + $0x418] sm:$0xf0] }
 0x143   : > { %2478 = vmatmul.bf16.vlgmr.msrb.gmra.mxu3 %v8485_v18  ;;  %v6373_v28 = vld [vmem:[#allocation8 + $0xf0] sm:$0xf] }
 0x144   : > { %2484 = vmatpush.bf16.msra.mxu0 %v6198_v49  ;;  %v2258_v4 = vpop.f32.mrf.mxu2  ;;  %v2234_v49 = vpop.f32.mrf.mxu0 }
 0x145   : > { %2497 = vmatpush.bf16.msra.mxu1 %v5434_v50  ;;  %v8537_v44 = vadd.f32 %v2258_v4, %v2246_v31  ;;  %v5242_v50 = vor.u32 %v7435_v38, %v5239_v40  ;;  %v6434_v31 = vor.u32 %v7740_v23, %v6433_v21  ;;  %v7737_v38 = vld [vmem:[#allocation8 + $0x158] sm:$0xf0]  ;;  %v6517_v4 = vld [vmem:[#allocation8 + $0x210] sm:$0xf]  ;;  %v7710_v49 = vld [vmem:[#allocation8 + $0x80] sm:$0xf0] }
 0x146   : > { %2510 = vmatpush.bf16.msra.mxu2 %v5818_v51  ;;  %2523 = vmatpush.bf16.msra.mxu3 %v6202_v55  ;;  %v8539_v45 = vpop.f32.mrf.mxu3  ;;  %v5626_v51 = vor.u32 %v7531_v42, %v5623_v43  ;;  %v2247_v55 = vpop.f32.mrf.mxu1  ;;  %v6613_v40 = vld [vmem:[#allocation8 + $0x2d0] sm:$0xf]  ;;  %v7785_v42 = vld [vmem:[#allocation8 + $0x2d8] sm:$0xf0]  ;;  %v6422_v46 = vor.u32 %v7737_v38, %v6421_v36  ;;  %v6577_v21 = vld [vmem:[#allocation8 + $0x288] sm:$0xf] }
 0x147   : > { %v6601_v55 = vld [vmem:[#allocation8 + $0x2b8] sm:$0xf] }
 0x148   : > { %2485 = vmatpush.bf16.msra.mxu0 %v6150_v62  ;;  %v5959_v62 = vld [vmem:[#allocation5 + $0x6b8] sm:$0xf0] }
 0x149   : > { %2498 = vmatpush.bf16.msra.mxu1 %v5386_v0  ;;  %v5909_v0 = vld [vmem:[#allocation5 + $0x628] sm:$0xf]  ;;  %v5962_v11 = vor.u32 %v7615_v61, %v5959_v62  ;;  %v6301_v61 = vld [vmem:[#allocation8 + $0x60] sm:$0xf]  ;;  %v7707_v62 = vld [vmem:[#allocation8 + $0x68] sm:$0xf0] }
 0x14a   : > { %2511 = vmatpush.bf16.msra.mxu2 %v5770_v1  ;;  %2524 = vmatpush.bf16.msra.mxu3 %v6154_v6  ;;  %v7609_v1 = vld [vmem:[#allocation5 + $0x654] sm:$0xf0]  ;;  %v5143_v6 = vld [vmem:[#allocation5 + $0x58] sm:$0xf0] }
 0x14b   : > { %v5910_v22 = vor.u32 %v7609_v1, %v5909_v0  ;;  %v7731_v1 = vld [vmem:[#allocation8 + $0x128] sm:$0xf0] }
 0x14c   : > { %2486 = vmatpush.bf16.msra.mxu0 %v6102_v14  ;;  %v2260_v10 = vpop.f32.mrf.mxu2  ;;  %v5911_v14 = vld [vmem:[#allocation5 + $0x658] sm:$0xf0] }
 0x14d   : > { %2499 = vmatpush.bf16.msra.mxu1 %v5338_v16  ;;  %v6337_v16 = vld [vmem:[#allocation8 + $0xa8] sm:$0xf]  ;;  %v5914_v19 = vor.u32 %v7603_v13, %v5911_v14 }
 0x14e   : > { %2512 = vmatpush.bf16.msra.mxu2 %v5722_v20  ;;  %2525 = vmatpush.bf16.msra.mxu3 %v6106_v34  ;;  %v2273_v15 = vpop.f32.mrf.mxu3  ;;  %v7716_v20 = vld [vmem:[#allocation8 + $0xb0] sm:$0xf0]  ;;  %v5146_v34 = vor.u32 %v7411_v5, %v5143_v6  ;;  %v6385_v13 = vld [vmem:[#allocation8 + $0x108] sm:$0xf] }
 0x14f   : > { %v6338_v30 = vor.u32 %v7716_v20, %v6337_v16  ;;  %v7728_v15 = vld [vmem:[#allocation8 + $0x110] sm:$0xf0]  ;;  %v6481_v16 = vld [vmem:[#allocation8 + $0x1c8] sm:$0xf] }
 0x150   : > { %2487 = vmatpush.bf16.msra.mxu0 %v6054_v32  ;;  %v6530_v32 = vor.u32 %v7764_v26, %v6529_v25  ;;  %v7752_v20 = vld [vmem:[#allocation8 + $0x1d0] sm:$0xf0]  ;;  %v6386_v25 = vor.u32 %v7728_v15, %v6385_v13  ;;  %v2535_v13 = vmax.f32 %v8507_v17, 0.0  ;;  %v6805_v17 = vld [vmem:[#allocation8 + $0x450] sm:$0xf] }
 0x151   : > { %2500 = vmatpush.bf16.msra.mxu1 %v5290_v33  ;;  %v6325_v33 = vld [vmem:[#allocation8 + $0x90] sm:$0xf]  ;;  %v6482_v26 = vor.u32 %v7752_v20, %v6481_v16  ;;  %v2537_v20 = vmax.f32 %v8528_v24, 0.0 }
 0x152   : > { %2513 = vmatpush.bf16.msra.mxu2 %v5674_v35  ;;  %2526 = vmatpush.bf16.msra.mxu3 %v6058_v39  ;;  %v7713_v35 = vld [vmem:[#allocation8 + $0x98] sm:$0xf0] }
 0x153   : > { %v7761_v39 = vld [vmem:[#allocation8 + $0x218] sm:$0xf0]  ;;  %v6326_v43 = vor.u32 %v7713_v35, %v6325_v33  ;;  %v6565_v33 = vld [vmem:[#allocation8 + $0x270] sm:$0xf]  ;;  %v8561_v24 = vpack.c.bf16 %v2537_v20, %v2537_v20 }
 0x154   : > { %2488 = vmatpush.bf16.msra.mxu0 %v6006_v48  ;;  %v6518_v47 = vor.u32 %v7761_v39, %v6517_v4  ;;  %v6313_v48 = vld [vmem:[#allocation8 + $0x78] sm:$0xf]  ;;  %v7773_v35 = vld [vmem:[#allocation8 + $0x278] sm:$0xf0] }
 0x155   : > { %2501 = vmatpush.bf16.msra.mxu1 %v5242_v50  ;;  %v6409_v50 = vld [vmem:[#allocation8 + $0x138] sm:$0xf]  ;;  %v6314_v57 = vor.u32 %v7710_v49, %v6313_v48  ;;  %v7722_v48 = vld [vmem:[#allocation8 + $0xe0] sm:$0xf0] }
 0x156   : > { %2514 = vmatpush.bf16.msra.mxu2 %v5626_v51  ;;  %2527 = vmatpush.bf16.msra.mxu3 %v6010_v56  ;;  %v6614_v51 = vor.u32 %v7785_v42, %v6613_v40  ;;  %v7782_v56 = vld [vmem:[#allocation8 + $0x2c0] sm:$0xf0]  ;;  %v6410_v58 = vor.u32 %v7734_v52, %v6409_v50  ;;  %v6265_v42 = vld [vmem:[#allocation8 + $0x18] sm:$0xf] }
 0x157   : > { %v6602_v0 = vor.u32 %v7782_v56, %v6601_v55  ;;  %v6457_v49 = vld [vmem:[#allocation8 + $0x198] sm:$0xf]  ;;  %v7746_v50 = vld [vmem:[#allocation8 + $0x1a0] sm:$0xf0]  ;;  %v7695_v55 = vld [vmem:[#allocation8 + $0x8] sm:$0xf0] }
 0x158   : > { %2489 = vmatpush.bf16.msra.mxu0 %v5958_v63  ;;  %v6397_v63 = vld [vmem:[#allocation8 + $0x120] sm:$0xf]  ;;  %v7770_v52 = vld [vmem:[#allocation8 + $0x260] sm:$0xf0] }
 0x159   : > { %2502 = vmatpush.bf16.msra.mxu1 %v5194_v2  ;;  %v6493_v2 = vld [vmem:[#allocation8 + $0x1e0] sm:$0xf]  ;;  %v6398_v7 = vor.u32 %v7731_v1, %v6397_v63  ;;  %v7743_v63 = vld [vmem:[#allocation8 + $0x188] sm:$0xf0] }
 0x15a   : > { %2515 = vmatpush.bf16.msra.mxu2 %v5578_v3  ;;  %2528 = vmatpush.bf16.msra.mxu3 %v5962_v11  ;;  %v6589_v3 = vld [vmem:[#allocation8 + $0x2a0] sm:$0xf]  ;;  %v6289_v11 = vld [vmem:[#allocation8 + $0x48] sm:$0xf]  ;;  %v7767_v1 = vld [vmem:[#allocation8 + $0x248] sm:$0xf0] }
 0x15b   : > { %v6290_v23 = vor.u32 %v7704_v12, %v6289_v11  ;;  %v6913_v11 = vld [vmem:[#allocation8 + $0x528] sm:$0xf]  ;;  %v7860_v12 = vld [vmem:[#allocation8 + $0x530] sm:$0xf0] }
 0x15c   : > { %2490 = vmatpush.bf16.msra.mxu0 %v5910_v22  ;;  %v8545_v5 = vpop.f32.mrf.mxu0  ;;  %v7776_v22 = vld [vmem:[#allocation8 + $0x290] sm:$0xf0] }
 0x15d   : > { %2503 = vmatpush.bf16.msra.mxu1 %v5146_v34  ;;  %v8547_v6 = vpop.f32.mrf.mxu1  ;;  %v6277_v34 = vld [vmem:[#allocation8 + $0x30] sm:$0xf]  ;;  %v6578_v29 = vor.u32 %v7776_v22, %v6577_v21  ;;  %v2538_v21 = vmax.f32 %v8530_v60, 0.0 }
 0x15e   : > { %2516 = vmatpush.bf16.msra.mxu2 %v5530_v27  ;;  %2529 = vmatpush.bf16.msra.mxu3 %v5914_v19  ;;  %v7701_v27 = vld [vmem:[#allocation8 + $0x38] sm:$0xf0] }
 0x15f   : > { %2491 = vmatmul.bf16.vlgmr.msra.gmra.mxu0 %v8477_v8  ;;  %v7725_v19 = vld [vmem:[#allocation8 + $0xf8] sm:$0xf0]  ;;  %v6278_v38 = vor.u32 %v7701_v27, %v6277_v34  ;;  %v6914_v27 = vor.u32 %v7860_v12, %v6913_v11  ;;  %v7800_v11 = vld [vmem:[#allocation8 + $0x350] sm:$0xf0]  ;;  %v6769_v12 = vld [vmem:[#allocation8 + $0x408] sm:$0xf] }
 0x160   : > { %4487 = vmatpush.bf16.msrb.mxu0 %v6338_v30  ;;  %2504 = vmatmul.bf16.vlgmr.msra.gmra.mxu1 %v8479_v9  ;;  %v7755_v9 = vld [vmem:[#allocation8 + $0x1e8] sm:$0xf0]  ;;  %v6469_v30 = vld [vmem:[#allocation8 + $0x1b0] sm:$0xf]  ;;  %v6374_v39 = vor.u32 %v7725_v19, %v6373_v28 }
 0x161   : > { %4500 = vmatpush.bf16.msrb.mxu1 %v6434_v31  ;;  %2517 = vmatmul.bf16.vlgmr.msra.gmra.mxu2 %v8485_v18  ;;  %v7779_v18 = vld [vmem:[#allocation8 + $0x2a8] sm:$0xf0]  ;;  %v6494_v10 = vor.u32 %v7755_v9, %v6493_v2  ;;  %v7749_v31 = vld [vmem:[#allocation8 + $0x1b8] sm:$0xf0]  ;;  %v6721_v9 = vld [vmem:[#allocation8 + $0x3a8] sm:$0xf] }
 0x162   : > { %4513 = vmatpush.bf16.msrb.mxu2 %v6530_v32  ;;  %4526 = vmatpush.bf16.msrb.mxu3 %v6626_v37  ;;  %v6590_v14 = vor.u32 %v7779_v18, %v6589_v3  ;;  %v6470_v40 = vor.u32 %v7749_v31, %v6469_v30  ;;  %v7812_v3 = vld [vmem:[#allocation8 + $0x3b0] sm:$0xf0]  ;;  %v6817_v18 = vld [vmem:[#allocation8 + $0x468] sm:$0xf]  ;;  %v6709_v28 = vld [vmem:[#allocation8 + $0x390] sm:$0xf]  ;;  %v8557_v31 = vpack.c.bf16 %v2535_v13, %v2535_v13 }
 0x163   : > { %2530 = vmatmul.bf16.vlgmr.msra.gmra.mxu3 %v8477_v8  ;;  %v6302_v8 = vor.u32 %v7707_v62, %v6301_v61  ;;  %v6445_v61 = vld [vmem:[#allocation8 + $0x180] sm:$0xf]  ;;  %v6901_v19 = vld [vmem:[#allocation8 + $0x510] sm:$0xf]  ;;  %v7857_v30 = vld [vmem:[#allocation8 + $0x518] sm:$0xf0] }
 0x164   : > { %4488 = vmatpush.bf16.msrb.mxu0 %v6326_v43  ;;  %v8549_v32 = vpop.f32.mrf.mxu2  ;;  %v2286_v37 = vpop.f32.mrf.mxu0  ;;  %v7698_v43 = vld [vmem:[#allocation8 + $0x20] sm:$0xf0]  ;;  %v6446_v16 = vor.u32 %v7743_v63, %v6445_v61  ;;  %v6877_v61 = vld [vmem:[#allocation8 + $0x4e0] sm:$0xf]  ;;  %v8077_v63 = vld [vmem:[#allocation7] sm:$0xff] }
 0x165   : > { %4501 = vmatpush.bf16.msrb.mxu1 %v6422_v46  ;;  %v2299_v4 = vpop.f32.mrf.mxu1  ;;  %v6361_v46 = vld [vmem:[#allocation8 + $0xd8] sm:$0xf]  ;;  %v6266_v53 = vor.u32 %v7698_v43, %v6265_v42  ;;  %v6997_v37 = vld [vmem:[#allocation8 + $0x5d0] sm:$0xf]  ;;  %v7806_v43 = vld [vmem:[#allocation8 + $0x380] sm:$0xf0] }
 0x166   : > { %4514 = vmatpush.bf16.msrb.mxu2 %v6518_v47  ;;  %4527 = vmatpush.bf16.msrb.mxu3 %v6614_v51  ;;  %v8551_v36 = vpop.f32.mrf.mxu3  ;;  %v6566_v47 = vor.u32 %v7773_v35, %v6565_v33  ;;  %v6553_v51 = vld [vmem:[#allocation8 + $0x258] sm:$0xf]  ;;  %v6362_v56 = vor.u32 %v7722_v48, %v6361_v46  ;;  %v8563_v4 = vpack.c.bf16 %v2538_v21, %v2538_v21  ;;  %v609_v20 = vperm.slane %v8077_v63, 6 }
 0x167   : > { %v6554_v62 = vor.u32 %v7770_v52, %v6553_v51  ;;  %v6697_v42 = vld [vmem:[#allocation8 + $0x378] sm:$0xf]  ;;  %v610_v21 = vperm.slane %v8077_v63, 7 }
 0x168   : > { %4489 = vmatpush.bf16.msrb.mxu0 %v6314_v57  ;;  %v6458_v57 = vor.u32 %v7746_v50, %v6457_v49  ;;  %v6793_v46 = vld [vmem:[#allocation8 + $0x438] sm:$0xf]  ;;  %v7854_v49 = vld [vmem:[#allocation8 + $0x500] sm:$0xf0]  ;;  %v6698_v51 = vor.u32 %v7806_v43, %v6697_v42  ;;  %v6949_v43 = vld [vmem:[#allocation8 + $0x570] sm:$0xf] }
 0x169   : > { %4502 = vmatpush.bf16.msrb.mxu1 %v6410_v58  ;;  %v6349_v58 = vld [vmem:[#allocation8 + $0xc0] sm:$0xf]  ;;  %v6889_v48 = vld [vmem:[#allocation8 + $0x4f8] sm:$0xf] }
 0x16a   : > { %4515 = vmatpush.bf16.msrb.mxu2 %v6506_v59  ;;  %4528 = vmatpush.bf16.msrb.mxu3 %v6602_v0  ;;  %v7719_v59 = vld [vmem:[#allocation8 + $0xc8] sm:$0xf0]  ;;  %v6541_v0 = vld [vmem:[#allocation8 + $0x240] sm:$0xf]  ;;  %v6985_v52 = vld [vmem:[#allocation8 + $0x5b8] sm:$0xf] }
 0x16b   : > { %v6350_v15 = vor.u32 %v7719_v59, %v6349_v58  ;;  %v6542_v22 = vor.u32 %v7767_v1, %v6541_v0  ;;  %v6781_v58 = vld [vmem:[#allocation8 + $0x420] sm:$0xf]  ;;  %v7827_v59 = vld [vmem:[#allocation8 + $0x428] sm:$0xf0]  ;;  %v608_v0 = vperm.slane %v8077_v63, 5 }
 0x16c   : > { %4490 = vmatpush.bf16.msrb.mxu0 %v6302_v8  ;;  %v2312_v2 = vpop.f32.mrf.mxu2  ;;  %v6637_v63 = vld [vmem:[#allocation8 + $0x300] sm:$0xf] }
 0x16d   : > { %4503 = vmatpush.bf16.msrb.mxu1 %v6398_v7  ;;  %v6254_v7 = vor.u32 %v7695_v55, %v6253_v54  ;;  %v6890_v55 = vor.u32 %v7854_v49, %v6889_v48 }
 0x16e   : > { %4516 = vmatpush.bf16.msrb.mxu2 %v6494_v10  ;;  %4529 = vmatpush.bf16.msrb.mxu3 %v6590_v14  ;;  %v2325_v8 = vpop.f32.mrf.mxu3  ;;  %v7836_v10 = vld [vmem:[#allocation8 + $0x470] sm:$0xf0]  ;;  %v2536_v14 = vmax.f32 %v8517_v41, 0.0  ;;  %v7833_v41 = vld [vmem:[#allocation8 + $0x458] sm:$0xf0] }
 0x16f   : > { %v6818_v34 = vor.u32 %v7836_v10, %v6817_v18  ;;  %v6782_v8 = vor.u32 %v7827_v59, %v6781_v58  ;;  %v6673_v10 = vld [vmem:[#allocation8 + $0x348] sm:$0xf] }
 0x170   : > { %4491 = vmatpush.bf16.msrb.mxu0 %v6290_v23  ;;  %v6722_v23 = vor.u32 %v7812_v3, %v6721_v9  ;;  %v8559_v33 = vpack.c.bf16 %v2536_v14, %v2536_v14  ;;  %v6973_v9 = vld [vmem:[#allocation8 + $0x5a0] sm:$0xf]  ;;  %v7875_v3 = vld [vmem:[#allocation8 + $0x5a8] sm:$0xf0]  ;;  %v7824_v14 = vld [vmem:[#allocation8 + $0x410] sm:$0xf0] }
 0x171   : > { %4504 = vmatpush.bf16.msrb.mxu1 %v6386_v25  ;;  %v7009_v25 = vld [vmem:[#allocation8 + $0x5e8] sm:$0xf] }
 0x172   : > { %4517 = vmatpush.bf16.msrb.mxu2 %v6482_v26  ;;  %4530 = vmatpush.bf16.msrb.mxu3 %v6578_v29  ;;  %v7884_v26 = vld [vmem:[#allocation8 + $0x5f0] sm:$0xf0]  ;;  %v7809_v29 = vld [vmem:[#allocation8 + $0x398] sm:$0xf0] }
 0x173   : > { %v7010_v60 = vor.u32 %v7884_v26, %v7009_v25  ;;  %v6710_v35 = vor.u32 %v7809_v29, %v6709_v28  ;;  %v6674_v25 = vor.u32 %v7800_v11, %v6673_v10  ;;  %v6961_v26 = vld [vmem:[#allocation8 + $0x588] sm:$0xf]  ;;  %v6661_v29 = vld [vmem:[#allocation8 + $0x330] sm:$0xf] }
 0x174   : > { %4492 = vmatpush.bf16.msrb.mxu0 %v6278_v38  ;;  %v7881_v38 = vld [vmem:[#allocation8 + $0x5d8] sm:$0xf0]  ;;  %v7105_v10 = vld [vmem:[#allocation8 + $0x6a8] sm:$0xf] }
 0x175   : > { %4505 = vmatpush.bf16.msrb.mxu1 %v6374_v39  ;;  %v6806_v39 = vor.u32 %v7833_v41, %v6805_v17  ;;  %v6998_v50 = vor.u32 %v7881_v38, %v6997_v37  ;;  %v7797_v17 = vld [vmem:[#allocation8 + $0x338] sm:$0xf0]  ;;  %v6757_v41 = vld [vmem:[#allocation8 + $0x3f0] sm:$0xf] }
 0x176   : > { %4518 = vmatpush.bf16.msrb.mxu2 %v6470_v40  ;;  %4531 = vmatpush.bf16.msrb.mxu3 %v6566_v47  ;;  %v6902_v40 = vor.u32 %v7857_v30, %v6901_v19  ;;  %v7830_v47 = vld [vmem:[#allocation8 + $0x440] sm:$0xf0]  ;;  %v7821_v30 = vld [vmem:[#allocation8 + $0x3f8] sm:$0xf0]  ;;  %v6662_v42 = vor.u32 %v7797_v17, %v6661_v29 }
 0x177   : > { %v6794_v54 = vor.u32 %v7830_v47, %v6793_v46  ;;  %v7869_v46 = vld [vmem:[#allocation8 + $0x578] sm:$0xf0]  ;;  %v6758_v48 = vor.u32 %v7821_v30, %v6757_v41  ;;  %v7980_v30 = vld [vmem:[#allocation8 + $0x8f0] sm:$0xf0] }
 0x178   : > { %4493 = vmatpush.bf16.msrb.mxu0 %v6266_v53  ;;  %v7878_v53 = vld [vmem:[#allocation8 + $0x5c0] sm:$0xf0]  ;;  %v6950_v58 = vor.u32 %v7869_v46, %v6949_v43  ;;  %v7905_v41 = vld [vmem:[#allocation8 + $0x698] sm:$0xf0] }
 0x179   : > { %4506 = vmatpush.bf16.msrb.mxu1 %v6362_v56  ;;  %v6685_v56 = vld [vmem:[#allocation8 + $0x360] sm:$0xf]  ;;  %v6986_v1 = vor.u32 %v7878_v53, %v6985_v52  ;;  %v6745_v52 = vld [vmem:[#allocation8 + $0x3d8] sm:$0xf] }
 0x17a   : > { %4519 = vmatpush.bf16.msrb.mxu2 %v6458_v57  ;;  %4532 = vmatpush.bf16.msrb.mxu3 %v6554_v62  ;;  %v7803_v57 = vld [vmem:[#allocation8 + $0x368] sm:$0xf0] }
 0x17b   : > { %v7851_v62 = vld [vmem:[#allocation8 + $0x4e8] sm:$0xf0]  ;;  %v6686_v2 = vor.u32 %v7803_v57, %v6685_v56 }
 0x17c   : > { %4494 = vmatpush.bf16.msrb.mxu0 %v6254_v7  ;;  %v8569_v18 = vpop.f32.mrf.mxu0  ;;  %v6878_v7 = vor.u32 %v7851_v62, %v6877_v61  ;;  %v6937_v61 = vld [vmem:[#allocation8 + $0x558] sm:$0xf]  ;;  %v7866_v62 = vld [vmem:[#allocation8 + $0x560] sm:$0xf0] }
 0x17d   : > { %4507 = vmatpush.bf16.msrb.mxu1 %v6350_v15  ;;  %v2349_v13 = vpop.f32.mrf.mxu1  ;;  %v6865_v15 = vld [vmem:[#allocation8 + $0x4c8] sm:$0xf] }
 0x17e   : > { %4520 = vmatpush.bf16.msrb.mxu2 %v6446_v16  ;;  %4533 = vmatpush.bf16.msrb.mxu3 %v6542_v22  ;;  %v7848_v16 = vld [vmem:[#allocation8 + $0x4d0] sm:$0xf0]  ;;  %v2272_v22 = vadd.f32 %v8539_v45, %v608_v0  ;;  %v2311_v45 = vadd.f32 %v8549_v32, %v609_v20  ;;  %v2350_v38 = vadd.f32 %v2349_v13, %v610_v21  ;;  %v6841_v32 = vld [vmem:[#allocation8 + $0x498] sm:$0xf] }
 0x17f   : > { %4495 = vmatmul.bf16.vlgmr.msrb.gmra.mxu0 %v8557_v31  ;;  %v6866_v28 = vor.u32 %v7848_v16, %v6865_v15  ;;  %v7908_v13 = vld [vmem:[#allocation8 + $0x6b0] sm:$0xf0]  ;;  %v2539_v16 = vmax.f32 %v8537_v44, 0.0  ;;  %v6938_v21 = vor.u32 %v7866_v62, %v6937_v61 }
 0x180   : > { %4539 = vmatpush.bf16.msra.mxu0 %v6722_v23  ;;  %4508 = vmatmul.bf16.vlgmr.msrb.gmra.mxu1 %v8559_v33  ;;  %v6974_v23 = vor.u32 %v7875_v3, %v6973_v9  ;;  %v6733_v9 = vld [vmem:[#allocation8 + $0x3c0] sm:$0xf]  ;;  %v7815_v3 = vld [vmem:[#allocation8 + $0x3c8] sm:$0xf0]  ;;  %v7932_v15 = vld [vmem:[#allocation8 + $0x770] sm:$0xf0]  ;;  %v7106_v29 = vor.u32 %v7908_v13, %v7105_v10 }
 0x181   : > { %4552 = vmatpush.bf16.msra.mxu1 %v6818_v34  ;;  %4521 = vmatmul.bf16.vlgmr.msrb.gmra.mxu2 %v8561_v24  ;;  %v7872_v34 = vld [vmem:[#allocation8 + $0x590] sm:$0xf0]  ;;  %v7057_v13 = vld [vmem:[#allocation8 + $0x648] sm:$0xf] }
 0x182   : > { %4565 = vmatpush.bf16.msra.mxu2 %v6914_v27  ;;  %4534 = vmatmul.bf16.vlgmr.msrb.gmra.mxu3 %v8563_v4  ;;  %v6770_v27 = vor.u32 %v7824_v14, %v6769_v12  ;;  %v7201_v14 = vld [vmem:[#allocation8 + $0x768] sm:$0xf] }
 0x183   : > { %4578 = vmatpush.bf16.msra.mxu3 %v7010_v60  ;;  %v6853_v60 = vld [vmem:[#allocation8 + $0x4b0] sm:$0xf]  ;;  %v7202_v17 = vor.u32 %v7932_v15, %v7201_v14 }
 0x184   : > { %4540 = vmatpush.bf16.msra.mxu0 %v6710_v35  ;;  %v2362_v19 = vpop.f32.mrf.mxu2  ;;  %v7845_v35 = vld [vmem:[#allocation8 + $0x4b8] sm:$0xf0]  ;;  %v2338_v47 = vpop.f32.mrf.mxu0 }
 0x185   : > { %4553 = vmatpush.bf16.msra.mxu1 %v6806_v39  ;;  %v2285_v39 = vadd.f32 %v8545_v5, %v2272_v22  ;;  %v6854_v49 = vor.u32 %v7845_v35, %v6853_v60  ;;  %v2351_v53 = vpop.f32.mrf.mxu1  ;;  %v2324_v5 = vadd.f32 %v8551_v36, %v2311_v45  ;;  %v2363_v56 = vadd.f32 %v2362_v19, %v2350_v38  ;;  %v7839_v36 = vld [vmem:[#allocation8 + $0x488] sm:$0xf0]  ;;  %v7393_v19 = vld [vmem:[#allocation8 + $0x8e8] sm:$0xf]  ;;  %v7189_v35 = vld [vmem:[#allocation8 + $0x750] sm:$0xf] }
 0x186   : > { %4566 = vmatpush.bf16.msra.mxu2 %v6902_v40  ;;  %v2375_v37 = vpop.f32.mrf.mxu3  ;;  %v6962_v40 = vor.u32 %v7872_v34, %v6961_v26  ;;  %v6734_v26 = vor.u32 %v7815_v3, %v6733_v9  ;;  %v7394_v43 = vor.u32 %v7980_v30, %v7393_v19  ;;  %v7165_v9 = vld [vmem:[#allocation8 + $0x720] sm:$0xf]  ;;  %v7923_v3 = vld [vmem:[#allocation8 + $0x728] sm:$0xf0]  ;;  %v7968_v19 = vld [vmem:[#allocation8 + $0x890] sm:$0xf0] }
 0x187   : > { %4579 = vmatpush.bf16.msra.mxu3 %v6998_v50  ;;  %v6649_v50 = vld [vmem:[#allocation8 + $0x318] sm:$0xf]  ;;  %v2298_v57 = vadd.f32 %v8547_v6, %v2285_v39  ;;  %v2337_v6 = vadd.f32 %v8569_v18, %v2324_v5  ;;  %v2376_v12 = vadd.f32 %v2375_v37, %v2363_v56  ;;  %v7093_v18 = vld [vmem:[#allocation8 + $0x690] sm:$0xf]  ;;  %v7929_v37 = vld [vmem:[#allocation8 + $0x758] sm:$0xf0] }
 0x188   : > { %4541 = vmatpush.bf16.msra.mxu0 %v6698_v51  ;;  %v7794_v51 = vld [vmem:[#allocation8 + $0x320] sm:$0xf0]  ;;  %v7285_v39 = vld [vmem:[#allocation8 + $0x810] sm:$0xf]  ;;  %v7094_v47 = vor.u32 %v7905_v41, %v7093_v18  ;;  %v7273_v56 = vld [vmem:[#allocation8 + $0x7f8] sm:$0xf] }
 0x189   : > { %4554 = vmatpush.bf16.msra.mxu1 %v6794_v54  ;;  %v7818_v54 = vld [vmem:[#allocation8 + $0x3e0] sm:$0xf0]  ;;  %v6650_v59 = vor.u32 %v7794_v51, %v6649_v50  ;;  %v2540_v20 = vmax.f32 %v2298_v57, 0.0  ;;  %v2541_v44 = vmax.f32 %v2337_v6, 0.0  ;;  %v2542_v60 = vmax.f32 %v2376_v12, 0.0 }
 0x18a   : > { %4567 = vmatpush.bf16.msra.mxu2 %v6890_v55  ;;  %v7842_v55 = vld [vmem:[#allocation8 + $0x4a0] sm:$0xf0]  ;;  %v6746_v0 = vor.u32 %v7818_v54, %v6745_v52  ;;  %v7381_v50 = vld [vmem:[#allocation8 + $0x8d0] sm:$0xf]  ;;  %v7977_v51 = vld [vmem:[#allocation8 + $0x8d8] sm:$0xf0]  ;;  %v7166_v12 = vor.u32 %v7923_v3, %v7165_v9 }
 0x18b   : > { %4580 = vmatpush.bf16.msra.mxu3 %v6986_v1  ;;  %v6842_v1 = vor.u32 %v7842_v55, %v6841_v32  ;;  %v8580_v46 = vpack.c.bf16 %v2540_v20, %v2540_v20  ;;  %v8582_v52 = vpack.c.bf16 %v2541_v44, %v2541_v44  ;;  %v8584_v53 = vpack.c.bf16 %v2542_v60, %v2542_v60  ;;  %v7902_v54 = vld [vmem:[#allocation8 + $0x680] sm:$0xf0]  ;;  %v7177_v32 = vld [vmem:[#allocation8 + $0x738] sm:$0xf]  ;;  %v7971_v20 = vld [vmem:[#allocation8 + $0x8a8] sm:$0xf0] }
 0x18c   : > { %4542 = vmatpush.bf16.msra.mxu0 %v6686_v2  ;;  %v7791_v2 = vld [vmem:[#allocation8 + $0x308] sm:$0xf0]  ;;  %v7926_v55 = vld [vmem:[#allocation8 + $0x740] sm:$0xf0]  ;;  %v7345_v41 = vld [vmem:[#allocation8 + $0x888] sm:$0xf] }
 0x18d   : > { %4555 = vmatpush.bf16.msra.mxu1 %v6782_v8  ;;  %v2364_v8 = vpop.f32.mrf.mxu2  ;;  %v6638_v22 = vor.u32 %v7791_v2, %v6637_v63  ;;  %v7950_v57 = vld [vmem:[#allocation8 + $0x800] sm:$0xf0]  ;;  %v7178_v62 = vor.u32 %v7926_v55, %v7177_v32  ;;  %v8589_v63 = vld [vmem:[#allocation7 + $0x8] sm:$0xf]  ;;  %v7899_v2 = vld [vmem:[#allocation8 + $0x668] sm:$0xf0] }
 0x18e   : > { %4568 = vmatpush.bf16.msra.mxu2 %v6878_v7  ;;  %v6829_v7 = vld [vmem:[#allocation8 + $0x480] sm:$0xf]  ;;  %v2377_v11 = vpop.f32.mrf.mxu3  ;;  %v7274_v8 = vor.u32 %v7950_v57, %v7273_v56  ;;  %v611_v10 = vperm.slane %v8589_v63, 0  ;;  %v7893_v30 = vld [vmem:[#allocation8 + $0x638] sm:$0xf0] }
 0x18f   : > { %4581 = vmatpush.bf16.msra.mxu3 %v6974_v23  ;;  %v7297_v23 = vld [vmem:[#allocation8 + $0x828] sm:$0xf]  ;;  %v6830_v34 = vor.u32 %v7839_v36, %v6829_v7  ;;  %v7261_v7 = vld [vmem:[#allocation8 + $0x7e0] sm:$0xf]  ;;  %v7947_v36 = vld [vmem:[#allocation8 + $0x7e8] sm:$0xf0] }
 0x190   : > { %4543 = vmatpush.bf16.msra.mxu0 %v6674_v25  ;;  %v7956_v25 = vld [vmem:[#allocation8 + $0x830] sm:$0xf0]  ;;  %v7141_v44 = vld [vmem:[#allocation8 + $0x6f0] sm:$0xf]  ;;  %v7917_v60 = vld [vmem:[#allocation8 + $0x6f8] sm:$0xf0] }
 0x191   : > { %4556 = vmatpush.bf16.msra.mxu1 %v6770_v27  ;;  %v6925_v27 = vld [vmem:[#allocation8 + $0x540] sm:$0xf]  ;;  %v7298_v45 = vor.u32 %v7956_v25, %v7297_v23  ;;  %v7920_v23 = vld [vmem:[#allocation8 + $0x710] sm:$0xf0]  ;;  %v7262_v25 = vor.u32 %v7947_v36, %v7261_v7  ;;  %v7965_v32 = vld [vmem:[#allocation8 + $0x878] sm:$0xf0] }
 0x192   : > { %4569 = vmatpush.bf16.msra.mxu2 %v6866_v28  ;;  %v7863_v28 = vld [vmem:[#allocation8 + $0x548] sm:$0xf0]  ;;  %v7890_v55 = vld [vmem:[#allocation8 + $0x620] sm:$0xf0]  ;;  %v7321_v3 = vld [vmem:[#allocation8 + $0x858] sm:$0xf] }
 0x193   : > { %4582 = vmatpush.bf16.msra.mxu3 %v6962_v40  ;;  %v6926_v38 = vor.u32 %v7863_v28, %v6925_v27  ;;  %v7953_v40 = vld [vmem:[#allocation8 + $0x818] sm:$0xf0]  ;;  %v7914_v56 = vld [vmem:[#allocation8 + $0x6e0] sm:$0xf0]  ;;  %v7887_v9 = vld [vmem:[#allocation8 + $0x608] sm:$0xf0] }
 0x194   : > { %4544 = vmatpush.bf16.msra.mxu0 %v6662_v42  ;;  %v8578_v42 = vpack.c.bf16 %v2539_v16, %v2539_v16  ;;  %v7286_v5 = vor.u32 %v7953_v40, %v7285_v39  ;;  %v7357_v16 = vld [vmem:[#allocation8 + $0x8a0] sm:$0xf]  ;;  %v7911_v36 = vld [vmem:[#allocation8 + $0x6c8] sm:$0xf0] }
 0x195   : > { %4557 = vmatpush.bf16.msra.mxu1 %v6758_v48  ;;  %v7190_v48 = vor.u32 %v7929_v37, %v7189_v35  ;;  %v7358_v28 = vor.u32 %v7971_v20, %v7357_v16  ;;  %v7117_v7 = vld [vmem:[#allocation8 + $0x6c0] sm:$0xf] }
 0x196   : > { %4570 = vmatpush.bf16.msra.mxu2 %v6854_v49  ;;  %v7081_v49 = vld [vmem:[#allocation8 + $0x678] sm:$0xf]  ;;  %v7213_v20 = vld [vmem:[#allocation8 + $0x780] sm:$0xf] }
 0x197   : > { %4583 = vmatpush.bf16.msra.mxu3 %v6950_v58  ;;  %v7069_v58 = vld [vmem:[#allocation8 + $0x660] sm:$0xf]  ;;  %v7082_v61 = vor.u32 %v7902_v54, %v7081_v49  ;;  %v7033_v49 = vld [vmem:[#allocation8 + $0x618] sm:$0xf]  ;;  %v7333_v54 = vld [vmem:[#allocation8 + $0x870] sm:$0xf] }
 0x198   : > { %4545 = vmatpush.bf16.msra.mxu0 %v6650_v59  ;;  %v7382_v59 = vor.u32 %v7977_v51, %v7381_v50  ;;  %v7070_v6 = vor.u32 %v7899_v2, %v7069_v58  ;;  %v7225_v58 = vld [vmem:[#allocation8 + $0x798] sm:$0xf] }
 0x199   : > { %4558 = vmatpush.bf16.msra.mxu1 %v6746_v0  ;;  %v7369_v0 = vld [vmem:[#allocation8 + $0x8b8] sm:$0xf] }
 0x19a   : > { %4571 = vmatpush.bf16.msra.mxu2 %v6842_v1  ;;  %v7974_v1 = vld [vmem:[#allocation8 + $0x8c0] sm:$0xf0] }
 0x19b   : > { %4584 = vmatpush.bf16.msra.mxu3 %v6938_v21  ;;  %v7370_v11 = vor.u32 %v7974_v1, %v7369_v0  ;;  %v7896_v21 = vld [vmem:[#allocation8 + $0x650] sm:$0xf0]  ;;  %v7334_v0 = vor.u32 %v7965_v32, %v7333_v54  ;;  %v7034_v1 = vor.u32 %v7890_v55, %v7033_v49  ;;  %v612_v49 = vperm.slane %v8589_v63, 1  ;;  %v7733_v54 = vld [vmem:[#allocation8 + $0x13c] sm:$0xf] }
 0x19c   : > { %4546 = vmatpush.bf16.msra.mxu0 %v6638_v22  ;;  %v2388_v14 = vpop.f32.mrf.mxu0  ;;  %v7153_v22 = vld [vmem:[#allocation8 + $0x708] sm:$0xf]  ;;  %v7058_v18 = vor.u32 %v7896_v21, %v7057_v13  ;;  %v7739_v13 = vld [vmem:[#allocation8 + $0x16c] sm:$0xf] }
 0x19d   : > { %4559 = vmatpush.bf16.msra.mxu1 %v6734_v26  ;;  %v2401_v15 = vpop.f32.mrf.mxu1  ;;  %v7249_v26 = vld [vmem:[#allocation8 + $0x7c8] sm:$0xf]  ;;  %v2389_v27 = vadd.f32 %v2388_v14, %v611_v10  ;;  %v7715_v10 = vld [vmem:[#allocation8 + $0xac] sm:$0xf]  ;;  %v6435_v14 = vld [vmem:[#allocation8 + $0x174] sm:$0xf0] }
 0x19e   : > { %4572 = vmatpush.bf16.msra.mxu2 %v6830_v34  ;;  %v7944_v34 = vld [vmem:[#allocation8 + $0x7d0] sm:$0xf0]  ;;  %v7935_v21 = vld [vmem:[#allocation8 + $0x788] sm:$0xf0]  ;;  %v6411_v32 = vld [vmem:[#allocation8 + $0x144] sm:$0xf0] }
 0x19f   : > { %4547 = vmatmul.bf16.vlgmr.msra.gmra.mxu0 %v8578_v42  ;;  %4585 = vmatpush.bf16.msra.mxu3 %v6926_v38  ;;  %v7250_v37 = vor.u32 %v7944_v34, %v7249_v26  ;;  %v7941_v38 = vld [vmem:[#allocation8 + $0x7b8] sm:$0xf0]  ;;  %v2402_v39 = vadd.f32 %v2401_v15, %v2389_v27  ;;  %v7763_v26 = vld [vmem:[#allocation8 + $0x22c] sm:$0xf]  ;;  %v6531_v34 = vld [vmem:[#allocation8 + $0x234] sm:$0xf0] }
 0x1a0   : > { %4591 = vmatpush.bf16.msrb.mxu0 %v7106_v29  ;;  %4560 = vmatmul.bf16.vlgmr.msra.gmra.mxu1 %v8580_v46  ;;  %v7154_v29 = vor.u32 %v7920_v23, %v7153_v22 }
 0x1a1   : > { %4604 = vmatpush.bf16.msrb.mxu1 %v7202_v17  ;;  %4573 = vmatmul.bf16.vlgmr.msra.gmra.mxu2 %v8582_v52  ;;  %v7045_v17 = vld [vmem:[#allocation8 + $0x630] sm:$0xf] }
 0x1a2   : > { %4617 = vmatpush.bf16.msrb.mxu2 %v7298_v45  ;;  %4586 = vmatmul.bf16.vlgmr.msra.gmra.mxu3 %v8584_v53  ;;  %v7237_v45 = vld [vmem:[#allocation8 + $0x7b0] sm:$0xf] }
 0x1a3   : > { %4630 = vmatpush.bf16.msrb.mxu3 %v7394_v43  ;;  %v7346_v43 = vor.u32 %v7968_v19, %v7345_v41  ;;  %v7238_v57 = vor.u32 %v7941_v38, %v7237_v45  ;;  %v6327_v41 = vld [vmem:[#allocation8 + $0x9c] sm:$0xf0]  ;;  %v7736_v19 = vld [vmem:[#allocation8 + $0x154] sm:$0xf]  ;;  %v6627_v45 = vld [vmem:[#allocation8 + $0x2f4] sm:$0xf0] }
 0x1a4   : > { %4592 = vmatpush.bf16.msrb.mxu0 %v7094_v47  ;;  %v2414_v35 = vpop.f32.mrf.mxu2  ;;  %v7046_v47 = vor.u32 %v7893_v30, %v7045_v17  ;;  %v2390_v50 = vpop.f32.mrf.mxu0  ;;  %v7959_v17 = vld [vmem:[#allocation8 + $0x848] sm:$0xf0]  ;;  %v6423_v30 = vld [vmem:[#allocation8 + $0x15c] sm:$0xf0]  ;;  %v7760_v38 = vld [vmem:[#allocation8 + $0x214] sm:$0xf] }
 0x1a5   : > { %4605 = vmatpush.bf16.msrb.mxu1 %v7190_v48  ;;  %v7142_v48 = vor.u32 %v7917_v60, %v7141_v44  ;;  %v2403_v51 = vpop.f32.mrf.mxu1  ;;  %v7214_v44 = vor.u32 %v7935_v21, %v7213_v20  ;;  %v7709_v50 = vld [vmem:[#allocation8 + $0x7c] sm:$0xf]  ;;  %v7727_v21 = vld [vmem:[#allocation8 + $0x10c] sm:$0xf] }
 0x1a6   : > { %4618 = vmatpush.bf16.msrb.mxu2 %v7286_v5  ;;  %v8593_v40 = vpop.f32.mrf.mxu3  ;;  %v7129_v5 = vld [vmem:[#allocation8 + $0x6d8] sm:$0xf]  ;;  %v6315_v51 = vld [vmem:[#allocation8 + $0x84] sm:$0xf0] }
 0x1a7   : > { %4631 = vmatpush.bf16.msrb.mxu3 %v7382_v59  ;;  %v7938_v59 = vld [vmem:[#allocation8 + $0x7a0] sm:$0xf0]  ;;  %v7130_v2 = vor.u32 %v7914_v56, %v7129_v5  ;;  %v7784_v56 = vld [vmem:[#allocation8 + $0x2d4] sm:$0xf] }
 0x1a8   : > { %4593 = vmatpush.bf16.msrb.mxu0 %v7082_v61  ;;  %v2415_v61 = vadd.f32 %v2414_v35, %v2402_v39  ;;  %v6534_v35 = vor.u32 %v7763_v26, %v6531_v34  ;;  %v6519_v39 = vld [vmem:[#allocation8 + $0x21c] sm:$0xf0]  ;;  %v7778_v26 = vld [vmem:[#allocation8 + $0x2a4] sm:$0xf]  ;;  %v6591_v34 = vld [vmem:[#allocation8 + $0x2ac] sm:$0xf0] }
 0x1a9   : > { %4606 = vmatpush.bf16.msrb.mxu1 %v7178_v62  ;;  %v7021_v62 = vld [vmem:[#allocation8 + $0x600] sm:$0xf]  ;;  %v6522_v5 = vor.u32 %v7760_v38, %v6519_v39  ;;  %v7775_v38 = vld [vmem:[#allocation8 + $0x28c] sm:$0xf]  ;;  %v6579_v39 = vld [vmem:[#allocation8 + $0x294] sm:$0xf0] }
 0x1aa   : > { %4619 = vmatpush.bf16.msrb.mxu2 %v7274_v8  ;;  %v7962_v8 = vld [vmem:[#allocation8 + $0x860] sm:$0xf0]  ;;  %v2543_v15 = vmax.f32 %v2415_v61, 0.0  ;;  %v7022_v23 = vor.u32 %v7887_v9, %v7021_v62  ;;  %v6318_v61 = vor.u32 %v7709_v50, %v6315_v51  ;;  %v6414_v62 = vor.u32 %v7733_v54, %v6411_v32  ;;  %v7697_v32 = vld [vmem:[#allocation8 + $0x1c] sm:$0xf] }
 0x1ab   : > { %4632 = vmatpush.bf16.msrb.mxu3 %v7370_v11  ;;  %v7226_v11 = vor.u32 %v7938_v59, %v7225_v58  ;;  %v7322_v22 = vor.u32 %v7962_v8, %v7321_v3  ;;  %v7757_v58 = vld [vmem:[#allocation8 + $0x1fc] sm:$0xf]  ;;  %v6507_v59 = vld [vmem:[#allocation8 + $0x204] sm:$0xf0]  ;;  %v7730_v9 = vld [vmem:[#allocation8 + $0x124] sm:$0xf] }
 0x1ac   : > { %4594 = vmatpush.bf16.msrb.mxu0 %v7070_v6  ;;  %v2416_v6 = vpop.f32.mrf.mxu2  ;;  %v8595_v60 = vpack.c.bf16 %v2543_v15, %v2543_v15  ;;  %v6399_v3 = vld [vmem:[#allocation8 + $0x12c] sm:$0xf0]  ;;  %v7703_v15 = vld [vmem:[#allocation8 + $0x4c] sm:$0xf] }
 0x1ad   : > { %4607 = vmatpush.bf16.msrb.mxu1 %v7166_v12  ;;  %v6339_v12 = vld [vmem:[#allocation8 + $0xb4] sm:$0xf0]  ;;  %v6495_v6 = vld [vmem:[#allocation8 + $0x1ec] sm:$0xf0] }
 0x1ae   : > { %4620 = vmatpush.bf16.msrb.mxu2 %v7262_v25  ;;  %v2429_v16 = vpop.f32.mrf.mxu3  ;;  %v7118_v25 = vor.u32 %v7911_v36, %v7117_v7  ;;  %v6342_v27 = vor.u32 %v7715_v10, %v6339_v12  ;;  %v6510_v7 = vor.u32 %v7757_v58, %v6507_v59  ;;  %v7781_v36 = vld [vmem:[#allocation8 + $0x2bc] sm:$0xf]  ;;  %v6603_v10 = vld [vmem:[#allocation8 + $0x2c4] sm:$0xf0]  ;;  %v6582_v59 = vor.u32 %v7775_v38, %v6579_v39 }
 0x1af   : > { %4633 = vmatpush.bf16.msrb.mxu3 %v7358_v28  ;;  %v6438_v28 = vor.u32 %v7739_v13, %v6435_v14  ;;  %v6402_v14 = vor.u32 %v7730_v9, %v6399_v3  ;;  %v7805_v38 = vld [vmem:[#allocation8 + $0x37c] sm:$0xf]  ;;  %v6699_v39 = vld [vmem:[#allocation8 + $0x384] sm:$0xf0] }
 0x1b0   : > { %4595 = vmatpush.bf16.msrb.mxu0 %v7058_v18  ;;  %v7712_v18 = vld [vmem:[#allocation8 + $0x94] sm:$0xf] }
 0x1b1   : > { %4608 = vmatpush.bf16.msrb.mxu1 %v7154_v29  ;;  %v7309_v29 = vld [vmem:[#allocation8 + $0x840] sm:$0xf] }
 0x1b2   : > { %4621 = vmatpush.bf16.msrb.mxu2 %v7250_v37  ;;  %v7787_v37 = vld [vmem:[#allocation8 + $0x2ec] sm:$0xf] }
 0x1b3   : > { %4634 = vmatpush.bf16.msrb.mxu3 %v7346_v43  ;;  %v7310_v43 = vor.u32 %v7959_v17, %v7309_v29  ;;  %v6630_v55 = vor.u32 %v7787_v37, %v6627_v45  ;;  %v6594_v37 = vor.u32 %v7778_v26, %v6591_v34 }
 0x1b4   : > { %4596 = vmatpush.bf16.msrb.mxu0 %v7046_v47  ;;  %v6330_v47 = vor.u32 %v7712_v18, %v6327_v41  ;;  %v6483_v18 = vld [vmem:[#allocation8 + $0x1d4] sm:$0xf0]  ;;  %v7700_v41 = vld [vmem:[#allocation8 + $0x34] sm:$0xf] }
 0x1b5   : > { %4609 = vmatpush.bf16.msrb.mxu1 %v7142_v48  ;;  %v6426_v48 = vor.u32 %v7736_v19, %v6423_v30  ;;  %v6279_v19 = vld [vmem:[#allocation8 + $0x3c] sm:$0xf0] }
 0x1b6   : > { %4622 = vmatpush.bf16.msrb.mxu2 %v7238_v57  ;;  %v6615_v57 = vld [vmem:[#allocation8 + $0x2dc] sm:$0xf0]  ;;  %v6282_v50 = vor.u32 %v7700_v41, %v6279_v19 }
 0x1b7   : > { %4635 = vmatpush.bf16.msrb.mxu3 %v7334_v0  ;;  %v7706_v0 = vld [vmem:[#allocation8 + $0x64] sm:$0xf]  ;;  %v6618_v8 = vor.u32 %v7784_v56, %v6615_v57  ;;  %v7721_v56 = vld [vmem:[#allocation8 + $0xdc] sm:$0xf]  ;;  %v6363_v57 = vld [vmem:[#allocation8 + $0xe4] sm:$0xf0] }
 0x1b8   : > { %4597 = vmatpush.bf16.msrb.mxu0 %v7034_v1  ;;  %v2428_v1 = vadd.f32 %v8593_v40, %v612_v49  ;;  %v6291_v40 = vld [vmem:[#allocation8 + $0x54] sm:$0xf0]  ;;  %v6471_v49 = vld [vmem:[#allocation8 + $0x1bc] sm:$0xf0]  ;;  %v6366_v3 = vor.u32 %v7721_v56, %v6363_v57  ;;  %v6687_v56 = vld [vmem:[#allocation8 + $0x36c] sm:$0xf0] }
 0x1b9   : > { %4610 = vmatpush.bf16.msrb.mxu1 %v7130_v2  ;;  %v6303_v2 = vld [vmem:[#allocation8 + $0x6c] sm:$0xf0]  ;;  %v6294_v29 = vor.u32 %v7703_v15, %v6291_v40  ;;  %v7826_v57 = vld [vmem:[#allocation8 + $0x424] sm:$0xf] }
 0x1ba   : > { %4623 = vmatpush.bf16.msrb.mxu2 %v7226_v11  ;;  %v7754_v11 = vld [vmem:[#allocation8 + $0x1e4] sm:$0xf]  ;;  %v6306_v13 = vor.u32 %v7706_v0, %v6303_v2  ;;  %v6567_v0 = vld [vmem:[#allocation8 + $0x27c] sm:$0xf0]  ;;  %v6459_v2 = vld [vmem:[#allocation8 + $0x1a4] sm:$0xf0] }
 0x1bb   : > { %4636 = vmatpush.bf16.msrb.mxu3 %v7322_v22  ;;  %v6387_v22 = vld [vmem:[#allocation8 + $0x114] sm:$0xf0]  ;;  %v6447_v40 = vld [vmem:[#allocation8 + $0x18c] sm:$0xf0] }
 0x1bc   : > { %4598 = vmatpush.bf16.msrb.mxu0 %v7022_v23  ;;  %v2440_v12 = vpop.f32.mrf.mxu0  ;;  %v6606_v23 = vor.u32 %v7781_v36, %v6603_v10  ;;  %v6390_v17 = vor.u32 %v7727_v21, %v6387_v22  ;;  %v7718_v36 = vld [vmem:[#allocation8 + $0xc4] sm:$0xf]  ;;  %v6351_v10 = vld [vmem:[#allocation8 + $0xcc] sm:$0xf0]  ;;  %v7769_v21 = vld [vmem:[#allocation8 + $0x25c] sm:$0xf] }
 0x1bd   : > { %4611 = vmatpush.bf16.msrb.mxu1 %v7118_v25  ;;  %v2441_v16 = vadd.f32 %v2440_v12, %v2428_v1  ;;  %v2453_v20 = vpop.f32.mrf.mxu1  ;;  %v6498_v25 = vor.u32 %v7754_v11, %v6495_v6  ;;  %v7745_v1 = vld [vmem:[#allocation8 + $0x19c] sm:$0xf]  ;;  %v7811_v11 = vld [vmem:[#allocation8 + $0x3ac] sm:$0xf]  ;;  %v6723_v6 = vld [vmem:[#allocation8 + $0x3b4] sm:$0xf0] }
 0x1be   : > { %4624 = vmatpush.bf16.msrb.mxu2 %v7214_v44  ;;  %v7724_v44 = vld [vmem:[#allocation8 + $0xf4] sm:$0xf]  ;;  %v6462_v15 = vor.u32 %v7745_v1, %v6459_v2  ;;  %v6555_v22 = vld [vmem:[#allocation8 + $0x264] sm:$0xf0]  ;;  %v6726_v34 = vor.u32 %v7811_v11, %v6723_v6  ;;  %v6675_v2 = vld [vmem:[#allocation8 + $0x354] sm:$0xf0] }
 0x1bf   : > { %4599 = vmatmul.bf16.vlgmr.msrb.gmra.mxu0 %v8595_v60  ;;  %4637 = vmatpush.bf16.msrb.mxu3 %v7310_v43  ;;  %v6558_v19 = vor.u32 %v7769_v21, %v6555_v22  ;;  %v6903_v21 = vld [vmem:[#allocation8 + $0x51c] sm:$0xf0] }
 0x1c0   : > { %4643 = vmatpush.bf16.msra.mxu0 %v6342_v27  ;;  %v2454_v27 = vadd.f32 %v2453_v20, %v2441_v16  ;;  %v7742_v16 = vld [vmem:[#allocation8 + $0x184] sm:$0xf] }
 0x1c1   : > { %4656 = vmatpush.bf16.msra.mxu1 %v6438_v28  ;;  %v7751_v28 = vld [vmem:[#allocation8 + $0x1cc] sm:$0xf]  ;;  %v6450_v41 = vor.u32 %v7742_v16, %v6447_v40  ;;  %v7856_v40 = vld [vmem:[#allocation8 + $0x514] sm:$0xf] }
 0x1c2   : > { %4669 = vmatpush.bf16.msra.mxu2 %v6534_v35  ;;  %v2544_v30 = vmax.f32 %v2454_v27, 0.0  ;;  %v6375_v35 = vld [vmem:[#allocation8 + $0xfc] sm:$0xf0]  ;;  %v6486_v45 = vor.u32 %v7751_v28, %v6483_v18  ;;  %v7808_v28 = vld [vmem:[#allocation8 + $0x394] sm:$0xf] }
 0x1c3   : > { %4682 = vmatpush.bf16.msra.mxu3 %v6630_v55  ;;  %v6378_v51 = vor.u32 %v7724_v44, %v6375_v35  ;;  %v6711_v18 = vld [vmem:[#allocation8 + $0x39c] sm:$0xf0]  ;;  %v6543_v44 = vld [vmem:[#allocation8 + $0x24c] sm:$0xf0]  ;;  %v613_v35 = vperm.slane %v8589_v63, 2 }
 0x1c4   : > { %4644 = vmatpush.bf16.msra.mxu0 %v6330_v47  ;;  %v8600_v43 = vpack.c.bf16 %v2544_v30, %v2544_v30  ;;  %v8602_v47 = vpop.f32.mrf.mxu2  ;;  %v2442_v55 = vpop.f32.mrf.mxu0  ;;  %v7766_v30 = vld [vmem:[#allocation8 + $0x244] sm:$0xf] }
 0x1c5   : > { %4657 = vmatpush.bf16.msra.mxu1 %v6426_v48  ;;  %v7748_v48 = vld [vmem:[#allocation8 + $0x1b4] sm:$0xf]  ;;  %v2455_v58 = vpop.f32.mrf.mxu1 }
 0x1c6   : > { %4670 = vmatpush.bf16.msra.mxu2 %v6522_v5  ;;  %v8604_v54 = vpop.f32.mrf.mxu3  ;;  %4612 = vmatmul.bf16.vlgmr.msrb.gmra.mxu1 %v8600_v43  ;;  %v6267_v5 = vld [vmem:[#allocation8 + $0x24] sm:$0xf0]  ;;  %v6783_v58 = vld [vmem:[#allocation8 + $0x42c] sm:$0xf0] }
 0x1c7   : > { %4683 = vmatpush.bf16.msra.mxu3 %v6618_v8  ;;  %v6270_v9 = vor.u32 %v7697_v32, %v6267_v5  ;;  %v7694_v8 = vld [vmem:[#allocation8 + $0x4] sm:$0xf]  ;;  %v6702_v32 = vor.u32 %v7805_v38, %v6699_v39 }
 0x1c8   : > { %4645 = vmatpush.bf16.msra.mxu0 %v6318_v61  ;;  %v6474_v61 = vor.u32 %v7748_v48, %v6471_v49  ;;  %v7829_v48 = vld [vmem:[#allocation8 + $0x43c] sm:$0xf]  ;;  %v6795_v49 = vld [vmem:[#allocation8 + $0x444] sm:$0xf0]  ;;  %v7802_v5 = vld [vmem:[#allocation8 + $0x364] sm:$0xf] }
 0x1c9   : > { %4658 = vmatpush.bf16.msra.mxu1 %v6414_v62  ;;  %v7772_v62 = vld [vmem:[#allocation8 + $0x274] sm:$0xf]  ;;  %v6798_v55 = vor.u32 %v7829_v48, %v6795_v49  ;;  %v7790_v38 = vld [vmem:[#allocation8 + $0x304] sm:$0xf]  ;;  %v6639_v49 = vld [vmem:[#allocation8 + $0x30c] sm:$0xf0] }
 0x1ca   : > { %4671 = vmatpush.bf16.msra.mxu2 %v6510_v7  ;;  %v6255_v7 = vld [vmem:[#allocation8 + $0xc] sm:$0xf0]  ;;  %v6570_v12 = vor.u32 %v7772_v62, %v6567_v0  ;;  %v6690_v62 = vor.u32 %v7802_v5, %v6687_v56  ;;  %v6786_v0 = vor.u32 %v7826_v57, %v6783_v58  ;;  %v7107_v5 = vld [vmem:[#allocation8 + $0x6b4] sm:$0xf0]  ;;  %v7931_v58 = vld [vmem:[#allocation8 + $0x76c] sm:$0xf] }
 0x1cb   : > { %4684 = vmatpush.bf16.msra.mxu3 %v6606_v23  ;;  %v6258_v23 = vor.u32 %v7694_v8, %v6255_v7 }
 0x1cc   : > { %4646 = vmatpush.bf16.msra.mxu0 %v6306_v13  ;;  %v7835_v13 = vld [vmem:[#allocation8 + $0x46c] sm:$0xf]  ;;  %v2468_v20 = vpop.f32.mrf.mxu2 }
 0x1cd   : > { %4659 = vmatpush.bf16.msra.mxu1 %v6402_v14  ;;  %v6819_v14 = vld [vmem:[#allocation8 + $0x474] sm:$0xf0] }
 0x1ce   : > { %4672 = vmatpush.bf16.msra.mxu2 %v6498_v25  ;;  %v6354_v25 = vor.u32 %v7718_v36, %v6351_v10  ;;  %v2481_v26 = vpop.f32.mrf.mxu3  ;;  %v6822_v27 = vor.u32 %v7835_v13, %v6819_v14  ;;  %v7859_v36 = vld [vmem:[#allocation8 + $0x52c] sm:$0xf]  ;;  %v6915_v10 = vld [vmem:[#allocation8 + $0x534] sm:$0xf0]  ;;  %v6663_v14 = vld [vmem:[#allocation8 + $0x33c] sm:$0xf0] }
 0x1cf   : > { %4685 = vmatpush.bf16.msra.mxu3 %v6594_v37  ;;  %v6714_v37 = vor.u32 %v7808_v28, %v6711_v18  ;;  %v6918_v20 = vor.u32 %v7859_v36, %v6915_v10  ;;  %v7793_v26 = vld [vmem:[#allocation8 + $0x31c] sm:$0xf]  ;;  %v6651_v18 = vld [vmem:[#allocation8 + $0x324] sm:$0xf0]  ;;  %v7904_v10 = vld [vmem:[#allocation8 + $0x694] sm:$0xf] }
 0x1d0   : > { %4647 = vmatpush.bf16.msra.mxu0 %v6294_v29  ;;  %v7832_v29 = vld [vmem:[#allocation8 + $0x454] sm:$0xf]  ;;  %v6654_v39 = vor.u32 %v7793_v26, %v6651_v18  ;;  %v7925_v26 = vld [vmem:[#allocation8 + $0x73c] sm:$0xf]  ;;  %v6975_v18 = vld [vmem:[#allocation8 + $0x5ac] sm:$0xf0] }
 0x1d1   : > { %4660 = vmatpush.bf16.msra.mxu1 %v6390_v17  ;;  %v6807_v17 = vld [vmem:[#allocation8 + $0x45c] sm:$0xf0] }
 0x1d2   : > { %4673 = vmatpush.bf16.msra.mxu2 %v6486_v45  ;;  %v6810_v45 = vor.u32 %v7832_v29, %v6807_v17  ;;  %v7817_v29 = vld [vmem:[#allocation8 + $0x3dc] sm:$0xf]  ;;  %v6747_v17 = vld [vmem:[#allocation8 + $0x3e4] sm:$0xf0] }
 0x1d3   : > { %4686 = vmatpush.bf16.msra.mxu3 %v6582_v59  ;;  %v6750_v48 = vor.u32 %v7817_v29, %v6747_v17  ;;  %v7844_v29 = vld [vmem:[#allocation8 + $0x4b4] sm:$0xf]  ;;  %v6855_v17 = vld [vmem:[#allocation8 + $0x4bc] sm:$0xf0] }
 0x1d4   : > { %4648 = vmatpush.bf16.msra.mxu0 %v6282_v50  ;;  %v6546_v50 = vor.u32 %v7766_v30, %v6543_v44  ;;  %v7853_v30 = vld [vmem:[#allocation8 + $0x4fc] sm:$0xf]  ;;  %v6891_v44 = vld [vmem:[#allocation8 + $0x504] sm:$0xf0] }
 0x1d5   : > { %4661 = vmatpush.bf16.msra.mxu1 %v6378_v51  ;;  %v2467_v51 = vadd.f32 %v8602_v47, %v613_v35  ;;  %v7799_v47 = vld [vmem:[#allocation8 + $0x34c] sm:$0xf]  ;;  %v6894_v56 = vor.u32 %v7853_v30, %v6891_v44  ;;  %v7898_v44 = vld [vmem:[#allocation8 + $0x664] sm:$0xf] }
 0x1d6   : > { %4674 = vmatpush.bf16.msra.mxu2 %v6474_v61  ;;  %v614_v61 = vperm.slane %v8589_v63, 3  ;;  %v6678_v6 = vor.u32 %v7799_v47, %v6675_v2  ;;  %v7820_v63 = vld [vmem:[#allocation8 + $0x3f4] sm:$0xf] }
 0x1d7   : > { %4687 = vmatpush.bf16.msra.mxu3 %v6570_v12  ;;  %v2480_v59 = vadd.f32 %v8604_v54, %v2467_v51  ;;  %v7796_v12 = vld [vmem:[#allocation8 + $0x334] sm:$0xf]  ;;  %v6735_v51 = vld [vmem:[#allocation8 + $0x3cc] sm:$0xf0] }
 0x1d8   : > { %4649 = vmatpush.bf16.msra.mxu0 %v6270_v9  ;;  %v7823_v9 = vld [vmem:[#allocation8 + $0x40c] sm:$0xf]  ;;  %v7880_v47 = vld [vmem:[#allocation8 + $0x5d4] sm:$0xf] }
 0x1d9   : > { %4662 = vmatpush.bf16.msra.mxu1 %v6366_v3  ;;  %v6771_v3 = vld [vmem:[#allocation8 + $0x414] sm:$0xf0] }
 0x1da   : > { %4675 = vmatpush.bf16.msra.mxu2 %v6462_v15  ;;  %v6774_v54 = vor.u32 %v7823_v9, %v6771_v3  ;;  %v6759_v15 = vld [vmem:[#allocation8 + $0x3fc] sm:$0xf0]  ;;  %v6642_v9 = vor.u32 %v7790_v38, %v6639_v49  ;;  %v7167_v38 = vld [vmem:[#allocation8 + $0x72c] sm:$0xf0]  ;;  %v7841_v49 = vld [vmem:[#allocation8 + $0x49c] sm:$0xf] }
 0x1db   : > { %4688 = vmatpush.bf16.msra.mxu3 %v6558_v19  ;;  %v6906_v19 = vor.u32 %v7856_v40, %v6903_v21 }
 0x1dc   : > { %4650 = vmatpush.bf16.msra.mxu0 %v6258_v23  ;;  %v2492_v1 = vpop.f32.mrf.mxu0  ;;  %v6666_v23 = vor.u32 %v7796_v12, %v6663_v14  ;;  %v7928_v12 = vld [vmem:[#allocation8 + $0x754] sm:$0xf]  ;;  %v7877_v14 = vld [vmem:[#allocation8 + $0x5bc] sm:$0xf] }
 0x1dd   : > { %4663 = vmatpush.bf16.msra.mxu1 %v6354_v25  ;;  %v2493_v8 = vadd.f32 %v2492_v1, %v2480_v59  ;;  %v2505_v7 = vpop.f32.mrf.mxu1  ;;  %v6762_v25 = vor.u32 %v7820_v63, %v6759_v15  ;;  %v7203_v59 = vld [vmem:[#allocation8 + $0x774] sm:$0xf0]  ;;  %v6999_v1 = vld [vmem:[#allocation8 + $0x5dc] sm:$0xf0]  ;;  %v6987_v63 = vld [vmem:[#allocation8 + $0x5c4] sm:$0xf0] }
 0x1de   : > { %4676 = vmatpush.bf16.msra.mxu2 %v6450_v41  ;;  %v2506_v13 = vadd.f32 %v2505_v7, %v614_v61  ;;  %v7850_v61 = vld [vmem:[#allocation8 + $0x4e4] sm:$0xf]  ;;  %v7206_v36 = vor.u32 %v7931_v58, %v7203_v59  ;;  %v7847_v15 = vld [vmem:[#allocation8 + $0x4cc] sm:$0xf]  ;;  %v7155_v59 = vld [vmem:[#allocation8 + $0x714] sm:$0xf0] }
 0x1df   : > { %4651 = vmatmul.bf16.vlgmr.msra.gmra.mxu0 %v8557_v31  ;;  %4689 = vmatpush.bf16.msra.mxu3 %v6546_v50  ;;  %v2545_v11 = vmax.f32 %v2493_v8, 0.0  ;;  %v7814_v50 = vld [vmem:[#allocation8 + $0x3c4] sm:$0xf]  ;;  %v7919_v58 = vld [vmem:[#allocation8 + $0x70c] sm:$0xf] }
 0x1e0   : > { %4695 = vmatpush.bf16.msrb.mxu0 %v6726_v34  ;;  %4664 = vmatmul.bf16.vlgmr.msra.gmra.mxu1 %v8559_v33  ;;  %v6738_v3 = vor.u32 %v7814_v50, %v6735_v51  ;;  %v6843_v50 = vld [vmem:[#allocation8 + $0x4a4] sm:$0xf0]  ;;  %v7871_v51 = vld [vmem:[#allocation8 + $0x58c] sm:$0xf] }
 0x1e1   : > { %4708 = vmatpush.bf16.msrb.mxu1 %v6822_v27  ;;  %v8613_v16 = vpack.c.bf16 %v2545_v11, %v2545_v11 }
 0x1e3   : > { %4625 = vmatmul.bf16.vlgmr.msrb.gmra.mxu2 %v8613_v16 }
 0x1e4   : > { %4696 = vmatpush.bf16.msrb.mxu0 %v6714_v37  ;;  %v2518_v22 = vpop.f32.mrf.mxu2  ;;  %v2494_v28 = vpop.f32.mrf.mxu0  ;;  %4721 = vmatpush.bf16.msrb.mxu2 %v6918_v20  ;;  %v7883_v37 = vld [vmem:[#allocation8 + $0x5ec] sm:$0xf]  ;;  %v6867_v20 = vld [vmem:[#allocation8 + $0x4d4] sm:$0xf0] }
 0x1e5   : > { %4709 = vmatpush.bf16.msrb.mxu1 %v6810_v45  ;;  %v2519_v34 = vadd.f32 %v2518_v22, %v2506_v13  ;;  %v2507_v41 = vpop.f32.mrf.mxu1  ;;  %v7011_v45 = vld [vmem:[#allocation8 + $0x5f4] sm:$0xf0]  ;;  %v7191_v13 = vld [vmem:[#allocation8 + $0x75c] sm:$0xf0]  ;;  %v7901_v22 = vld [vmem:[#allocation8 + $0x67c] sm:$0xf] }
 0x1e6   : > { %v2531_v27 = vpop.f32.mrf.mxu3  ;;  %v7014_v57 = vor.u32 %v7883_v37, %v7011_v45  ;;  %v7194_v21 = vor.u32 %v7928_v12, %v7191_v13  ;;  %v7874_v28 = vld [vmem:[#allocation8 + $0x5a4] sm:$0xf]  ;;  %v8621_v41 = vld [vmem:[#allocation10] sm:$0x7]  ;;  %v7071_v37 = vld [vmem:[#allocation8 + $0x66c] sm:$0xf0] }
 0x1e7   : > { %v2532_v35 = vadd.f32 %v2531_v27, %v2519_v34  ;;  %v7179_v34 = vld [vmem:[#allocation8 + $0x744] sm:$0xf0]  ;;  %v6870_v27 = vor.u32 %v7847_v15, %v6867_v20  ;;  %v7922_v45 = vld [vmem:[#allocation8 + $0x724] sm:$0xf]  ;;  %v7047_v13 = vld [vmem:[#allocation8 + $0x63c] sm:$0xf0] }
 0x1e8   : > { %4697 = vmatpush.bf16.msrb.mxu0 %v6702_v32  ;;  %4722 = vmatpush.bf16.msrb.mxu2 %v6906_v19  ;;  %v7182_v30 = vor.u32 %v7925_v26, %v7179_v34  ;;  %v7952_v26 = vld [vmem:[#allocation8 + $0x814] sm:$0xf]  ;;  %v7287_v34 = vld [vmem:[#allocation8 + $0x81c] sm:$0xf0] }
 0x1e9   : > { %4710 = vmatpush.bf16.msrb.mxu1 %v6798_v55  ;;  %v2546_v32 = vmax.f32 %v2532_v35, 0.0  ;;  %v7907_v55 = vld [vmem:[#allocation8 + $0x6ac] sm:$0xf]  ;;  %v6978_v35 = vor.u32 %v7874_v28, %v6975_v18 }
 0x1ea   : > { %v7110_v7 = vor.u32 %v7907_v55, %v7107_v5  ;;  %v7074_v55 = vor.u32 %v7898_v44, %v7071_v37  ;;  %v7170_v5 = vor.u32 %v7922_v45, %v7167_v38  ;;  %v7862_v45 = vld [vmem:[#allocation8 + $0x544] sm:$0xf]  ;;  %v7290_v38 = vor.u32 %v7952_v26, %v7287_v34  ;;  %v7973_v26 = vld [vmem:[#allocation8 + $0x8bc] sm:$0xf]  ;;  %v7371_v34 = vld [vmem:[#allocation8 + $0x8c4] sm:$0xf0] }
 0x1ec   : > { %4698 = vmatpush.bf16.msrb.mxu0 %v6690_v62  ;;  %v8616_v62 = vpack.c.bf16 %v2546_v32, %v2546_v32  ;;  %v2520_v2 = vpop.f32.mrf.mxu2  ;;  %4723 = vmatpush.bf16.msrb.mxu2 %v6894_v56  ;;  %v6963_v32 = vld [vmem:[#allocation8 + $0x594] sm:$0xf0]  ;;  %v7895_v56 = vld [vmem:[#allocation8 + $0x64c] sm:$0xf] }
 0x1ed   : > { %4711 = vmatpush.bf16.msrb.mxu1 %v6786_v0  ;;  %v6879_v0 = vld [vmem:[#allocation8 + $0x4ec] sm:$0xf0]  ;;  %v7838_v2 = vld [vmem:[#allocation8 + $0x484] sm:$0xf] }
 0x1ee   : > { %v2533_v8 = vpop.f32.mrf.mxu3  ;;  %4638 = vmatmul.bf16.vlgmr.msrb.gmra.mxu3 %v8616_v62  ;;  %v6882_v11 = vor.u32 %v7850_v61, %v6879_v0 }
 0x1ef   : > { %4734 = vmatpush.bf16.msrb.mxu3 %v7014_v57  ;;  %v7059_v57 = vld [vmem:[#allocation8 + $0x654] sm:$0xf0]  ;;  %v7868_v8 = vld [vmem:[#allocation8 + $0x574] sm:$0xf] }
 0x1f0   : > { %4699 = vmatpush.bf16.msrb.mxu0 %v6678_v6  ;;  %v7002_v6 = vor.u32 %v7880_v47, %v6999_v1  ;;  %4724 = vmatpush.bf16.msrb.mxu2 %v6882_v11  ;;  %v6846_v47 = vor.u32 %v7841_v49, %v6843_v50  ;;  %v6966_v1 = vor.u32 %v7871_v51, %v6963_v32  ;;  %v7955_v11 = vld [vmem:[#allocation8 + $0x82c] sm:$0xf]  ;;  %v7275_v49 = vld [vmem:[#allocation8 + $0x804] sm:$0xf0] }
 0x1f1   : > { %4712 = vmatpush.bf16.msrb.mxu1 %v6774_v54  ;;  %v7095_v54 = vld [vmem:[#allocation8 + $0x69c] sm:$0xf0] }
 0x1f2   : > { %v7098_v40 = vor.u32 %v7904_v10, %v7095_v54  ;;  %v7158_v10 = vor.u32 %v7919_v58, %v7155_v59  ;;  %v7892_v54 = vld [vmem:[#allocation8 + $0x634] sm:$0xf]  ;;  %v7910_v58 = vld [vmem:[#allocation8 + $0x6c4] sm:$0xf]  ;;  %v7119_v59 = vld [vmem:[#allocation8 + $0x6cc] sm:$0xf0] }
 0x1f3   : > { %4735 = vmatpush.bf16.msrb.mxu3 %v7002_v6  ;;  %4677 = vmatmul.bf16.vlgmr.msra.gmra.mxu2 %v8561_v24  ;;  %v7299_v6 = vld [vmem:[#allocation8 + $0x834] sm:$0xf0] }
 0x1f4   : > { %4700 = vmatpush.bf16.msrb.mxu0 %v6666_v23  ;;  %v6990_v23 = vor.u32 %v7877_v14, %v6987_v63  ;;  %4725 = vmatpush.bf16.msrb.mxu2 %v6870_v27  ;;  %v7916_v14 = vld [vmem:[#allocation8 + $0x6f4] sm:$0xf]  ;;  %v7143_v63 = vld [vmem:[#allocation8 + $0x6fc] sm:$0xf0]  ;;  %v7889_v27 = vld [vmem:[#allocation8 + $0x61c] sm:$0xf] }
 0x1f5   : > { %4713 = vmatpush.bf16.msrb.mxu1 %v6762_v25  ;;  %v7083_v25 = vld [vmem:[#allocation8 + $0x684] sm:$0xf0] }
 0x1f6   : > { %v7086_v19 = vor.u32 %v7901_v22, %v7083_v25  ;;  %v6939_v22 = vld [vmem:[#allocation8 + $0x564] sm:$0xf0]  ;;  %v7146_v25 = vor.u32 %v7916_v14, %v7143_v63  ;;  %v6333_v63 = vld [vmem:[#allocation8 + $0x98] sm:$0xf] }
 0x1f7   : > { %4736 = vmatpush.bf16.msrb.mxu3 %v6990_v23  ;;  %v7050_v23 = vor.u32 %v7892_v54, %v7047_v13 }
 0x1f8   : > { %4701 = vmatpush.bf16.msrb.mxu0 %v6654_v39  ;;  %v6858_v39 = vor.u32 %v7844_v29, %v6855_v17  ;;  %v7035_v29 = vld [vmem:[#allocation8 + $0x624] sm:$0xf0]  ;;  %v7913_v17 = vld [vmem:[#allocation8 + $0x6dc] sm:$0xf] }
 0x1f9   : > { %4714 = vmatpush.bf16.msrb.mxu1 %v6750_v48  ;;  %v2945_v48 = vperm.slane %v8621_v41, 0  ;;  %v7038_v51 = vor.u32 %v7889_v27, %v7035_v29  ;;  %v7711_v29 = vld [vmem:[#allocation8 + $0x88] sm:$0xf0] }
 0x1fa   : > { %4726 = vmatpush.bf16.msrb.mxu2 %v6858_v39  ;;  %v6927_v39 = vld [vmem:[#allocation8 + $0x54c] sm:$0xf0] }
 0x1fb   : > { %4737 = vmatpush.bf16.msrb.mxu3 %v6978_v35 }
 0x1fc   : > { %4702 = vmatpush.bf16.msrb.mxu0 %v6642_v9  ;;  %v4496_v61 = vpop.f32.mrf.mxu0 }
 0x1fd   : > { %4715 = vmatpush.bf16.msrb.mxu1 %v6738_v3  ;;  %v4509_v0 = vpop.f32.mrf.mxu1  ;;  %v4497_v9 = vadd.f32 %v4496_v61, %v2945_v48  ;;  %v6831_v3 = vld [vmem:[#allocation8 + $0x48c] sm:$0xf0]  ;;  %v7949_v48 = vld [vmem:[#allocation8 + $0x7fc] sm:$0xf]  ;;  %v6930_v61 = vor.u32 %v7862_v45, %v6927_v39  ;;  %v7970_v45 = vld [vmem:[#allocation8 + $0x8a4] sm:$0xf] }
 0x1fe   : > { %4690 = vmatmul.bf16.vlgmr.msra.gmra.mxu3 %v8563_v4  ;;  %4727 = vmatpush.bf16.msrb.mxu2 %v6846_v47  ;;  %v6834_v15 = vor.u32 %v7838_v2, %v6831_v3  ;;  %v7717_v47 = vld [vmem:[#allocation8 + $0xb8] sm:$0xf0] }
 0x1ff   : > { %4703 = vmatmul.bf16.vlgmr.msrb.gmra.mxu0 %v8578_v42  ;;  %v4510_v12 = vadd.f32 %v4509_v0, %v4497_v9  ;;  %4738 = vmatpush.bf16.msrb.mxu3 %v6966_v1  ;;  %v6345_v0 = vld [vmem:[#allocation8 + $0xb0] sm:$0xf]  ;;  %v7278_v1 = vor.u32 %v7949_v48, %v7275_v49  ;;  %v7741_v3 = vld [vmem:[#allocation8 + $0x178] sm:$0xf0]  ;;  %v6309_v49 = vld [vmem:[#allocation8 + $0x68] sm:$0xf] }
 0x200   : > { %4747 = vmatpush.bf16.msra.mxu0 %v7110_v7  ;;  %4716 = vmatmul.bf16.vlgmr.msrb.gmra.mxu1 %v8580_v46  ;;  %v6951_v7 = vld [vmem:[#allocation8 + $0x57c] sm:$0xf0]  ;;  %v6441_v9 = vld [vmem:[#allocation8 + $0x170] sm:$0xf]  ;;  %v6346_v13 = vor.u32 %v7717_v47, %v6345_v0 }
 0x201   : > { %4760 = vmatpush.bf16.msra.mxu1 %v7206_v36  ;;  %v7062_v36 = vor.u32 %v7895_v56, %v7059_v57  ;;  %v6954_v20 = vor.u32 %v7868_v8, %v6951_v7  ;;  %v7886_v56 = vld [vmem:[#allocation8 + $0x604] sm:$0xf]  ;;  %v7023_v57 = vld [vmem:[#allocation8 + $0x60c] sm:$0xf0]  ;;  %v6442_v14 = vor.u32 %v7741_v3, %v6441_v9 }
 0x202   : > { %4728 = vmatpush.bf16.msrb.mxu2 %v6834_v15  ;;  %v7946_v8 = vld [vmem:[#allocation8 + $0x7e4] sm:$0xf]  ;;  %v7026_v7 = vor.u32 %v7886_v56, %v7023_v57  ;;  %v7732_v56 = vld [vmem:[#allocation8 + $0x130] sm:$0xf0]  ;;  %v7937_v57 = vld [vmem:[#allocation8 + $0x79c] sm:$0xf] }
 0x203   : > { %4739 = vmatpush.bf16.msrb.mxu3 %v6954_v20  ;;  %v7714_v15 = vld [vmem:[#allocation8 + $0xa0] sm:$0xf0] }
 0x204   : > { %4748 = vmatpush.bf16.msra.mxu0 %v7098_v40  ;;  %v7302_v40 = vor.u32 %v7955_v11, %v7299_v6  ;;  %v4522_v28 = vpop.f32.mrf.mxu2  ;;  %v4498_v44 = vpop.f32.mrf.mxu0  ;;  %v7976_v11 = vld [vmem:[#allocation8 + $0x8d4] sm:$0xf]  ;;  %v7383_v6 = vld [vmem:[#allocation8 + $0x8dc] sm:$0xf0]  ;;  %v6334_v27 = vor.u32 %v7714_v15, %v6333_v63  ;;  %v6537_v63 = vld [vmem:[#allocation8 + $0x230] sm:$0xf] }
 0x205   : > { %4761 = vmatpush.bf16.msra.mxu1 %v7194_v21  ;;  %v7865_v21 = vld [vmem:[#allocation8 + $0x55c] sm:$0xf]  ;;  %v4535_v18 = vpop.f32.mrf.mxu3  ;;  %v4511_v35 = vpop.f32.mrf.mxu1  ;;  %4729 = vmatmul.bf16.vlgmr.msrb.gmra.mxu2 %v8582_v52  ;;  %v7735_v44 = vld [vmem:[#allocation8 + $0x148] sm:$0xf0] }
 0x206   : > { %v6942_v37 = vor.u32 %v7865_v21, %v6939_v22  ;;  %4773 = vmatpush.bf16.msra.mxu2 %v7302_v40  ;;  %v7386_v40 = vor.u32 %v7976_v11, %v7383_v6  ;;  %v6429_v21 = vld [vmem:[#allocation8 + $0x158] sm:$0xf]  ;;  %v7738_v22 = vld [vmem:[#allocation8 + $0x160] sm:$0xf0]  ;;  %v7940_v35 = vld [vmem:[#allocation8 + $0x7b4] sm:$0xf] }
 0x207   : > { %v7765_v15 = vld [vmem:[#allocation8 + $0x238] sm:$0xf0] }
 0x208   : > { %4749 = vmatpush.bf16.msra.mxu0 %v7086_v19  ;;  %v7131_v19 = vld [vmem:[#allocation8 + $0x6e4] sm:$0xf0]  ;;  %4740 = vmatpush.bf16.msrb.mxu3 %v6942_v37  ;;  %v7239_v37 = vld [vmem:[#allocation8 + $0x7bc] sm:$0xf0] }
 0x209   : > { %4762 = vmatpush.bf16.msra.mxu1 %v7182_v30  ;;  %v4523_v30 = vadd.f32 %v4522_v28, %v4510_v12  ;;  %v7134_v32 = vor.u32 %v7913_v17, %v7131_v19  ;;  %v6430_v28 = vor.u32 %v7738_v22, %v6429_v21  ;;  %v7374_v19 = vor.u32 %v7973_v26, %v7371_v34  ;;  %v6285_v21 = vld [vmem:[#allocation8 + $0x38] sm:$0xf]  ;;  %v7702_v22 = vld [vmem:[#allocation8 + $0x40] sm:$0xf0] }
 0x20a   : > { %4774 = vmatpush.bf16.msra.mxu2 %v7290_v38  ;;  %v7359_v38 = vld [vmem:[#allocation8 + $0x8ac] sm:$0xf0]  ;;  %v6381_v26 = vld [vmem:[#allocation8 + $0xf8] sm:$0xf]  ;;  %v7726_v34 = vld [vmem:[#allocation8 + $0x100] sm:$0xf0] }
 0x20b   : > { %v8626_v50 = vadd.f32 %v4535_v18, %v4523_v30  ;;  %v6321_v18 = vld [vmem:[#allocation8 + $0x80] sm:$0xf] }
 0x20c   : > { %4750 = vmatpush.bf16.msra.mxu0 %v7074_v55  ;;  %v7979_v55 = vld [vmem:[#allocation8 + $0x8ec] sm:$0xf]  ;;  %v4524_v54 = vpop.f32.mrf.mxu2  ;;  %4741 = vmatpush.bf16.msrb.mxu3 %v6930_v61  ;;  %v6417_v30 = vld [vmem:[#allocation8 + $0x140] sm:$0xf]  ;;  %v6322_v39 = vor.u32 %v7711_v29, %v6321_v18  ;;  %v7347_v61 = vld [vmem:[#allocation8 + $0x894] sm:$0xf0]  ;;  %v6286_v18 = vor.u32 %v7702_v22, %v6285_v21 }
 0x20d   : > { %4763 = vmatpush.bf16.msra.mxu1 %v7170_v5  ;;  %v7395_v5 = vld [vmem:[#allocation8 + $0x8f4] sm:$0xf0]  ;;  %v4537_v12 = vpop.f32.mrf.mxu3  ;;  %v6418_v48 = vor.u32 %v7735_v44, %v6417_v30  ;;  %v7215_v54 = vld [vmem:[#allocation8 + $0x78c] sm:$0xf0]  ;;  %v6273_v30 = vld [vmem:[#allocation8 + $0x20] sm:$0xf] }
 0x20e   : > { %v7398_v2 = vor.u32 %v7979_v55, %v7395_v5  ;;  %4775 = vmatpush.bf16.msra.mxu2 %v7278_v1  ;;  %v7362_v55 = vor.u32 %v7970_v45, %v7359_v38  ;;  %v6405_v5 = vld [vmem:[#allocation8 + $0x128] sm:$0xf]  ;;  %v6297_v1 = vld [vmem:[#allocation8 + $0x50] sm:$0xf]  ;;  %v7964_v12 = vld [vmem:[#allocation8 + $0x874] sm:$0xf] }
 0x20f   : > { %4742 = vmatmul.bf16.vlgmr.msrb.gmra.mxu3 %v8584_v53  ;;  %v6406_v47 = vor.u32 %v7732_v56, %v6405_v5  ;;  %v6525_v29 = vld [vmem:[#allocation8 + $0x218] sm:$0xf]  ;;  %v7699_v44 = vld [vmem:[#allocation8 + $0x28] sm:$0xf0]  ;;  %v6369_v38 = vld [vmem:[#allocation8 + $0xe0] sm:$0xf] }
 0x210   : > { %4751 = vmatpush.bf16.msra.mxu0 %v7062_v36  ;;  %v7122_v36 = vor.u32 %v7910_v58, %v7119_v59  ;;  %4786 = vmatpush.bf16.msra.mxu3 %v7398_v2  ;;  %v7227_v58 = vld [vmem:[#allocation8 + $0x7a4] sm:$0xf0]  ;;  %v7967_v59 = vld [vmem:[#allocation8 + $0x88c] sm:$0xf]  ;;  %v7705_v2 = vld [vmem:[#allocation8 + $0x58] sm:$0xf0] }
 0x211   : > { %4764 = vmatpush.bf16.msra.mxu1 %v7158_v10  ;;  %v7263_v10 = vld [vmem:[#allocation8 + $0x7ec] sm:$0xf0]  ;;  %v7230_v3 = vor.u32 %v7937_v57, %v7227_v58  ;;  %v6513_v5 = vld [vmem:[#allocation8 + $0x200] sm:$0xf]  ;;  %v6274_v57 = vor.u32 %v7699_v44, %v6273_v30  ;;  %v7759_v58 = vld [vmem:[#allocation8 + $0x208] sm:$0xf0] }
 0x212   : > { %v7266_v20 = vor.u32 %v7946_v8, %v7263_v10  ;;  %v7350_v8 = vor.u32 %v7967_v59, %v7347_v61  ;;  %v7934_v10 = vld [vmem:[#allocation8 + $0x784] sm:$0xf]  ;;  %v6633_v59 = vld [vmem:[#allocation8 + $0x2f0] sm:$0xf]  ;;  %v7789_v61 = vld [vmem:[#allocation8 + $0x2f8] sm:$0xf0] }
 0x214   : > { %4752 = vmatpush.bf16.msra.mxu0 %v7050_v23  ;;  %v7943_v23 = vld [vmem:[#allocation8 + $0x7cc] sm:$0xf]  ;;  %4776 = vmatpush.bf16.msra.mxu2 %v7266_v20 }
 0x215   : > { %4765 = vmatpush.bf16.msra.mxu1 %v7146_v25  ;;  %v7251_v25 = vld [vmem:[#allocation8 + $0x7d4] sm:$0xf0]  ;;  %4787 = vmatpush.bf16.msra.mxu3 %v7386_v40 }
 0x216   : > { %v7254_v17 = vor.u32 %v7943_v23, %v7251_v25  ;;  %v7218_v23 = vor.u32 %v7934_v10, %v7215_v54  ;;  %v6514_v10 = vor.u32 %v7759_v58, %v6513_v5  ;;  %v7837_v54 = vld [vmem:[#allocation8 + $0x478] sm:$0xf0]  ;;  %v7804_v58 = vld [vmem:[#allocation8 + $0x370] sm:$0xf0] }
 0x218   : > { %4753 = vmatpush.bf16.msra.mxu0 %v7038_v51  ;;  %v7708_v51 = vld [vmem:[#allocation8 + $0x70] sm:$0xf0]  ;;  %4777 = vmatpush.bf16.msra.mxu2 %v7254_v17  ;;  %v7762_v17 = vld [vmem:[#allocation8 + $0x220] sm:$0xf0] }
 0x219   : > { %4766 = vmatpush.bf16.msra.mxu1 %v7134_v32  ;;  %4788 = vmatpush.bf16.msra.mxu3 %v7374_v19  ;;  %v7242_v32 = vor.u32 %v7940_v35, %v7239_v37  ;;  %v6310_v0 = vor.u32 %v7708_v51, %v6309_v49  ;;  %v6382_v19 = vor.u32 %v7726_v34, %v6381_v26 }
 0x21a   : > { %v6526_v51 = vor.u32 %v7762_v17, %v6525_v29  ;;  %v6609_v29 = vld [vmem:[#allocation8 + $0x2c0] sm:$0xf]  ;;  %v7783_v17 = vld [vmem:[#allocation8 + $0x2c8] sm:$0xf0] }
 0x21c   : > { %4754 = vmatpush.bf16.msra.mxu0 %v7026_v7  ;;  %4778 = vmatpush.bf16.msra.mxu2 %v7242_v32  ;;  %v4548_v9 = vpop.f32.mrf.mxu0  ;;  %v6393_v7 = vld [vmem:[#allocation8 + $0x110] sm:$0xf]  ;;  %v7958_v32 = vld [vmem:[#allocation8 + $0x844] sm:$0xf] }
 0x21d   : > { %4767 = vmatpush.bf16.msra.mxu1 %v7122_v36  ;;  %4789 = vmatpush.bf16.msra.mxu3 %v7362_v55  ;;  %v7729_v36 = vld [vmem:[#allocation8 + $0x118] sm:$0xf0]  ;;  %v4549_v11 = vadd.f32 %v4548_v9, %v8626_v50  ;;  %v4561_v6 = vpop.f32.mrf.mxu1  ;;  %v6538_v50 = vor.u32 %v7765_v15, %v6537_v63  ;;  %v7311_v55 = vld [vmem:[#allocation8 + $0x84c] sm:$0xf0]  ;;  %v6357_v9 = vld [vmem:[#allocation8 + $0xc8] sm:$0xf] }
 0x21e   : > { %v6394_v40 = vor.u32 %v7729_v36, %v6393_v7  ;;  %v6729_v7 = vld [vmem:[#allocation8 + $0x3b0] sm:$0xf]  ;;  %v7813_v36 = vld [vmem:[#allocation8 + $0x3b8] sm:$0xf0]  ;;  %v6621_v63 = vld [vmem:[#allocation8 + $0x2d8] sm:$0xf] }
 0x21f   : > { %4755 = vmatmul.bf16.vlgmr.msra.gmra.mxu0 %v8595_v60  ;;  %v4562_v20 = vadd.f32 %v4561_v6, %v4549_v11  ;;  %v6634_v11 = vor.u32 %v7789_v61, %v6633_v59  ;;  %v6825_v6 = vld [vmem:[#allocation8 + $0x470] sm:$0xf]  ;;  %v7786_v15 = vld [vmem:[#allocation8 + $0x2e0] sm:$0xf0]  ;;  %v6730_v21 = vor.u32 %v7813_v36, %v6729_v7  ;;  %v7801_v36 = vld [vmem:[#allocation8 + $0x358] sm:$0xf0] }
 0x220   : > { %4799 = vmatpush.bf16.msrb.mxu0 %v6346_v13  ;;  %4768 = vmatmul.bf16.vlgmr.msra.gmra.mxu1 %v8600_v43  ;;  %v7335_v13 = vld [vmem:[#allocation8 + $0x87c] sm:$0xf0]  ;;  %v6826_v22 = vor.u32 %v7837_v54, %v6825_v6  ;;  %v6622_v34 = vor.u32 %v7786_v15, %v6621_v63  ;;  %v6681_v7 = vld [vmem:[#allocation8 + $0x350] sm:$0xf]  ;;  %v7825_v54 = vld [vmem:[#allocation8 + $0x418] sm:$0xf0] }
 0x221   : > { %4812 = vmatpush.bf16.msrb.mxu1 %v6442_v14  ;;  %v6298_v14 = vor.u32 %v7705_v2, %v6297_v1  ;;  %4779 = vmatpush.bf16.msra.mxu2 %v7230_v3  ;;  %v7338_v25 = vor.u32 %v7964_v12, %v7335_v13  ;;  %v6261_v1 = vld [vmem:[#allocation8 + $0x8] sm:$0xf]  ;;  %v7696_v2 = vld [vmem:[#allocation8 + $0x10] sm:$0xf0]  ;;  %v7314_v3 = vor.u32 %v7958_v32, %v7311_v55  ;;  %v6777_v6 = vld [vmem:[#allocation8 + $0x410] sm:$0xf] }
 0x222   : > { %4790 = vmatpush.bf16.msra.mxu3 %v7350_v8  ;;  %v7720_v8 = vld [vmem:[#allocation8 + $0xd0] sm:$0xf0]  ;;  %v6501_v12 = vld [vmem:[#allocation8 + $0x1e8] sm:$0xf]  ;;  %v6262_v13 = vor.u32 %v7696_v2, %v6261_v1  ;;  %v6465_v2 = vld [vmem:[#allocation8 + $0x1a0] sm:$0xf] }
 0x223   : > { %v6597_v32 = vld [vmem:[#allocation8 + $0x2a8] sm:$0xf]  ;;  %v7780_v55 = vld [vmem:[#allocation8 + $0x2b0] sm:$0xf0]  ;;  %v6573_v63 = vld [vmem:[#allocation8 + $0x278] sm:$0xf] }
 0x224   : > { %4800 = vmatpush.bf16.msrb.mxu0 %v6334_v27  ;;  %v7961_v27 = vld [vmem:[#allocation8 + $0x85c] sm:$0xf]  ;;  %v4574_v35 = vpop.f32.mrf.mxu2  ;;  %v4550_v37 = vpop.f32.mrf.mxu0  ;;  %v6598_v61 = vor.u32 %v7780_v55, %v6597_v32  ;;  %v7828_v1 = vld [vmem:[#allocation8 + $0x430] sm:$0xf0]  ;;  %v7774_v15 = vld [vmem:[#allocation8 + $0x280] sm:$0xf0] }
 0x225   : > { %4813 = vmatpush.bf16.msrb.mxu1 %v6430_v28  ;;  %v7323_v28 = vld [vmem:[#allocation8 + $0x864] sm:$0xf0]  ;;  %4780 = vmatpush.bf16.msra.mxu2 %v7218_v23  ;;  %v4563_v49 = vpop.f32.mrf.mxu1  ;;  %v4587_v56 = vpop.f32.mrf.mxu3  ;;  %v6717_v23 = vld [vmem:[#allocation8 + $0x398] sm:$0xf]  ;;  %v7807_v37 = vld [vmem:[#allocation8 + $0x388] sm:$0xf0] }
 0x226   : > { %4791 = vmatpush.bf16.msra.mxu3 %v7338_v25  ;;  %v7326_v45 = vor.u32 %v7961_v27, %v7323_v28  ;;  %v7810_v25 = vld [vmem:[#allocation8 + $0x3a0] sm:$0xf0]  ;;  %v6489_v28 = vld [vmem:[#allocation8 + $0x1d0] sm:$0xf]  ;;  %v6477_v49 = vld [vmem:[#allocation8 + $0x1b8] sm:$0xf] }
 0x227   : > { %v7834_v27 = vld [vmem:[#allocation8 + $0x460] sm:$0xf0]  ;;  %v6718_v30 = vor.u32 %v7810_v25, %v6717_v23  ;;  %v6574_v25 = vor.u32 %v7774_v15, %v6573_v63  ;;  %v6897_v32 = vld [vmem:[#allocation8 + $0x500] sm:$0xf] }
 0x228   : > { %4801 = vmatpush.bf16.msrb.mxu0 %v6322_v39  ;;  %v7723_v39 = vld [vmem:[#allocation8 + $0xe8] sm:$0xf0]  ;;  %4781 = vmatmul.bf16.vlgmr.msra.gmra.mxu2 %v8613_v16 }
 0x229   : > { %4814 = vmatpush.bf16.msrb.mxu1 %v6418_v48  ;;  %v4575_v48 = vadd.f32 %v4574_v35, %v4562_v20  ;;  %4825 = vmatpush.bf16.msrb.mxu2 %v6538_v50  ;;  %v6358_v20 = vor.u32 %v7720_v8, %v6357_v9  ;;  %v6813_v50 = vld [vmem:[#allocation8 + $0x458] sm:$0xf]  ;;  %v6705_v35 = vld [vmem:[#allocation8 + $0x380] sm:$0xf]  ;;  %v7747_v9 = vld [vmem:[#allocation8 + $0x1a8] sm:$0xf0] }
 0x22a   : > { %4792 = vmatpush.bf16.msra.mxu3 %v7326_v45  ;;  %v6814_v44 = vor.u32 %v7834_v27, %v6813_v50  ;;  %v6706_v5 = vor.u32 %v7807_v37, %v6705_v35  ;;  %v6765_v50 = vld [vmem:[#allocation8 + $0x3f8] sm:$0xf] }
 0x22c   : > { %4802 = vmatpush.bf16.msrb.mxu0 %v6310_v0  ;;  %v8633_v0 = vadd.f32 %v4587_v56, %v4575_v48  ;;  %v7831_v48 = vld [vmem:[#allocation8 + $0x448] sm:$0xf0] }
 0x22d   : > { %4815 = vmatpush.bf16.msrb.mxu1 %v6406_v47  ;;  %v6370_v47 = vor.u32 %v7723_v39, %v6369_v38  ;;  %4826 = vmatpush.bf16.msrb.mxu2 %v6526_v51  ;;  %v6610_v38 = vor.u32 %v7783_v17, %v6609_v29  ;;  %v6801_v39 = vld [vmem:[#allocation8 + $0x440] sm:$0xf]  ;;  %v7750_v51 = vld [vmem:[#allocation8 + $0x1c0] sm:$0xf0]  ;;  %v7771_v29 = vld [vmem:[#allocation8 + $0x268] sm:$0xf0] }
 0x22e   : > { %4793 = vmatpush.bf16.msra.mxu3 %v7314_v3  ;;  %v6802_v56 = vor.u32 %v7831_v48, %v6801_v39  ;;  %v6478_v59 = vor.u32 %v7750_v51, %v6477_v49  ;;  %v7777_v3 = vld [vmem:[#allocation8 + $0x298] sm:$0xf0]  ;;  %v6909_v17 = vld [vmem:[#allocation8 + $0x518] sm:$0xf]  ;;  %v7819_v39 = vld [vmem:[#allocation8 + $0x3e8] sm:$0xf0] }
 0x22f   : > { %v6549_v49 = vld [vmem:[#allocation8 + $0x248] sm:$0xf]  ;;  %v7768_v51 = vld [vmem:[#allocation8 + $0x250] sm:$0xf0] }
 0x230   : > { %4803 = vmatpush.bf16.msrb.mxu0 %v6298_v14  ;;  %v7756_v14 = vld [vmem:[#allocation8 + $0x1f0] sm:$0xf0] }
 0x231   : > { %4816 = vmatpush.bf16.msrb.mxu1 %v6394_v40  ;;  %v4576_v40 = vpop.f32.mrf.mxu2  ;;  %4827 = vmatpush.bf16.msrb.mxu2 %v6514_v10  ;;  %v6502_v26 = vor.u32 %v7756_v14, %v6501_v12  ;;  %v6466_v10 = vor.u32 %v7747_v9, %v6465_v2  ;;  %v6453_v12 = vld [vmem:[#allocation8 + $0x188] sm:$0xf]  ;;  %v7744_v14 = vld [vmem:[#allocation8 + $0x190] sm:$0xf0] }
 0x232   : > { %4838 = vmatpush.bf16.msrb.mxu3 %v6634_v11  ;;  %v7861_v40 = vld [vmem:[#allocation8 + $0x538] sm:$0xf0]  ;;  %v6454_v23 = vor.u32 %v7744_v14, %v6453_v12  ;;  %v6741_v2 = vld [vmem:[#allocation8 + $0x3c8] sm:$0xf]  ;;  %v7816_v9 = vld [vmem:[#allocation8 + $0x3d0] sm:$0xf0] }
 0x233   : > { %4794 = vmatmul.bf16.vlgmr.msra.gmra.mxu3 %v8616_v62  ;;  %v6742_v12 = vor.u32 %v7816_v9, %v6741_v2 }
 0x234   : > { %4804 = vmatpush.bf16.msrb.mxu0 %v6286_v18  ;;  %v7753_v18 = vld [vmem:[#allocation8 + $0x1d8] sm:$0xf0] }
 0x235   : > { %4817 = vmatpush.bf16.msrb.mxu1 %v6382_v19  ;;  %v4589_v19 = vpop.f32.mrf.mxu3  ;;  %4828 = vmatpush.bf16.msrb.mxu2 %v6502_v26  ;;  %v6490_v45 = vor.u32 %v7753_v18, %v6489_v28  ;;  %v6669_v26 = vld [vmem:[#allocation8 + $0x338] sm:$0xf]  ;;  %v7822_v28 = vld [vmem:[#allocation8 + $0x400] sm:$0xf0]  ;;  %v6561_v18 = vld [vmem:[#allocation8 + $0x260] sm:$0xf] }
 0x236   : > { %4839 = vmatpush.bf16.msrb.mxu3 %v6622_v34  ;;  %v7798_v34 = vld [vmem:[#allocation8 + $0x340] sm:$0xf0]  ;;  %v6766_v35 = vor.u32 %v7822_v28, %v6765_v50  ;;  %v6562_v37 = vor.u32 %v7771_v29, %v6561_v18  ;;  %v6993_v50 = vld [vmem:[#allocation8 + $0x5c0] sm:$0xf] }
 0x237   : > { %v7858_v19 = vld [vmem:[#allocation8 + $0x520] sm:$0xf0] }
 0x238   : > { %4805 = vmatpush.bf16.msrb.mxu0 %v6274_v57  ;;  %v6693_v57 = vld [vmem:[#allocation8 + $0x368] sm:$0xf]  ;;  %v6910_v48 = vor.u32 %v7858_v19, %v6909_v17  ;;  %v7089_v17 = vld [vmem:[#allocation8 + $0x680] sm:$0xf]  ;;  %v7903_v19 = vld [vmem:[#allocation8 + $0x688] sm:$0xf0] }
 0x239   : > { %4818 = vmatpush.bf16.msrb.mxu1 %v6370_v47  ;;  %4829 = vmatpush.bf16.msrb.mxu2 %v6490_v45  ;;  %v6789_v47 = vld [vmem:[#allocation8 + $0x428] sm:$0xf]  ;;  %v7795_v45 = vld [vmem:[#allocation8 + $0x328] sm:$0xf0] }
 0x23a   : > { %4840 = vmatpush.bf16.msrb.mxu3 %v6610_v38  ;;  %v6790_v8 = vor.u32 %v7828_v1, %v6789_v47  ;;  %v6753_v38 = vld [vmem:[#allocation8 + $0x3e0] sm:$0xf]  ;;  %v6550_v47 = vor.u32 %v7768_v51, %v6549_v49  ;;  %v7792_v1 = vld [vmem:[#allocation8 + $0x310] sm:$0xf0] }
 0x23c   : > { %4806 = vmatpush.bf16.msrb.mxu0 %v6262_v13  ;;  %v8639_v13 = vpop.f32.mrf.mxu0 }
 0x23d   : > { %4819 = vmatpush.bf16.msrb.mxu1 %v6358_v20  ;;  %4830 = vmatpush.bf16.msrb.mxu2 %v6478_v59  ;;  %v6921_v20 = vld [vmem:[#allocation8 + $0x530] sm:$0xf]  ;;  %v6645_v59 = vld [vmem:[#allocation8 + $0x308] sm:$0xf] }
 0x23e   : > { %4841 = vmatpush.bf16.msrb.mxu3 %v6598_v61  ;;  %v6922_v27 = vor.u32 %v7861_v40, %v6921_v20  ;;  %v6754_v61 = vor.u32 %v7819_v39, %v6753_v38  ;;  %v7101_v40 = vld [vmem:[#allocation8 + $0x698] sm:$0xf]  ;;  %v7876_v38 = vld [vmem:[#allocation8 + $0x5b0] sm:$0xf0] }
 0x23f   : > { %4807 = vmatmul.bf16.vlgmr.msrb.gmra.mxu0 %v8557_v31  ;;  %v6585_v31 = vld [vmem:[#allocation8 + $0x290] sm:$0xf] }
 0x240   : > { %4851 = vmatpush.bf16.msra.mxu0 %v6730_v21  ;;  %4820 = vmatmul.bf16.vlgmr.msrb.gmra.mxu1 %v8559_v33  ;;  %v6694_v33 = vor.u32 %v7804_v58, %v6693_v57  ;;  %v6586_v11 = vor.u32 %v7777_v3, %v6585_v31  ;;  %v6682_v21 = vor.u32 %v7801_v36, %v6681_v7  ;;  %v7885_v57 = vld [vmem:[#allocation8 + $0x5f8] sm:$0xf0]  ;;  %v7209_v7 = vld [vmem:[#allocation8 + $0x770] sm:$0xf] }
 0x241   : > { %4864 = vmatpush.bf16.msra.mxu1 %v6826_v22  ;;  %v6778_v22 = vor.u32 %v7825_v54, %v6777_v6  ;;  %4831 = vmatpush.bf16.msrb.mxu2 %v6466_v10  ;;  %v7933_v36 = vld [vmem:[#allocation8 + $0x778] sm:$0xf0]  ;;  %v6885_v10 = vld [vmem:[#allocation8 + $0x4e8] sm:$0xf]  ;;  %v7005_v6 = vld [vmem:[#allocation8 + $0x5d8] sm:$0xf] }
 0x242   : > { %4842 = vmatpush.bf16.msrb.mxu3 %v6586_v11  ;;  %v7852_v11 = vld [vmem:[#allocation8 + $0x4f0] sm:$0xf0]  ;;  %v7882_v54 = vld [vmem:[#allocation8 + $0x5e0] sm:$0xf0]  ;;  %v7210_v15 = vor.u32 %v7933_v36, %v7209_v7  ;;  %v6837_v36 = vld [vmem:[#allocation8 + $0x488] sm:$0xf] }
 0x243   : > { %v8642_v14 = vpop.f32.mrf.mxu1  ;;  %v6886_v20 = vor.u32 %v7852_v11, %v6885_v10  ;;  %v7840_v10 = vld [vmem:[#allocation8 + $0x490] sm:$0xf0]  ;;  %v6957_v11 = vld [vmem:[#allocation8 + $0x578] sm:$0xf] }
 0x244   : > { %4852 = vmatpush.bf16.msra.mxu0 %v6718_v30  ;;  %v6670_v30 = vor.u32 %v7798_v34, %v6669_v26  ;;  %v4602_v55 = vpop.f32.mrf.mxu0  ;;  %v6873_v26 = vld [vmem:[#allocation8 + $0x4d0] sm:$0xf]  ;;  %v7849_v34 = vld [vmem:[#allocation8 + $0x4d8] sm:$0xf0] }
 0x245   : > { %4865 = vmatpush.bf16.msra.mxu1 %v6814_v44  ;;  %v6657_v44 = vld [vmem:[#allocation8 + $0x320] sm:$0xf]  ;;  %4832 = vmatpush.bf16.msrb.mxu2 %v6454_v23  ;;  %v7006_v23 = vor.u32 %v7882_v54, %v7005_v6  ;;  %v6874_v29 = vor.u32 %v7849_v34, %v6873_v26  ;;  %v7900_v55 = vld [vmem:[#allocation8 + $0x670] sm:$0xf0]  ;;  %v7305_v6 = vld [vmem:[#allocation8 + $0x830] sm:$0xf] }
 0x246   : > { %4843 = vmatpush.bf16.msrb.mxu3 %v6574_v25  ;;  %v6658_v58 = vor.u32 %v7795_v45, %v6657_v44  ;;  %v7930_v25 = vld [vmem:[#allocation8 + $0x760] sm:$0xf0]  ;;  %v6981_v45 = vld [vmem:[#allocation8 + $0x5a8] sm:$0xf]  ;;  %v7957_v54 = vld [vmem:[#allocation8 + $0x838] sm:$0xf0] }
 0x247   : > { %v7149_v26 = vld [vmem:[#allocation8 + $0x6f8] sm:$0xf]  ;;  %v7918_v34 = vld [vmem:[#allocation8 + $0x700] sm:$0xf0] }
 0x248   : > { %4853 = vmatpush.bf16.msra.mxu0 %v6706_v5  ;;  %v7855_v5 = vld [vmem:[#allocation8 + $0x508] sm:$0xf0]  ;;  %4833 = vmatmul.bf16.vlgmr.msrb.gmra.mxu2 %v8561_v24  ;;  %v6646_v24 = vor.u32 %v7792_v1, %v6645_v59  ;;  %v6969_v59 = vld [vmem:[#allocation8 + $0x590] sm:$0xf] }
 0x249   : > { %4866 = vmatpush.bf16.msra.mxu1 %v6802_v56  ;;  %4877 = vmatpush.bf16.msra.mxu2 %v6922_v27  ;;  %v7017_v56 = vld [vmem:[#allocation8 + $0x5f0] sm:$0xf]  ;;  %v6898_v31 = vor.u32 %v7855_v5, %v6897_v32  ;;  %v7879_v27 = vld [vmem:[#allocation8 + $0x5c8] sm:$0xf0]  ;;  %v7077_v32 = vld [vmem:[#allocation8 + $0x668] sm:$0xf] }
 0x24a   : > { %4844 = vmatpush.bf16.msrb.mxu3 %v6562_v37  ;;  %v7018_v3 = vor.u32 %v7885_v57, %v7017_v56  ;;  %v6994_v44 = vor.u32 %v7879_v27, %v6993_v50  ;;  %v6861_v37 = vld [vmem:[#allocation8 + $0x4b8] sm:$0xf]  ;;  %v7173_v5 = vld [vmem:[#allocation8 + $0x728] sm:$0xf]  ;;  %v7924_v56 = vld [vmem:[#allocation8 + $0x730] sm:$0xf0] }
 0x24b   : > { %v4615_v39 = vpop.f32.mrf.mxu1  ;;  %v6849_v57 = vld [vmem:[#allocation8 + $0x4a0] sm:$0xf]  ;;  %v7065_v1 = vld [vmem:[#allocation8 + $0x650] sm:$0xf]  ;;  %v7174_v2 = vor.u32 %v7924_v56, %v7173_v5  ;;  %v7867_v27 = vld [vmem:[#allocation8 + $0x568] sm:$0xf0] }
 0x24c   : > { %4854 = vmatpush.bf16.msra.mxu0 %v6694_v33  ;;  %v7113_v33 = vld [vmem:[#allocation8 + $0x6b0] sm:$0xf]  ;;  %v6945_v50 = vld [vmem:[#allocation8 + $0x560] sm:$0xf]  ;;  %v7864_v39 = vld [vmem:[#allocation8 + $0x550] sm:$0xf0] }
 0x24d   : > { %4867 = vmatpush.bf16.msra.mxu1 %v6790_v8  ;;  %4878 = vmatpush.bf16.msra.mxu2 %v6910_v48  ;;  %v7909_v8 = vld [vmem:[#allocation8 + $0x6b8] sm:$0xf0]  ;;  %v7090_v48 = vor.u32 %v7903_v19, %v7089_v17  ;;  %v7150_v17 = vor.u32 %v7918_v34, %v7149_v26  ;;  %v7041_v19 = vld [vmem:[#allocation8 + $0x620] sm:$0xf]  ;;  %v7029_v56 = vld [vmem:[#allocation8 + $0x608] sm:$0xf] }
 0x24e   : > { %4845 = vmatpush.bf16.msrb.mxu3 %v6550_v47  ;;  %v7114_v63 = vor.u32 %v7909_v8, %v7113_v33  ;;  %v7078_v47 = vor.u32 %v7900_v55, %v7077_v32  ;;  %v7921_v33 = vld [vmem:[#allocation8 + $0x718] sm:$0xf0]  ;;  %v7401_v32 = vld [vmem:[#allocation8 + $0x8f0] sm:$0xf] }
 0x24f   : > { %v7981_v55 = vld [vmem:[#allocation8 + $0x8f8] sm:$0xf0] }
 0x250   : > { %4855 = vmatpush.bf16.msra.mxu0 %v6682_v21  ;;  %v7906_v21 = vld [vmem:[#allocation8 + $0x6a0] sm:$0xf0]  ;;  %v7969_v26 = vld [vmem:[#allocation8 + $0x898] sm:$0xf0] }
 0x251   : > { %4868 = vmatpush.bf16.msra.mxu1 %v6778_v22  ;;  %4879 = vmatpush.bf16.msra.mxu2 %v6898_v31  ;;  %v7197_v22 = vld [vmem:[#allocation8 + $0x758] sm:$0xf]  ;;  %v7102_v28 = vor.u32 %v7906_v21, %v7101_v40  ;;  %v7897_v31 = vld [vmem:[#allocation8 + $0x658] sm:$0xf0]  ;;  %v7894_v21 = vld [vmem:[#allocation8 + $0x640] sm:$0xf0] }
 0x252   : > { %4890 = vmatpush.bf16.msra.mxu3 %v7018_v3  ;;  %v7198_v18 = vor.u32 %v7930_v25, %v7197_v22  ;;  %v7161_v3 = vld [vmem:[#allocation8 + $0x710] sm:$0xf]  ;;  %v7053_v40 = vld [vmem:[#allocation8 + $0x638] sm:$0xf]  ;;  %v7306_v25 = vor.u32 %v7957_v54, %v7305_v6 }
 0x253   : > { %4846 = vmatmul.bf16.vlgmr.msrb.gmra.mxu3 %v8563_v4  ;;  %v7846_v4 = vld [vmem:[#allocation8 + $0x4c0] sm:$0xf0] }
 0x254   : > { %4856 = vmatpush.bf16.msra.mxu0 %v6670_v30  ;;  %v7185_v30 = vld [vmem:[#allocation8 + $0x740] sm:$0xf]  ;;  %v6862_v51 = vor.u32 %v7846_v4, %v6861_v37 }
 0x255   : > { %4869 = vmatpush.bf16.msra.mxu1 %v6766_v35  ;;  %4880 = vmatpush.bf16.msra.mxu2 %v6886_v20  ;;  %v7927_v35 = vld [vmem:[#allocation8 + $0x748] sm:$0xf0]  ;;  %v6838_v20 = vor.u32 %v7840_v10, %v6837_v36  ;;  %v7137_v4 = vld [vmem:[#allocation8 + $0x6e0] sm:$0xf]  ;;  %v7945_v36 = vld [vmem:[#allocation8 + $0x7d8] sm:$0xf0] }
 0x256   : > { %4891 = vmatpush.bf16.msra.mxu3 %v7006_v23  ;;  %v7186_v49 = vor.u32 %v7927_v35, %v7185_v30  ;;  %v7891_v30 = vld [vmem:[#allocation8 + $0x628] sm:$0xf0]  ;;  %v6946_v35 = vor.u32 %v7867_v27, %v6945_v50  ;;  %v7377_v10 = vld [vmem:[#allocation8 + $0x8c0] sm:$0xf] }
 0x258   : > { %4857 = vmatpush.bf16.msra.mxu0 %v6658_v58  ;;  %v7843_v58 = vld [vmem:[#allocation8 + $0x4a8] sm:$0xf0] }
 0x259   : > { %4870 = vmatpush.bf16.msra.mxu1 %v6754_v61  ;;  %4881 = vmatpush.bf16.msra.mxu2 %v6874_v29  ;;  %v7873_v61 = vld [vmem:[#allocation8 + $0x598] sm:$0xf0]  ;;  %v6850_v9 = vor.u32 %v7843_v58, %v6849_v57  ;;  %v7054_v29 = vor.u32 %v7894_v21, %v7053_v40  ;;  %v7888_v57 = vld [vmem:[#allocation8 + $0x610] sm:$0xf0]  ;;  %v4601_v40 = vadd.f32 %v8639_v13, %v8633_v0  ;;  %v7233_v21 = vld [vmem:[#allocation8 + $0x7a0] sm:$0xf] }
 0x25a   : > { %4892 = vmatpush.bf16.msra.mxu3 %v6994_v44  ;;  %v6970_v7 = vor.u32 %v7873_v61, %v6969_v59  ;;  %v7125_v61 = vld [vmem:[#allocation8 + $0x6c8] sm:$0xf]  ;;  %v7341_v13 = vld [vmem:[#allocation8 + $0x878] sm:$0xf] }
 0x25c   : > { %4858 = vmatpush.bf16.msra.mxu0 %v6646_v24  ;;  %v4652_v8 = vpop.f32.mrf.mxu0  ;;  %v7870_v24 = vld [vmem:[#allocation8 + $0x580] sm:$0xf0] }
 0x25d   : > { %4871 = vmatpush.bf16.msra.mxu1 %v6742_v12  ;;  %4882 = vmatpush.bf16.msra.mxu2 %v6862_v51  ;;  %v6958_v23 = vor.u32 %v7870_v24, %v6957_v11  ;;  %v7042_v51 = vor.u32 %v7891_v30, %v7041_v19  ;;  %v7975_v11 = vld [vmem:[#allocation8 + $0x8c8] sm:$0xf0]  ;;  %v7966_v19 = vld [vmem:[#allocation8 + $0x880] sm:$0xf0] }
 0x25e   : > { %v7378_v54 = vor.u32 %v7975_v11, %v7377_v10 }
 0x25f   : > { %4859 = vmatmul.bf16.vlgmr.msra.gmra.mxu0 %v8578_v42  ;;  %v6982_v42 = vor.u32 %v7876_v38, %v6981_v45  ;;  %v7915_v45 = vld [vmem:[#allocation8 + $0x6e8] sm:$0xf0]  ;;  %v6933_v38 = vld [vmem:[#allocation8 + $0x548] sm:$0xf] }
 0x260   : > { %4903 = vmatpush.bf16.msrb.mxu0 %v7114_v63  ;;  %4872 = vmatmul.bf16.vlgmr.msra.gmra.mxu1 %v8580_v46  ;;  %v2946_v46 = vperm.slane %v8621_v41, 1  ;;  %v7066_v41 = vor.u32 %v7897_v31, %v7065_v1  ;;  %v4665_v63 = vpop.f32.mrf.mxu1  ;;  %v6934_v58 = vor.u32 %v7864_v39, %v6933_v38  ;;  %v7269_v1 = vld [vmem:[#allocation8 + $0x7e8] sm:$0xf]  ;;  %v7978_v31 = vld [vmem:[#allocation8 + $0x8e0] sm:$0xf0] }
 0x261   : > { %4916 = vmatpush.bf16.msrb.mxu1 %v7210_v15  ;;  %4893 = vmatpush.bf16.msra.mxu3 %v6982_v42  ;;  %v7162_v15 = vor.u32 %v7921_v33, %v7161_v3  ;;  %v7138_v42 = vor.u32 %v7915_v45, %v7137_v4  ;;  %v7963_v4 = vld [vmem:[#allocation8 + $0x868] sm:$0xf0] }
 0x262   : > { %v4653_v12 = vadd.f32 %v4652_v8, %v2946_v46  ;;  %4883 = vmatpush.bf16.msra.mxu2 %v6850_v9  ;;  %v7912_v46 = vld [vmem:[#allocation8 + $0x6d0] sm:$0xf0]  ;;  %v7389_v9 = vld [vmem:[#allocation8 + $0x8d8] sm:$0xf] }
 0x263   : > { %v7126_v3 = vor.u32 %v7912_v46, %v7125_v61  ;;  %v7390_v8 = vor.u32 %v7978_v31, %v7389_v9 }
 0x264   : > { %4904 = vmatpush.bf16.msrb.mxu0 %v7102_v28  ;;  %v8648_v22 = vadd.f32 %v4665_v63, %v4653_v12  ;;  %v7293_v28 = vld [vmem:[#allocation8 + $0x818] sm:$0xf]  ;;  %v4654_v44 = vpop.f32.mrf.mxu0  ;;  %v7365_v63 = vld [vmem:[#allocation8 + $0x8a8] sm:$0xf] }
 0x265   : > { %4917 = vmatpush.bf16.msrb.mxu1 %v7198_v18  ;;  %4894 = vmatpush.bf16.msra.mxu3 %v6970_v7  ;;  %v7954_v18 = vld [vmem:[#allocation8 + $0x820] sm:$0xf0]  ;;  %v7257_v7 = vld [vmem:[#allocation8 + $0x7d0] sm:$0xf]  ;;  %v7245_v12 = vld [vmem:[#allocation8 + $0x7b8] sm:$0xf] }
 0x266   : > { %4884 = vmatpush.bf16.msra.mxu2 %v6838_v20  ;;  %v7294_v37 = vor.u32 %v7954_v18, %v7293_v28  ;;  %v7258_v24 = vor.u32 %v7945_v36, %v7257_v7  ;;  %v4626_v6 = vpop.f32.mrf.mxu2  ;;  %v7221_v18 = vld [vmem:[#allocation8 + $0x788] sm:$0xf] }
 0x268   : > { %4905 = vmatpush.bf16.msrb.mxu0 %v7090_v48  ;;  %v7281_v48 = vld [vmem:[#allocation8 + $0x800] sm:$0xf]  ;;  %v4667_v5 = vpop.f32.mrf.mxu1 }
 0x269   : > { %4918 = vmatpush.bf16.msrb.mxu1 %v7186_v49  ;;  %4895 = vmatpush.bf16.msra.mxu3 %v6958_v23  ;;  %v7951_v49 = vld [vmem:[#allocation8 + $0x808] sm:$0xf0] }
 0x26a   : > { %4929 = vmatpush.bf16.msrb.mxu2 %v7306_v25  ;;  %v7282_v59 = vor.u32 %v7951_v49, %v7281_v48  ;;  %v7939_v23 = vld [vmem:[#allocation8 + $0x7a8] sm:$0xf0]  ;;  %v7353_v25 = vld [vmem:[#allocation8 + $0x890] sm:$0xf] }
 0x26b   : > { %4885 = vmatmul.bf16.vlgmr.msra.gmra.mxu2 %v8582_v52  ;;  %v7030_v52 = vor.u32 %v7888_v57, %v7029_v56  ;;  %v7234_v34 = vor.u32 %v7939_v23, %v7233_v21  ;;  %v7354_v28 = vor.u32 %v7969_v26, %v7353_v25 }
 0x26c   : > { %4906 = vmatpush.bf16.msrb.mxu0 %v7078_v47  ;;  %v7402_v47 = vor.u32 %v7981_v55, %v7401_v32  ;;  %v7960_v32 = vld [vmem:[#allocation8 + $0x850] sm:$0xf0] }
 0x26d   : > { %4919 = vmatpush.bf16.msrb.mxu1 %v7174_v2  ;;  %4896 = vmatpush.bf16.msra.mxu3 %v6946_v35  ;;  %v7948_v2 = vld [vmem:[#allocation8 + $0x7f0] sm:$0xf0] }
 0x26e   : > { %4930 = vmatpush.bf16.msrb.mxu2 %v7294_v37  ;;  %v7270_v33 = vor.u32 %v7948_v2, %v7269_v1  ;;  %v7329_v37 = vld [vmem:[#allocation8 + $0x860] sm:$0xf] }
 0x26f   : > { %v7330_v39 = vor.u32 %v7963_v4, %v7329_v37 }
 0x270   : > { %4907 = vmatpush.bf16.msrb.mxu0 %v7066_v41  ;;  %v7942_v41 = vld [vmem:[#allocation8 + $0x7c0] sm:$0xf0] }
 0x271   : > { %4920 = vmatpush.bf16.msrb.mxu1 %v7162_v15  ;;  %4897 = vmatpush.bf16.msra.mxu3 %v6934_v58  ;;  %v7972_v15 = vld [vmem:[#allocation8 + $0x8b0] sm:$0xf0]  ;;  %v7246_v20 = vor.u32 %v7942_v41, %v7245_v12  ;;  %v4639_v0 = vpop.f32.mrf.mxu3 }
 0x272   : > { %4931 = vmatpush.bf16.msrb.mxu2 %v7282_v59 }
 0x274   : > { %4908 = vmatpush.bf16.msrb.mxu0 %v7054_v29  ;;  %4898 = vmatmul.bf16.vlgmr.msra.gmra.mxu3 %v8584_v53  ;;  %v7366_v53 = vor.u32 %v7972_v15, %v7365_v63  ;;  %v7936_v29 = vld [vmem:[#allocation8 + $0x790] sm:$0xf0] }
 0x275   : > { %4921 = vmatpush.bf16.msrb.mxu1 %v7150_v17  ;;  %4942 = vmatpush.bf16.msrb.mxu3 %v7402_v47  ;;  %v4628_v17 = vpop.f32.mrf.mxu2  ;;  %v7222_v44 = vor.u32 %v7936_v29, %v7221_v18 }
 0x276   : > { %4932 = vmatpush.bf16.msrb.mxu2 %v7270_v33 }
 0x278   : > { %4909 = vmatpush.bf16.msrb.mxu0 %v7042_v51  ;;  %v7317_v51 = vld [vmem:[#allocation8 + $0x848] sm:$0xf] }
 0x279   : > { %4922 = vmatpush.bf16.msrb.mxu1 %v7138_v42  ;;  %4943 = vmatpush.bf16.msrb.mxu3 %v7390_v8  ;;  %v4641_v48 = vpop.f32.mrf.mxu3  ;;  %v7318_v55 = vor.u32 %v7960_v32, %v7317_v51 }
 0x27a   : > { %4933 = vmatpush.bf16.msrb.mxu2 %v7258_v24 }
 0x27c   : > { %4910 = vmatpush.bf16.msrb.mxu0 %v7030_v52 }
 0x27d   : > { %4923 = vmatpush.bf16.msrb.mxu1 %v7126_v3  ;;  %4944 = vmatpush.bf16.msrb.mxu3 %v7378_v54  ;;  %v4717_v27 = vpop.f32.mrf.mxu1  ;;  %v4678_v49 = vpop.f32.mrf.mxu2 }
 0x27e   : > { %4934 = vmatpush.bf16.msrb.mxu2 %v7246_v20  ;;  %v4679_v47 = vadd.f32 %v4678_v49, %v8648_v22 }
 0x27f   : > { %4911 = vmatmul.bf16.vlgmr.msrb.gmra.mxu0 %v8595_v60  ;;  %v4614_v60 = vadd.f32 %v8642_v14, %v4601_v40  ;;  %v7342_v14 = vor.u32 %v7966_v19, %v7341_v13 }
 0x280   : > { %4924 = vmatmul.bf16.vlgmr.msrb.gmra.mxu1 %v8600_v43  ;;  %v4704_v43 = vpop.f32.mrf.mxu0 }
 0x281   : > { %v4627_v50 = vadd.f32 %v4626_v6, %v4614_v60  ;;  %4945 = vmatpush.bf16.msrb.mxu3 %v7366_v53  ;;  %v4691_v42 = vpop.f32.mrf.mxu3 }
 0x282   : > { %4935 = vmatpush.bf16.msrb.mxu2 %v7234_v34  ;;  %v4692_v52 = vadd.f32 %v4691_v42, %v4679_v47 }
 0x283   : > { %v4640_v30 = vadd.f32 %v4639_v0, %v4627_v50 }
 0x285   : > { %v4955_v35 = vmax.f32 %v4640_v30, 0.0  ;;  %4946 = vmatpush.bf16.msrb.mxu3 %v7354_v28  ;;  %v4719_v38 = vpop.f32.mrf.mxu1  ;;  %v4680_v5 = vpop.f32.mrf.mxu2 }
 0x286   : > { %4936 = vmatpush.bf16.msrb.mxu2 %v7222_v44 }
 0x287   : > { %4958 = vst [vmem:[%s8659_s26] sm:$0xff] %v4955_v35 }
 0x288   : > { %v4706_v45 = vpop.f32.mrf.mxu0 }
 0x289   : > { %4947 = vmatpush.bf16.msrb.mxu3 %v7342_v14  ;;  %4937 = vmatmul.bf16.vlgmr.msrb.gmra.mxu2 %v8613_v16  ;;  %v4693_v56 = vpop.f32.mrf.mxu3  ;;  %v4705_v16 = vadd.f32 %v4704_v43, %v4692_v52 }
 0x28b   : > { %v4718_v31 = vadd.f32 %v4717_v27, %v4705_v16 }
 0x28d   : > { %4948 = vmatpush.bf16.msrb.mxu3 %v7330_v39  ;;  %v4730_v57 = vpop.f32.mrf.mxu2 }
 0x28e   : > { %v4731_v3 = vadd.f32 %v4730_v57, %v4718_v31 }
 0x291   : > { %4949 = vmatpush.bf16.msrb.mxu3 %v7318_v55 }
 0x292   : > { %v4743_v46 = vpop.f32.mrf.mxu3 }
 0x293   : > { %v4744_v33 = vadd.f32 %v4743_v46, %v4731_v3 }
 0x294   : > { %4950 = vmatmul.bf16.vlgmr.msrb.gmra.mxu3 %v8616_v62  ;;  %v8078_v62 = vld [vmem:[#allocation10] sm:$0x7] }
 0x295   : > { %v4732_v61 = vpop.f32.mrf.mxu2  ;;  %v2947_v36 = vperm.slane %v8078_v62, 2 }
 0x29a   : > { %v4745_v9 = vpop.f32.mrf.mxu3 }
 0x29c   : > { %v4756_v58 = vpop.f32.mrf.mxu0 }
 0x29d   : > { %v4769_v59 = vpop.f32.mrf.mxu1  ;;  %v4757_v7 = vadd.f32 %v4756_v58, %v4744_v33 }
 0x29f   : > { %v4770_v10 = vadd.f32 %v4769_v59, %v4757_v7 }
 0x2a4   : > { %v4758_v1 = vpop.f32.mrf.mxu0 }
 0x2a5   : > { %v4771_v2 = vpop.f32.mrf.mxu1 }
 0x2ab   : > { %v4782_v8 = vpop.f32.mrf.mxu2 }
 0x2ac   : > { %v4783_v54 = vadd.f32 %v4782_v8, %v4770_v10 }
 0x2b3   : > { %v4784_v22 = vpop.f32.mrf.mxu2 }
 0x2b6   : > { %v4795_v41 = vpop.f32.mrf.mxu3 }
 0x2b7   : > { %v4796_v63 = vadd.f32 %v4795_v41, %v4783_v54 }
 0x2b9   : > { %v4956_v15 = vmax.f32 %v4796_v63, 0.0 }
 0x2bb   : > { %4959 = vst [vmem:[%s8659_s26 + $0x8] sm:$0xff] %v4956_v15 }
 0x2bc   : > { %v4808_v11 = vpop.f32.mrf.mxu0 }
 0x2bd   : > { %v4821_v24 = vpop.f32.mrf.mxu1  ;;  %v4809_v6 = vadd.f32 %v4808_v11, %v2947_v36 }
 0x2be   : > { %v4797_v53 = vpop.f32.mrf.mxu3 }
 0x2bf   : > { %v4822_v12 = vadd.f32 %v4821_v24, %v4809_v6 }
 0x2c4   : > { %v4810_v20 = vpop.f32.mrf.mxu0 }
 0x2c5   : > { %v4823_v40 = vpop.f32.mrf.mxu1 }
 0x2cb   : > { %v4834_v21 = vpop.f32.mrf.mxu2 }
 0x2cc   : > { %v4835_v0 = vadd.f32 %v4834_v21, %v4822_v12 }
 0x2d3   : > { %v4836_v26 = vpop.f32.mrf.mxu2 }
 0x2d6   : > { %v4847_v60 = vpop.f32.mrf.mxu3 }
 0x2d7   : > { %v4848_v30 = vadd.f32 %v4847_v60, %v4835_v0 }
 0x2dc   : > { %v4860_v23 = vpop.f32.mrf.mxu0 }
 0x2dd   : > { %v4873_v25 = vpop.f32.mrf.mxu1  ;;  %v4861_v35 = vadd.f32 %v4860_v23, %v4848_v30 }
 0x2de   : > { %v4849_v43 = vpop.f32.mrf.mxu3 }
 0x2df   : > { %v4874_v14 = vadd.f32 %v4873_v25, %v4861_v35 }
 0x2e4   : > { %v4862_v34 = vpop.f32.mrf.mxu0 }
 0x2e5   : > { %v4875_v50 = vpop.f32.mrf.mxu1 }
 0x2ee   : > { %v4886_v27 = vpop.f32.mrf.mxu2 }
 0x2ef   : > { %v4887_v37 = vadd.f32 %v4886_v27, %v4874_v14 }
 0x2f6   : > { %v4888_v29 = vpop.f32.mrf.mxu2 }
 0x2f7   : > { %v4899_v17 = vpop.f32.mrf.mxu3 }
 0x2f8   : > { %v4900_v4 = vadd.f32 %v4899_v17, %v4887_v37 }
 0x2fc   : > { %v4912_v28 = vpop.f32.mrf.mxu0 }
 0x2fd   : > { %v4925_v18 = vpop.f32.mrf.mxu1  ;;  %v4913_v38 = vadd.f32 %v4912_v28, %v4900_v4 }
 0x2ff   : > { %v4901_v44 = vpop.f32.mrf.mxu3  ;;  %v4926_v39 = vadd.f32 %v4925_v18, %v4913_v38 }
 0x304   : > { %v4914_v13 = vpop.f32.mrf.mxu0 }
 0x305   : > { %v4927_v19 = vpop.f32.mrf.mxu1 }
 0x30c   : > { %v4938_v45 = vpop.f32.mrf.mxu2 }
 0x30d   : > { %v4939_v48 = vadd.f32 %v4938_v45, %v4926_v39 }
 0x314   : > { %v4940_v49 = vpop.f32.mrf.mxu2 }
 0x317   : > { %v4951_v51 = vpop.f32.mrf.mxu3 }
 0x318   : > { %v4952_v32 = vadd.f32 %v4951_v51, %v4939_v48 }
 0x31a   : > { %v4957_v55 = vmax.f32 %v4952_v32, 0.0 }
 0x31c   : > { %4960 = vst [vmem:[%s8659_s26 + $0x10] sm:$0xff] %v4957_v55 }
 0x31d   : > { %8256 = shalt.err (!%p8253_p9)
}
 0x31e   : > { %8004 = dma.vmem_to_hbm [thread:$0]  (%p8426_p4), %s4976_s28, 384, %s4978_s29, %s4962_s30  }
 0x31f   : > { %v4953_v5 = vpop.f32.mrf.mxu3 }
 0x320 PF: > { %s4989_s7 = sand.u32 1, %s8291_s18   ;;  %p8715_p10 = scmp.ge.s32.totalorder %s8303_s21, 2 }
 0x321   : > { %s4990_s14 = scalar_lea.sflag [#allocation4], %s4989_s7 }
 0x322   : > { %p8024_p11 = pnand %p8715_p10, %p8430_p6 }
 0x324   : > { %p8025_p13 = pneg %p8024_p11 }
 0x326   : > { %8286 = dma.done.wait (%p8025_p13), %s4990_s14, 384  }
 0x327   : > { %8288 = vsyncadd (%p8025_p13), %s4990_s14, 4294966912  ;;  %p20_p0 = scmp.ge.s32.totalorder %s8404_s6, 4   ;;  %s8716_s18 = smov %s8295_s19 }
 0x328   : > { %s8717_s19 = smov %s8299_s20  ;;  %s8718_s20 = smov %s8415_s10 }
 0x329   : > { %s8719_s21 = smov %s8404_s6  ;;  %22 = sbr.rel (!%p20_p0) target bundleno = 9 (0x9), region = 101 }
 0x32e   :  { %4996 = vsyncpa [#allocation3], 1 }
 0x32f   :  { %4998 = vsyncpa [#allocation3 + $0x1], 1 }
 0x330   :  { %4999 = vsyncpa [#allocation6], 1 }
 0x331   :  { %5000 = vsyncpa [#allocation9], 1 }
 0x332   :  { %5001 = vsyncpa [#allocation4], 1 }
 0x333   :  { %5003 = vsyncpa [#allocation4 + $0x1], 1 }

</bundles_post_ra>
